<compile_context>
chip_gen: v5e
topology: v5e:2x2
jax: 0.10.0
libtpu: 0.0.40
codegen_flags: <defaults>
</compile_context>

<pallas_src>
import jax
import jax.numpy as jnp
import numpy as np
from jax import lax
from jax.experimental import pallas as pl
from jax.experimental.pallas import tpu as pltpu

KSIZE = 7
PAD = (KSIZE - 1) // 2


def _make_kernel(C, H, W, c_chunk):
    HW = H * W
    n_chunks = C // c_chunk

    def spatial_attention_kernel(w_ref, x_ref, o_ref, avg_pad, max_pad):
        # w_ref:   SMEM f32[2*7*7]   flattened conv weight (in_ch, kh, kw)
        # x_ref:   VMEM (1, C, H*W)  one batch element, lane-dense
        # o_ref:   VMEM (1, C, H*W)
        # avg_pad, max_pad: VMEM (H+6, W+6) zero-padded conv scratch

        # --- zero-padded halo buffers (tiny; zeroed per step — megacore safe) ---
        avg_pad[...] = jnp.zeros(avg_pad.shape, avg_pad.dtype)
        max_pad[...] = jnp.zeros(max_pad.shape, max_pad.dtype)

        # --- pass 1: streaming channel sum / max on the flat (lane-dense) layout ---
        def reduce_body(c, carry):
            s, m = carry
            start = pl.multiple_of(c * c_chunk, c_chunk)
            xc = x_ref[0, pl.ds(start, c_chunk), :].astype(jnp.float32)  # (chunk, HW)
            s = s + jnp.sum(xc, axis=0, keepdims=True)
            m = jnp.maximum(m, jnp.max(xc, axis=0, keepdims=True))
            return s, m

        s0 = jnp.zeros((1, HW), jnp.float32)
        m0 = jnp.full((1, HW), -jnp.inf, jnp.float32)
        s, m = lax.fori_loop(0, n_chunks, reduce_body, (s0, m0))
        avg_flat = s * (1.0 / C)        # (1, HW)
        max_flat = m                    # (1, HW)

        # --- scatter the two tiny reduced maps into the padded (H, W) scratch ---
        # (row-by-row static slices; avoids an in-kernel relayout reshape)
        for h in range(H):
            avg_pad[PAD + h:PAD + h + 1, PAD:PAD + W] = avg_flat[:, h * W:(h + 1) * W]
            max_pad[PAD + h:PAD + h + 1, PAD:PAD + W] = max_flat[:, h * W:(h + 1) * W]

        # --- 7x7 conv over (avg, max) -> 1 channel ---
        ap = avg_pad[...]               # (H+6, W+6) f32
        mp = max_pad[...]
        # hoist the 7 lane (dj) shifts out of the tap loop
        ap_sh = [ap[:, dj:dj + W] for dj in range(KSIZE)]   # each (H+6, W)
        mp_sh = [mp[:, dj:dj + W] for dj in range(KSIZE)]

        # 4 independent accumulator chains: (di parity) x (avg, max)
        acc_a = [jnp.zeros((H, W), jnp.float32), jnp.zeros((H, W), jnp.float32)]
        acc_m = [jnp.zeros((H, W), jnp.float32), jnp.zeros((H, W), jnp.float32)]
        for di in range(KSIZE):
            p = di & 1
            for dj in range(KSIZE):
                w_avg = w_ref[di * KSIZE + dj]
                w_max = w_ref[KSIZE * KSIZE + di * KSIZE + dj]
                acc_a[p] = acc_a[p] + w_avg * ap_sh[dj][di:di + H, :]
                acc_m[p] = acc_m[p] + w_max * mp_sh[dj][di:di + H, :]
        conv = (acc_a[0] + acc_a[1]) + (acc_m[0] + acc_m[1])   # (H, W)

        attn2d = jax.nn.sigmoid(conv)                          # (H, W)
        # back to the flat (1, HW) layout for the broadcast multiply
        attn_flat = jnp.concatenate(
            [attn2d[h:h + 1, :] for h in range(H)], axis=1)    # (1, HW)

        # --- pass 2: streaming attn * x -> out (lane-dense loads & stores) ---
        @pl.loop(0, n_chunks)
        def _(c):
            start = pl.multiple_of(c * c_chunk, c_chunk)
            xc = x_ref[0, pl.ds(start, c_chunk), :].astype(jnp.float32)
            o_ref[0, pl.ds(start, c_chunk), :] = (xc * attn_flat).astype(o_ref.dtype)

    return spatial_attention_kernel


def spatial_attention(x, weight):
    """x: (N, C, H, W); weight: (1, 2, 7, 7) conv weight (no bias)."""
    N, C, H, W = x.shape
    HW = H * W
    x_flat = x.reshape(N, C, HW)                       # lane-dense layout
    w_flat = weight.reshape(-1).astype(jnp.float32)    # (2*7*7,), (in_ch, kh, kw) order

    # channel chunk for the streaming passes (largest divisor of C <= 8)
    c_chunk = 1
    for cand in range(min(C, 8), 0, -1):
        if C % cand == 0:
            c_chunk = cand
            break

    # VMEM budget: in + out blocks are double-buffered, plus the tiny conv scratch.
    block_bytes = C * HW * x.dtype.itemsize
    scratch_bytes = 2 * (H + 2 * PAD) * (W + 2 * PAD) * 4
    vmem_needed = 4 * block_bytes + scratch_bytes + (2 << 20)
    vmem_limit = int(min(max(vmem_needed, 32 * 1024 * 1024), 64 * 1024 * 1024))
    # TODO(synk): for very large C*H*W slabs that exceed ~64 MiB (v7x) even with this
    # limit, add a spatial grid axis over H with a +-3-row halo instead of full slabs.

    kernel = _make_kernel(C, H, W, c_chunk)

    out_flat = pl.pallas_call(
        kernel,
        out_shape=jax.ShapeDtypeStruct((N, C, HW), x.dtype),
        grid_spec=pltpu.PrefetchScalarGridSpec(
            num_scalar_prefetch=0,
            grid=(N,),
            in_specs=[
                pl.BlockSpec(memory_space=pltpu.MemorySpace.SMEM),   # conv weights
                pl.BlockSpec((1, C, HW), lambda n: (n, 0, 0)),       # x (lane-dense)
            ],
            out_specs=pl.BlockSpec((1, C, HW), lambda n: (n, 0, 0)),
            scratch_shapes=[
                pltpu.VMEM((H + 2 * PAD, W + 2 * PAD), jnp.float32),
                pltpu.VMEM((H + 2 * PAD, W + 2 * PAD), jnp.float32),
            ],
        ),
        compiler_params=pltpu.CompilerParams(
            dimension_semantics=("parallel",),        # batch elems are independent (v7x 2-TC)
            vmem_limit_bytes=vmem_limit,
        ),
        cost_estimate=pl.CostEstimate(
            flops=int(N * H * W * (3 * C + 4 * KSIZE * KSIZE)),
            transcendentals=int(N * H * W),
            bytes_accessed=int(2 * N * C * HW * x.dtype.itemsize + w_flat.size * 4),
        ),
    )(w_flat, x_flat)

    return out_flat.reshape(N, C, H, W)


def reference(x, weight):
    avg = jnp.mean(x, axis=1, keepdims=True)
    mx = jnp.max(x, axis=1, keepdims=True)
    cat = jnp.concatenate([avg, mx], axis=1)
    conv = lax.conv_general_dilated(
        cat, weight, window_strides=(1, 1), padding=((PAD, PAD), (PAD, PAD)),
        dimension_numbers=("NCHW", "OIHW", "NCHW"))
    return jax.nn.sigmoid(conv) * x


if __name__ == "__main__":
    key = jax.random.PRNGKey(0)
    kx, kw = jax.random.split(key)

    N, C, H, W = 2, 4, 16, 16
    x = jax.random.normal(kx, (N, C, H, W), dtype=jnp.float32)

    # Deterministic Conv2d(2, 1, 7, bias=False) weight init (Kaiming-uniform-like bound).
    fan_in = 2 * KSIZE * KSIZE
    bound = 1.0 / np.sqrt(fan_in)
    weight = jax.random.uniform(kw, (1, 2, KSIZE, KSIZE),
                                minval=-bound, maxval=bound, dtype=jnp.float32)

    out = spatial_attention(x, weight)
    out = jax.block_until_ready(out)

    ref = reference(x, weight)
    np.testing.assert_allclose(np.asarray(out), np.asarray(ref), rtol=1e-5, atol=1e-5)

    print("KERNEL_OK")
</pallas_src>

<mosaic_0001>
module attributes {stable_mosaic.version = 11 : i64} {
  func.func @spatial_attention_kernel(%arg0: i32, %arg1: memref<98xf32, #tpu.memory_space<smem>>, %arg2: memref<1x4x256xf32, #tpu.memory_space<vmem>>, %arg3: memref<1x4x256xf32, #tpu.memory_space<vmem>>, %arg4: memref<22x22xf32, #tpu.memory_space<vmem>>, %arg5: memref<22x22xf32, #tpu.memory_space<vmem>>) attributes {dimension_semantics = [#tpu.dimension_semantics<parallel>], iteration_bounds = array<i64: 2>, scalar_prefetch = 0 : i64, scratch_operands = 2 : i64, tpu.core_type = #tpu.core_type<tc>, window_params = [{transform_indices = @transform_0, window_bounds = array<i64: 98>}, {transform_indices = @transform_1, window_bounds = array<i64: 1, 4, 256>}, {transform_indices = @transform_2, window_bounds = array<i64: 1, 4, 256>}]} {
    %cst = arith.constant 0.000000e+00 : f32
    %0 = vector.broadcast %cst : f32 to vector<22x22xf32>
    %c0 = arith.constant 0 : index
    %c0_0 = arith.constant 0 : index
    %1 = vector.load %arg4[%c0, %c0_0] : memref<22x22xf32, #tpu.memory_space<vmem>>, vector<22x22xf32>
    tpu.vector_store %arg4[%c0, %c0_0], %0 {strides = array<i32>} : memref<22x22xf32, #tpu.memory_space<vmem>>, vector<22x22xf32>,
    %cst_1 = arith.constant 0.000000e+00 : f32
    %2 = vector.broadcast %cst_1 : f32 to vector<22x22xf32>
    %c0_2 = arith.constant 0 : index
    %c0_3 = arith.constant 0 : index
    %3 = vector.load %arg5[%c0_2, %c0_3] : memref<22x22xf32, #tpu.memory_space<vmem>>, vector<22x22xf32>
    tpu.vector_store %arg5[%c0_2, %c0_3], %2 {strides = array<i32>} : memref<22x22xf32, #tpu.memory_space<vmem>>, vector<22x22xf32>,
    %cst_4 = arith.constant 0.000000e+00 : f32
    %4 = vector.broadcast %cst_4 : f32 to vector<1x256xf32>
    %cst_5 = arith.constant 0xFF800000 : f32
    %5 = vector.broadcast %cst_5 : f32 to vector<1x256xf32>
    %c0_i32 = arith.constant 0 : i32
    %c4_i32 = arith.constant 4 : i32
    %6 = arith.muli %c0_i32, %c4_i32 : i32
    %7 = tpu.assume_multiple %6, 4 : i32
    %c0_6 = arith.constant 0 : index
    %8 = arith.index_cast %7 : i32 to index
    %c0_7 = arith.constant 0 : index
    %9 = vector.load %arg2[%c0_6, %8, %c0_7] : memref<1x4x256xf32, #tpu.memory_space<vmem>>, vector<1x4x256xf32>
    %10 = vector.shape_cast %9 : vector<1x4x256xf32> to vector<4x256xf32>
    %cst_8 = arith.constant dense<0.000000e+00> : vector<256xf32>
    %11 = vector.multi_reduction <add>, %10, %cst_8 [0] : vector<4x256xf32> to vector<256xf32>
    %12 = vector.shape_cast %11 : vector<256xf32> to vector<1x256xf32>
    %13 = arith.addf %4, %12 : vector<1x256xf32>
    %cst_9 = arith.constant dense<0xFF800000> : vector<256xf32>
    %14 = vector.multi_reduction <maximumf>, %10, %cst_9 [0] : vector<4x256xf32> to vector<256xf32>
    %15 = vector.shape_cast %14 : vector<256xf32> to vector<1x256xf32>
    %16 = arith.maximumf %5, %15 : vector<1x256xf32>
    %c1_i32 = arith.constant 1 : i32
    %cst_10 = arith.constant 2.500000e-01 : f32
    %17 = vector.broadcast %cst_10 : f32 to vector<1x256xf32>
    %18 = arith.mulf %13, %17 : vector<1x256xf32>
    %19 = vector.extract_strided_slice %18 {offsets = [0, 0], sizes = [1, 16], strides = [1, 1]} : vector<1x256xf32> to vector<1x16xf32>
    %c3 = arith.constant 3 : index
    %c3_11 = arith.constant 3 : index
    %20 = vector.load %arg4[%c3, %c3_11] : memref<22x22xf32, #tpu.memory_space<vmem>>, vector<1x16xf32>
    tpu.vector_store %arg4[%c3, %c3_11], %19 {strides = array<i32>} : memref<22x22xf32, #tpu.memory_space<vmem>>, vector<1x16xf32>,
    %21 = vector.extract_strided_slice %16 {offsets = [0, 0], sizes = [1, 16], strides = [1, 1]} : vector<1x256xf32> to vector<1x16xf32>
    %c3_12 = arith.constant 3 : index
    %c3_13 = arith.constant 3 : index
    %22 = vector.load %arg5[%c3_12, %c3_13] : memref<22x22xf32, #tpu.memory_space<vmem>>, vector<1x16xf32>
    tpu.vector_store %arg5[%c3_12, %c3_13], %21 {strides = array<i32>} : memref<22x22xf32, #tpu.memory_space<vmem>>, vector<1x16xf32>,
    %23 = vector.extract_strided_slice %18 {offsets = [0, 16], sizes = [1, 16], strides = [1, 1]} : vector<1x256xf32> to vector<1x16xf32>
    %c4 = arith.constant 4 : index
    %c3_14 = arith.constant 3 : index
    %24 = vector.load %arg4[%c4, %c3_14] : memref<22x22xf32, #tpu.memory_space<vmem>>, vector<1x16xf32>
    tpu.vector_store %arg4[%c4, %c3_14], %23 {strides = array<i32>} : memref<22x22xf32, #tpu.memory_space<vmem>>, vector<1x16xf32>,
    %25 = vector.extract_strided_slice %16 {offsets = [0, 16], sizes = [1, 16], strides = [1, 1]} : vector<1x256xf32> to vector<1x16xf32>
    %c4_15 = arith.constant 4 : index
    %c3_16 = arith.constant 3 : index
    %26 = vector.load %arg5[%c4_15, %c3_16] : memref<22x22xf32, #tpu.memory_space<vmem>>, vector<1x16xf32>
    tpu.vector_store %arg5[%c4_15, %c3_16], %25 {strides = array<i32>} : memref<22x22xf32, #tpu.memory_space<vmem>>, vector<1x16xf32>,
    %27 = vector.extract_strided_slice %18 {offsets = [0, 32], sizes = [1, 16], strides = [1, 1]} : vector<1x256xf32> to vector<1x16xf32>
    %c5 = arith.constant 5 : index
    %c3_17 = arith.constant 3 : index
    %28 = vector.load %arg4[%c5, %c3_17] : memref<22x22xf32, #tpu.memory_space<vmem>>, vector<1x16xf32>
    tpu.vector_store %arg4[%c5, %c3_17], %27 {strides = array<i32>} : memref<22x22xf32, #tpu.memory_space<vmem>>, vector<1x16xf32>,
    %29 = vector.extract_strided_slice %16 {offsets = [0, 32], sizes = [1, 16], strides = [1, 1]} : vector<1x256xf32> to vector<1x16xf32>
    %c5_18 = arith.constant 5 : index
    %c3_19 = arith.constant 3 : index
    %30 = vector.load %arg5[%c5_18, %c3_19] : memref<22x22xf32, #tpu.memory_space<vmem>>, vector<1x16xf32>
    tpu.vector_store %arg5[%c5_18, %c3_19], %29 {strides = array<i32>} : memref<22x22xf32, #tpu.memory_space<vmem>>, vector<1x16xf32>,
    %31 = vector.extract_strided_slice %18 {offsets = [0, 48], sizes = [1, 16], strides = [1, 1]} : vector<1x256xf32> to vector<1x16xf32>
    %c6 = arith.constant 6 : index
    %c3_20 = arith.constant 3 : index
    %32 = vector.load %arg4[%c6, %c3_20] : memref<22x22xf32, #tpu.memory_space<vmem>>, vector<1x16xf32>
    tpu.vector_store %arg4[%c6, %c3_20], %31 {strides = array<i32>} : memref<22x22xf32, #tpu.memory_space<vmem>>, vector<1x16xf32>,
    %33 = vector.extract_strided_slice %16 {offsets = [0, 48], sizes = [1, 16], strides = [1, 1]} : vector<1x256xf32> to vector<1x16xf32>
    %c6_21 = arith.constant 6 : index
    %c3_22 = arith.constant 3 : index
    %34 = vector.load %arg5[%c6_21, %c3_22] : memref<22x22xf32, #tpu.memory_space<vmem>>, vector<1x16xf32>
    tpu.vector_store %arg5[%c6_21, %c3_22], %33 {strides = array<i32>} : memref<22x22xf32, #tpu.memory_space<vmem>>, vector<1x16xf32>,
    %35 = vector.extract_strided_slice %18 {offsets = [0, 64], sizes = [1, 16], strides = [1, 1]} : vector<1x256xf32> to vector<1x16xf32>
    %c7 = arith.constant 7 : index
    %c3_23 = arith.constant 3 : index
    %36 = vector.load %arg4[%c7, %c3_23] : memref<22x22xf32, #tpu.memory_space<vmem>>, vector<1x16xf32>
    tpu.vector_store %arg4[%c7, %c3_23], %35 {strides = array<i32>} : memref<22x22xf32, #tpu.memory_space<vmem>>, vector<1x16xf32>,
    %37 = vector.extract_strided_slice %16 {offsets = [0, 64], sizes = [1, 16], strides = [1, 1]} : vector<1x256xf32> to vector<1x16xf32>
    %c7_24 = arith.constant 7 : index
    %c3_25 = arith.constant 3 : index
    %38 = vector.load %arg5[%c7_24, %c3_25] : memref<22x22xf32, #tpu.memory_space<vmem>>, vector<1x16xf32>
    tpu.vector_store %arg5[%c7_24, %c3_25], %37 {strides = array<i32>} : memref<22x22xf32, #tpu.memory_space<vmem>>, vector<1x16xf32>,
    %39 = vector.extract_strided_slice %18 {offsets = [0, 80], sizes = [1, 16], strides = [1, 1]} : vector<1x256xf32> to vector<1x16xf32>
    %c8 = arith.constant 8 : index
    %c3_26 = arith.constant 3 : index
    %40 = vector.load %arg4[%c8, %c3_26] : memref<22x22xf32, #tpu.memory_space<vmem>>, vector<1x16xf32>
    tpu.vector_store %arg4[%c8, %c3_26], %39 {strides = array<i32>} : memref<22x22xf32, #tpu.memory_space<vmem>>, vector<1x16xf32>,
    %41 = vector.extract_strided_slice %16 {offsets = [0, 80], sizes = [1, 16], strides = [1, 1]} : vector<1x256xf32> to vector<1x16xf32>
    %c8_27 = arith.constant 8 : index
    %c3_28 = arith.constant 3 : index
    %42 = vector.load %arg5[%c8_27, %c3_28] : memref<22x22xf32, #tpu.memory_space<vmem>>, vector<1x16xf32>
    tpu.vector_store %arg5[%c8_27, %c3_28], %41 {strides = array<i32>} : memref<22x22xf32, #tpu.memory_space<vmem>>, vector<1x16xf32>,
    %43 = vector.extract_strided_slice %18 {offsets = [0, 96], sizes = [1, 16], strides = [1, 1]} : vector<1x256xf32> to vector<1x16xf32>
    %c9 = arith.constant 9 : index
    %c3_29 = arith.constant 3 : index
    %44 = vector.load %arg4[%c9, %c3_29] : memref<22x22xf32, #tpu.memory_space<vmem>>, vector<1x16xf32>
    tpu.vector_store %arg4[%c9, %c3_29], %43 {strides = array<i32>} : memref<22x22xf32, #tpu.memory_space<vmem>>, vector<1x16xf32>,
    %45 = vector.extract_strided_slice %16 {offsets = [0, 96], sizes = [1, 16], strides = [1, 1]} : vector<1x256xf32> to vector<1x16xf32>
    %c9_30 = arith.constant 9 : index
    %c3_31 = arith.constant 3 : index
    %46 = vector.load %arg5[%c9_30, %c3_31] : memref<22x22xf32, #tpu.memory_space<vmem>>, vector<1x16xf32>
    tpu.vector_store %arg5[%c9_30, %c3_31], %45 {strides = array<i32>} : memref<22x22xf32, #tpu.memory_space<vmem>>, vector<1x16xf32>,
    %47 = vector.extract_strided_slice %18 {offsets = [0, 112], sizes = [1, 16], strides = [1, 1]} : vector<1x256xf32> to vector<1x16xf32>
    %c10 = arith.constant 10 : index
    %c3_32 = arith.constant 3 : index
    %48 = vector.load %arg4[%c10, %c3_32] : memref<22x22xf32, #tpu.memory_space<vmem>>, vector<1x16xf32>
    tpu.vector_store %arg4[%c10, %c3_32], %47 {strides = array<i32>} : memref<22x22xf32, #tpu.memory_space<vmem>>, vector<1x16xf32>,
    %49 = vector.extract_strided_slice %16 {offsets = [0, 112], sizes = [1, 16], strides = [1, 1]} : vector<1x256xf32> to vector<1x16xf32>
    %c10_33 = arith.constant 10 : index
    %c3_34 = arith.constant 3 : index
    %50 = vector.load %arg5[%c10_33, %c3_34] : memref<22x22xf32, #tpu.memory_space<vmem>>, vector<1x16xf32>
    tpu.vector_store %arg5[%c10_33, %c3_34], %49 {strides = array<i32>} : memref<22x22xf32, #tpu.memory_space<vmem>>, vector<1x16xf32>,
    %51 = vector.extract_strided_slice %18 {offsets = [0, 128], sizes = [1, 16], strides = [1, 1]} : vector<1x256xf32> to vector<1x16xf32>
    %c11 = arith.constant 11 : index
    %c3_35 = arith.constant 3 : index
    %52 = vector.load %arg4[%c11, %c3_35] : memref<22x22xf32, #tpu.memory_space<vmem>>, vector<1x16xf32>
    tpu.vector_store %arg4[%c11, %c3_35], %51 {strides = array<i32>} : memref<22x22xf32, #tpu.memory_space<vmem>>, vector<1x16xf32>,
    %53 = vector.extract_strided_slice %16 {offsets = [0, 128], sizes = [1, 16], strides = [1, 1]} : vector<1x256xf32> to vector<1x16xf32>
    %c11_36 = arith.constant 11 : index
    %c3_37 = arith.constant 3 : index
    %54 = vector.load %arg5[%c11_36, %c3_37] : memref<22x22xf32, #tpu.memory_space<vmem>>, vector<1x16xf32>
    tpu.vector_store %arg5[%c11_36, %c3_37], %53 {strides = array<i32>} : memref<22x22xf32, #tpu.memory_space<vmem>>, vector<1x16xf32>,
    %55 = vector.extract_strided_slice %18 {offsets = [0, 144], sizes = [1, 16], strides = [1, 1]} : vector<1x256xf32> to vector<1x16xf32>
    %c12 = arith.constant 12 : index
    %c3_38 = arith.constant 3 : index
    %56 = vector.load %arg4[%c12, %c3_38] : memref<22x22xf32, #tpu.memory_space<vmem>>, vector<1x16xf32>
    tpu.vector_store %arg4[%c12, %c3_38], %55 {strides = array<i32>} : memref<22x22xf32, #tpu.memory_space<vmem>>, vector<1x16xf32>,
    %57 = vector.extract_strided_slice %16 {offsets = [0, 144], sizes = [1, 16], strides = [1, 1]} : vector<1x256xf32> to vector<1x16xf32>
    %c12_39 = arith.constant 12 : index
    %c3_40 = arith.constant 3 : index
    %58 = vector.load %arg5[%c12_39, %c3_40] : memref<22x22xf32, #tpu.memory_space<vmem>>, vector<1x16xf32>
    tpu.vector_store %arg5[%c12_39, %c3_40], %57 {strides = array<i32>} : memref<22x22xf32, #tpu.memory_space<vmem>>, vector<1x16xf32>,
    %59 = vector.extract_strided_slice %18 {offsets = [0, 160], sizes = [1, 16], strides = [1, 1]} : vector<1x256xf32> to vector<1x16xf32>
    %c13 = arith.constant 13 : index
    %c3_41 = arith.constant 3 : index
    %60 = vector.load %arg4[%c13, %c3_41] : memref<22x22xf32, #tpu.memory_space<vmem>>, vector<1x16xf32>
    tpu.vector_store %arg4[%c13, %c3_41], %59 {strides = array<i32>} : memref<22x22xf32, #tpu.memory_space<vmem>>, vector<1x16xf32>,
    %61 = vector.extract_strided_slice %16 {offsets = [0, 160], sizes = [1, 16], strides = [1, 1]} : vector<1x256xf32> to vector<1x16xf32>
    %c13_42 = arith.constant 13 : index
    %c3_43 = arith.constant 3 : index
    %62 = vector.load %arg5[%c13_42, %c3_43] : memref<22x22xf32, #tpu.memory_space<vmem>>, vector<1x16xf32>
    tpu.vector_store %arg5[%c13_42, %c3_43], %61 {strides = array<i32>} : memref<22x22xf32, #tpu.memory_space<vmem>>, vector<1x16xf32>,
    %63 = vector.extract_strided_slice %18 {offsets = [0, 176], sizes = [1, 16], strides = [1, 1]} : vector<1x256xf32> to vector<1x16xf32>
    %c14 = arith.constant 14 : index
    %c3_44 = arith.constant 3 : index
    %64 = vector.load %arg4[%c14, %c3_44] : memref<22x22xf32, #tpu.memory_space<vmem>>, vector<1x16xf32>
    tpu.vector_store %arg4[%c14, %c3_44], %63 {strides = array<i32>} : memref<22x22xf32, #tpu.memory_space<vmem>>, vector<1x16xf32>,
    %65 = vector.extract_strided_slice %16 {offsets = [0, 176], sizes = [1, 16], strides = [1, 1]} : vector<1x256xf32> to vector<1x16xf32>
    %c14_45 = arith.constant 14 : index
    %c3_46 = arith.constant 3 : index
    %66 = vector.load %arg5[%c14_45, %c3_46] : memref<22x22xf32, #tpu.memory_space<vmem>>, vector<1x16xf32>
    tpu.vector_store %arg5[%c14_45, %c3_46], %65 {strides = array<i32>} : memref<22x22xf32, #tpu.memory_space<vmem>>, vector<1x16xf32>,
    %67 = vector.extract_strided_slice %18 {offsets = [0, 192], sizes = [1, 16], strides = [1, 1]} : vector<1x256xf32> to vector<1x16xf32>
    %c15 = arith.constant 15 : index
    %c3_47 = arith.constant 3 : index
    %68 = vector.load %arg4[%c15, %c3_47] : memref<22x22xf32, #tpu.memory_space<vmem>>, vector<1x16xf32>
    tpu.vector_store %arg4[%c15, %c3_47], %67 {strides = array<i32>} : memref<22x22xf32, #tpu.memory_space<vmem>>, vector<1x16xf32>,
    %69 = vector.extract_strided_slice %16 {offsets = [0, 192], sizes = [1, 16], strides = [1, 1]} : vector<1x256xf32> to vector<1x16xf32>
    %c15_48 = arith.constant 15 : index
    %c3_49 = arith.constant 3 : index
    %70 = vector.load %arg5[%c15_48, %c3_49] : memref<22x22xf32, #tpu.memory_space<vmem>>, vector<1x16xf32>
    tpu.vector_store %arg5[%c15_48, %c3_49], %69 {strides = array<i32>} : memref<22x22xf32, #tpu.memory_space<vmem>>, vector<1x16xf32>,
    %71 = vector.extract_strided_slice %18 {offsets = [0, 208], sizes = [1, 16], strides = [1, 1]} : vector<1x256xf32> to vector<1x16xf32>
    %c16 = arith.constant 16 : index
    %c3_50 = arith.constant 3 : index
    %72 = vector.load %arg4[%c16, %c3_50] : memref<22x22xf32, #tpu.memory_space<vmem>>, vector<1x16xf32>
    tpu.vector_store %arg4[%c16, %c3_50], %71 {strides = array<i32>} : memref<22x22xf32, #tpu.memory_space<vmem>>, vector<1x16xf32>,
    %73 = vector.extract_strided_slice %16 {offsets = [0, 208], sizes = [1, 16], strides = [1, 1]} : vector<1x256xf32> to vector<1x16xf32>
    %c16_51 = arith.constant 16 : index
    %c3_52 = arith.constant 3 : index
    %74 = vector.load %arg5[%c16_51, %c3_52] : memref<22x22xf32, #tpu.memory_space<vmem>>, vector<1x16xf32>
    tpu.vector_store %arg5[%c16_51, %c3_52], %73 {strides = array<i32>} : memref<22x22xf32, #tpu.memory_space<vmem>>, vector<1x16xf32>,
    %75 = vector.extract_strided_slice %18 {offsets = [0, 224], sizes = [1, 16], strides = [1, 1]} : vector<1x256xf32> to vector<1x16xf32>
    %c17 = arith.constant 17 : index
    %c3_53 = arith.constant 3 : index
    %76 = vector.load %arg4[%c17, %c3_53] : memref<22x22xf32, #tpu.memory_space<vmem>>, vector<1x16xf32>
    tpu.vector_store %arg4[%c17, %c3_53], %75 {strides = array<i32>} : memref<22x22xf32, #tpu.memory_space<vmem>>, vector<1x16xf32>,
    %77 = vector.extract_strided_slice %16 {offsets = [0, 224], sizes = [1, 16], strides = [1, 1]} : vector<1x256xf32> to vector<1x16xf32>
    %c17_54 = arith.constant 17 : index
    %c3_55 = arith.constant 3 : index
    %78 = vector.load %arg5[%c17_54, %c3_55] : memref<22x22xf32, #tpu.memory_space<vmem>>, vector<1x16xf32>
    tpu.vector_store %arg5[%c17_54, %c3_55], %77 {strides = array<i32>} : memref<22x22xf32, #tpu.memory_space<vmem>>, vector<1x16xf32>,
    %79 = vector.extract_strided_slice %18 {offsets = [0, 240], sizes = [1, 16], strides = [1, 1]} : vector<1x256xf32> to vector<1x16xf32>
    %c18 = arith.constant 18 : index
    %c3_56 = arith.constant 3 : index
    %80 = vector.load %arg4[%c18, %c3_56] : memref<22x22xf32, #tpu.memory_space<vmem>>, vector<1x16xf32>
    tpu.vector_store %arg4[%c18, %c3_56], %79 {strides = array<i32>} : memref<22x22xf32, #tpu.memory_space<vmem>>, vector<1x16xf32>,
    %81 = vector.extract_strided_slice %16 {offsets = [0, 240], sizes = [1, 16], strides = [1, 1]} : vector<1x256xf32> to vector<1x16xf32>
    %c18_57 = arith.constant 18 : index
    %c3_58 = arith.constant 3 : index
    %82 = vector.load %arg5[%c18_57, %c3_58] : memref<22x22xf32, #tpu.memory_space<vmem>>, vector<1x16xf32>
    tpu.vector_store %arg5[%c18_57, %c3_58], %81 {strides = array<i32>} : memref<22x22xf32, #tpu.memory_space<vmem>>, vector<1x16xf32>,
    %c0_59 = arith.constant 0 : index
    %c0_60 = arith.constant 0 : index
    %83 = vector.load %arg4[%c0_59, %c0_60] : memref<22x22xf32, #tpu.memory_space<vmem>>, vector<22x22xf32>
    %c0_61 = arith.constant 0 : index
    %c0_62 = arith.constant 0 : index
    %84 = vector.load %arg5[%c0_61, %c0_62] : memref<22x22xf32, #tpu.memory_space<vmem>>, vector<22x22xf32>
    %85 = vector.extract_strided_slice %83 {offsets = [0, 0], sizes = [22, 16], strides = [1, 1]} : vector<22x22xf32> to vector<22x16xf32>
    %86 = vector.extract_strided_slice %83 {offsets = [0, 1], sizes = [22, 16], strides = [1, 1]} : vector<22x22xf32> to vector<22x16xf32>
    %87 = vector.extract_strided_slice %83 {offsets = [0, 2], sizes = [22, 16], strides = [1, 1]} : vector<22x22xf32> to vector<22x16xf32>
    %88 = vector.extract_strided_slice %83 {offsets = [0, 3], sizes = [22, 16], strides = [1, 1]} : vector<22x22xf32> to vector<22x16xf32>
    %89 = vector.extract_strided_slice %83 {offsets = [0, 4], sizes = [22, 16], strides = [1, 1]} : vector<22x22xf32> to vector<22x16xf32>
    %90 = vector.extract_strided_slice %83 {offsets = [0, 5], sizes = [22, 16], strides = [1, 1]} : vector<22x22xf32> to vector<22x16xf32>
    %91 = vector.extract_strided_slice %83 {offsets = [0, 6], sizes = [22, 16], strides = [1, 1]} : vector<22x22xf32> to vector<22x16xf32>
    %92 = vector.extract_strided_slice %84 {offsets = [0, 0], sizes = [22, 16], strides = [1, 1]} : vector<22x22xf32> to vector<22x16xf32>
    %93 = vector.extract_strided_slice %84 {offsets = [0, 1], sizes = [22, 16], strides = [1, 1]} : vector<22x22xf32> to vector<22x16xf32>
    %94 = vector.extract_strided_slice %84 {offsets = [0, 2], sizes = [22, 16], strides = [1, 1]} : vector<22x22xf32> to vector<22x16xf32>
    %95 = vector.extract_strided_slice %84 {offsets = [0, 3], sizes = [22, 16], strides = [1, 1]} : vector<22x22xf32> to vector<22x16xf32>
    %96 = vector.extract_strided_slice %84 {offsets = [0, 4], sizes = [22, 16], strides = [1, 1]} : vector<22x22xf32> to vector<22x16xf32>
    %97 = vector.extract_strided_slice %84 {offsets = [0, 5], sizes = [22, 16], strides = [1, 1]} : vector<22x22xf32> to vector<22x16xf32>
    %98 = vector.extract_strided_slice %84 {offsets = [0, 6], sizes = [22, 16], strides = [1, 1]} : vector<22x22xf32> to vector<22x16xf32>
    %cst_63 = arith.constant 0.000000e+00 : f32
    %99 = vector.broadcast %cst_63 : f32 to vector<16x16xf32>
    %cst_64 = arith.constant 0.000000e+00 : f32
    %100 = vector.broadcast %cst_64 : f32 to vector<16x16xf32>
    %cst_65 = arith.constant 0.000000e+00 : f32
    %101 = vector.broadcast %cst_65 : f32 to vector<16x16xf32>
    %cst_66 = arith.constant 0.000000e+00 : f32
    %102 = vector.broadcast %cst_66 : f32 to vector<16x16xf32>
    %c0_67 = arith.constant 0 : index
    %103 = memref.load %arg1[%c0_67] : memref<98xf32, #tpu.memory_space<smem>>
    %c49 = arith.constant 49 : index
    %104 = memref.load %arg1[%c49] : memref<98xf32, #tpu.memory_space<smem>>
    %105 = vector.extract_strided_slice %85 {offsets = [0, 0], sizes = [16, 16], strides = [1, 1]} : vector<22x16xf32> to vector<16x16xf32>
    %106 = vector.broadcast %103 : f32 to vector<16x16xf32>
    %107 = arith.mulf %106, %105 : vector<16x16xf32>
    %108 = arith.addf %99, %107 : vector<16x16xf32>
    %109 = vector.extract_strided_slice %92 {offsets = [0, 0], sizes = [16, 16], strides = [1, 1]} : vector<22x16xf32> to vector<16x16xf32>
    %110 = vector.broadcast %104 : f32 to vector<16x16xf32>
    %111 = arith.mulf %110, %109 : vector<16x16xf32>
    %112 = arith.addf %101, %111 : vector<16x16xf32>
    %c1 = arith.constant 1 : index
    %113 = memref.load %arg1[%c1] : memref<98xf32, #tpu.memory_space<smem>>
    %c50 = arith.constant 50 : index
    %114 = memref.load %arg1[%c50] : memref<98xf32, #tpu.memory_space<smem>>
    %115 = vector.extract_strided_slice %86 {offsets = [0, 0], sizes = [16, 16], strides = [1, 1]} : vector<22x16xf32> to vector<16x16xf32>
    %116 = vector.broadcast %113 : f32 to vector<16x16xf32>
    %117 = arith.mulf %116, %115 : vector<16x16xf32>
    %118 = arith.addf %108, %117 : vector<16x16xf32>
    %119 = vector.extract_strided_slice %93 {offsets = [0, 0], sizes = [16, 16], strides = [1, 1]} : vector<22x16xf32> to vector<16x16xf32>
    %120 = vector.broadcast %114 : f32 to vector<16x16xf32>
    %121 = arith.mulf %120, %119 : vector<16x16xf32>
    %122 = arith.addf %112, %121 : vector<16x16xf32>
    %c2 = arith.constant 2 : index
    %123 = memref.load %arg1[%c2] : memref<98xf32, #tpu.memory_space<smem>>
    %c51 = arith.constant 51 : index
    %124 = memref.load %arg1[%c51] : memref<98xf32, #tpu.memory_space<smem>>
    %125 = vector.extract_strided_slice %87 {offsets = [0, 0], sizes = [16, 16], strides = [1, 1]} : vector<22x16xf32> to vector<16x16xf32>
    %126 = vector.broadcast %123 : f32 to vector<16x16xf32>
    %127 = arith.mulf %126, %125 : vector<16x16xf32>
    %128 = arith.addf %118, %127 : vector<16x16xf32>
    %129 = vector.extract_strided_slice %94 {offsets = [0, 0], sizes = [16, 16], strides = [1, 1]} : vector<22x16xf32> to vector<16x16xf32>
    %130 = vector.broadcast %124 : f32 to vector<16x16xf32>
    %131 = arith.mulf %130, %129 : vector<16x16xf32>
    %132 = arith.addf %122, %131 : vector<16x16xf32>
    %c3_68 = arith.constant 3 : index
    %133 = memref.load %arg1[%c3_68] : memref<98xf32, #tpu.memory_space<smem>>
    %c52 = arith.constant 52 : index
    %134 = memref.load %arg1[%c52] : memref<98xf32, #tpu.memory_space<smem>>
    %135 = vector.extract_strided_slice %88 {offsets = [0, 0], sizes = [16, 16], strides = [1, 1]} : vector<22x16xf32> to vector<16x16xf32>
    %136 = vector.broadcast %133 : f32 to vector<16x16xf32>
    %137 = arith.mulf %136, %135 : vector<16x16xf32>
    %138 = arith.addf %128, %137 : vector<16x16xf32>
    %139 = vector.extract_strided_slice %95 {offsets = [0, 0], sizes = [16, 16], strides = [1, 1]} : vector<22x16xf32> to vector<16x16xf32>
    %140 = vector.broadcast %134 : f32 to vector<16x16xf32>
    %141 = arith.mulf %140, %139 : vector<16x16xf32>
    %142 = arith.addf %132, %141 : vector<16x16xf32>
    %c4_69 = arith.constant 4 : index
    %143 = memref.load %arg1[%c4_69] : memref<98xf32, #tpu.memory_space<smem>>
    %c53 = arith.constant 53 : index
    %144 = memref.load %arg1[%c53] : memref<98xf32, #tpu.memory_space<smem>>
    %145 = vector.extract_strided_slice %89 {offsets = [0, 0], sizes = [16, 16], strides = [1, 1]} : vector<22x16xf32> to vector<16x16xf32>
    %146 = vector.broadcast %143 : f32 to vector<16x16xf32>
    %147 = arith.mulf %146, %145 : vector<16x16xf32>
    %148 = arith.addf %138, %147 : vector<16x16xf32>
    %149 = vector.extract_strided_slice %96 {offsets = [0, 0], sizes = [16, 16], strides = [1, 1]} : vector<22x16xf32> to vector<16x16xf32>
    %150 = vector.broadcast %144 : f32 to vector<16x16xf32>
    %151 = arith.mulf %150, %149 : vector<16x16xf32>
    %152 = arith.addf %142, %151 : vector<16x16xf32>
    %c5_70 = arith.constant 5 : index
    %153 = memref.load %arg1[%c5_70] : memref<98xf32, #tpu.memory_space<smem>>
    %c54 = arith.constant 54 : index
    %154 = memref.load %arg1[%c54] : memref<98xf32, #tpu.memory_space<smem>>
    %155 = vector.extract_strided_slice %90 {offsets = [0, 0], sizes = [16, 16], strides = [1, 1]} : vector<22x16xf32> to vector<16x16xf32>
    %156 = vector.broadcast %153 : f32 to vector<16x16xf32>
    %157 = arith.mulf %156, %155 : vector<16x16xf32>
    %158 = arith.addf %148, %157 : vector<16x16xf32>
    %159 = vector.extract_strided_slice %97 {offsets = [0, 0], sizes = [16, 16], strides = [1, 1]} : vector<22x16xf32> to vector<16x16xf32>
    %160 = vector.broadcast %154 : f32 to vector<16x16xf32>
    %161 = arith.mulf %160, %159 : vector<16x16xf32>
    %162 = arith.addf %152, %161 : vector<16x16xf32>
    %c6_71 = arith.constant 6 : index
    %163 = memref.load %arg1[%c6_71] : memref<98xf32, #tpu.memory_space<smem>>
    %c55 = arith.constant 55 : index
    %164 = memref.load %arg1[%c55] : memref<98xf32, #tpu.memory_space<smem>>
    %165 = vector.extract_strided_slice %91 {offsets = [0, 0], sizes = [16, 16], strides = [1, 1]} : vector<22x16xf32> to vector<16x16xf32>
    %166 = vector.broadcast %163 : f32 to vector<16x16xf32>
    %167 = arith.mulf %166, %165 : vector<16x16xf32>
    %168 = arith.addf %158, %167 : vector<16x16xf32>
    %169 = vector.extract_strided_slice %98 {offsets = [0, 0], sizes = [16, 16], strides = [1, 1]} : vector<22x16xf32> to vector<16x16xf32>
    %170 = vector.broadcast %164 : f32 to vector<16x16xf32>
    %171 = arith.mulf %170, %169 : vector<16x16xf32>
    %172 = arith.addf %162, %171 : vector<16x16xf32>
    %c7_72 = arith.constant 7 : index
    %173 = memref.load %arg1[%c7_72] : memref<98xf32, #tpu.memory_space<smem>>
    %c56 = arith.constant 56 : index
    %174 = memref.load %arg1[%c56] : memref<98xf32, #tpu.memory_space<smem>>
    %175 = vector.extract_strided_slice %85 {offsets = [1, 0], sizes = [16, 16], strides = [1, 1]} : vector<22x16xf32> to vector<16x16xf32>
    %176 = vector.broadcast %173 : f32 to vector<16x16xf32>
    %177 = arith.mulf %176, %175 : vector<16x16xf32>
    %178 = arith.addf %100, %177 : vector<16x16xf32>
    %179 = vector.extract_strided_slice %92 {offsets = [1, 0], sizes = [16, 16], strides = [1, 1]} : vector<22x16xf32> to vector<16x16xf32>
    %180 = vector.broadcast %174 : f32 to vector<16x16xf32>
    %181 = arith.mulf %180, %179 : vector<16x16xf32>
    %182 = arith.addf %102, %181 : vector<16x16xf32>
    %c8_73 = arith.constant 8 : index
    %183 = memref.load %arg1[%c8_73] : memref<98xf32, #tpu.memory_space<smem>>
    %c57 = arith.constant 57 : index
    %184 = memref.load %arg1[%c57] : memref<98xf32, #tpu.memory_space<smem>>
    %185 = vector.extract_strided_slice %86 {offsets = [1, 0], sizes = [16, 16], strides = [1, 1]} : vector<22x16xf32> to vector<16x16xf32>
    %186 = vector.broadcast %183 : f32 to vector<16x16xf32>
    %187 = arith.mulf %186, %185 : vector<16x16xf32>
    %188 = arith.addf %178, %187 : vector<16x16xf32>
    %189 = vector.extract_strided_slice %93 {offsets = [1, 0], sizes = [16, 16], strides = [1, 1]} : vector<22x16xf32> to vector<16x16xf32>
    %190 = vector.broadcast %184 : f32 to vector<16x16xf32>
    %191 = arith.mulf %190, %189 : vector<16x16xf32>
    %192 = arith.addf %182, %191 : vector<16x16xf32>
    %c9_74 = arith.constant 9 : index
    %193 = memref.load %arg1[%c9_74] : memref<98xf32, #tpu.memory_space<smem>>
    %c58 = arith.constant 58 : index
    %194 = memref.load %arg1[%c58] : memref<98xf32, #tpu.memory_space<smem>>
    %195 = vector.extract_strided_slice %87 {offsets = [1, 0], sizes = [16, 16], strides = [1, 1]} : vector<22x16xf32> to vector<16x16xf32>
    %196 = vector.broadcast %193 : f32 to vector<16x16xf32>
    %197 = arith.mulf %196, %195 : vector<16x16xf32>
    %198 = arith.addf %188, %197 : vector<16x16xf32>
    %199 = vector.extract_strided_slice %94 {offsets = [1, 0], sizes = [16, 16], strides = [1, 1]} : vector<22x16xf32> to vector<16x16xf32>
    %200 = vector.broadcast %194 : f32 to vector<16x16xf32>
    %201 = arith.mulf %200, %199 : vector<16x16xf32>
    %202 = arith.addf %192, %201 : vector<16x16xf32>
    %c10_75 = arith.constant 10 : index
    %203 = memref.load %arg1[%c10_75] : memref<98xf32, #tpu.memory_space<smem>>
    %c59 = arith.constant 59 : index
    %204 = memref.load %arg1[%c59] : memref<98xf32, #tpu.memory_space<smem>>
    %205 = vector.extract_strided_slice %88 {offsets = [1, 0], sizes = [16, 16], strides = [1, 1]} : vector<22x16xf32> to vector<16x16xf32>
    %206 = vector.broadcast %203 : f32 to vector<16x16xf32>
    %207 = arith.mulf %206, %205 : vector<16x16xf32>
    %208 = arith.addf %198, %207 : vector<16x16xf32>
    %209 = vector.extract_strided_slice %95 {offsets = [1, 0], sizes = [16, 16], strides = [1, 1]} : vector<22x16xf32> to vector<16x16xf32>
    %210 = vector.broadcast %204 : f32 to vector<16x16xf32>
    %211 = arith.mulf %210, %209 : vector<16x16xf32>
    %212 = arith.addf %202, %211 : vector<16x16xf32>
    %c11_76 = arith.constant 11 : index
    %213 = memref.load %arg1[%c11_76] : memref<98xf32, #tpu.memory_space<smem>>
    %c60 = arith.constant 60 : index
    %214 = memref.load %arg1[%c60] : memref<98xf32, #tpu.memory_space<smem>>
    %215 = vector.extract_strided_slice %89 {offsets = [1, 0], sizes = [16, 16], strides = [1, 1]} : vector<22x16xf32> to vector<16x16xf32>
    %216 = vector.broadcast %213 : f32 to vector<16x16xf32>
    %217 = arith.mulf %216, %215 : vector<16x16xf32>
    %218 = arith.addf %208, %217 : vector<16x16xf32>
    %219 = vector.extract_strided_slice %96 {offsets = [1, 0], sizes = [16, 16], strides = [1, 1]} : vector<22x16xf32> to vector<16x16xf32>
    %220 = vector.broadcast %214 : f32 to vector<16x16xf32>
    %221 = arith.mulf %220, %219 : vector<16x16xf32>
    %222 = arith.addf %212, %221 : vector<16x16xf32>
    %c12_77 = arith.constant 12 : index
    %223 = memref.load %arg1[%c12_77] : memref<98xf32, #tpu.memory_space<smem>>
    %c61 = arith.constant 61 : index
    %224 = memref.load %arg1[%c61] : memref<98xf32, #tpu.memory_space<smem>>
    %225 = vector.extract_strided_slice %90 {offsets = [1, 0], sizes = [16, 16], strides = [1, 1]} : vector<22x16xf32> to vector<16x16xf32>
    %226 = vector.broadcast %223 : f32 to vector<16x16xf32>
    %227 = arith.mulf %226, %225 : vector<16x16xf32>
    %228 = arith.addf %218, %227 : vector<16x16xf32>
    %229 = vector.extract_strided_slice %97 {offsets = [1, 0], sizes = [16, 16], strides = [1, 1]} : vector<22x16xf32> to vector<16x16xf32>
    %230 = vector.broadcast %224 : f32 to vector<16x16xf32>
    %231 = arith.mulf %230, %229 : vector<16x16xf32>
    %232 = arith.addf %222, %231 : vector<16x16xf32>
    %c13_78 = arith.constant 13 : index
    %233 = memref.load %arg1[%c13_78] : memref<98xf32, #tpu.memory_space<smem>>
    %c62 = arith.constant 62 : index
    %234 = memref.load %arg1[%c62] : memref<98xf32, #tpu.memory_space<smem>>
    %235 = vector.extract_strided_slice %91 {offsets = [1, 0], sizes = [16, 16], strides = [1, 1]} : vector<22x16xf32> to vector<16x16xf32>
    %236 = vector.broadcast %233 : f32 to vector<16x16xf32>
    %237 = arith.mulf %236, %235 : vector<16x16xf32>
    %238 = arith.addf %228, %237 : vector<16x16xf32>
    %239 = vector.extract_strided_slice %98 {offsets = [1, 0], sizes = [16, 16], strides = [1, 1]} : vector<22x16xf32> to vector<16x16xf32>
    %240 = vector.broadcast %234 : f32 to vector<16x16xf32>
    %241 = arith.mulf %240, %239 : vector<16x16xf32>
    %242 = arith.addf %232, %241 : vector<16x16xf32>
    %c14_79 = arith.constant 14 : index
    %243 = memref.load %arg1[%c14_79] : memref<98xf32, #tpu.memory_space<smem>>
    %c63 = arith.constant 63 : index
    %244 = memref.load %arg1[%c63] : memref<98xf32, #tpu.memory_space<smem>>
    %245 = vector.extract_strided_slice %85 {offsets = [2, 0], sizes = [16, 16], strides = [1, 1]} : vector<22x16xf32> to vector<16x16xf32>
    %246 = vector.broadcast %243 : f32 to vector<16x16xf32>
    %247 = arith.mulf %246, %245 : vector<16x16xf32>
    %248 = arith.addf %168, %247 : vector<16x16xf32>
    %249 = vector.extract_strided_slice %92 {offsets = [2, 0], sizes = [16, 16], strides = [1, 1]} : vector<22x16xf32> to vector<16x16xf32>
    %250 = vector.broadcast %244 : f32 to vector<16x16xf32>
    %251 = arith.mulf %250, %249 : vector<16x16xf32>
    %252 = arith.addf %172, %251 : vector<16x16xf32>
    %c15_80 = arith.constant 15 : index
    %253 = memref.load %arg1[%c15_80] : memref<98xf32, #tpu.memory_space<smem>>
    %c64 = arith.constant 64 : index
    %254 = memref.load %arg1[%c64] : memref<98xf32, #tpu.memory_space<smem>>
    %255 = vector.extract_strided_slice %86 {offsets = [2, 0], sizes = [16, 16], strides = [1, 1]} : vector<22x16xf32> to vector<16x16xf32>
    %256 = vector.broadcast %253 : f32 to vector<16x16xf32>
    %257 = arith.mulf %256, %255 : vector<16x16xf32>
    %258 = arith.addf %248, %257 : vector<16x16xf32>
    %259 = vector.extract_strided_slice %93 {offsets = [2, 0], sizes = [16, 16], strides = [1, 1]} : vector<22x16xf32> to vector<16x16xf32>
    %260 = vector.broadcast %254 : f32 to vector<16x16xf32>
    %261 = arith.mulf %260, %259 : vector<16x16xf32>
    %262 = arith.addf %252, %261 : vector<16x16xf32>
    %c16_81 = arith.constant 16 : index
    %263 = memref.load %arg1[%c16_81] : memref<98xf32, #tpu.memory_space<smem>>
    %c65 = arith.constant 65 : index
    %264 = memref.load %arg1[%c65] : memref<98xf32, #tpu.memory_space<smem>>
    %265 = vector.extract_strided_slice %87 {offsets = [2, 0], sizes = [16, 16], strides = [1, 1]} : vector<22x16xf32> to vector<16x16xf32>
    %266 = vector.broadcast %263 : f32 to vector<16x16xf32>
    %267 = arith.mulf %266, %265 : vector<16x16xf32>
    %268 = arith.addf %258, %267 : vector<16x16xf32>
    %269 = vector.extract_strided_slice %94 {offsets = [2, 0], sizes = [16, 16], strides = [1, 1]} : vector<22x16xf32> to vector<16x16xf32>
    %270 = vector.broadcast %264 : f32 to vector<16x16xf32>
    %271 = arith.mulf %270, %269 : vector<16x16xf32>
    %272 = arith.addf %262, %271 : vector<16x16xf32>
    %c17_82 = arith.constant 17 : index
    %273 = memref.load %arg1[%c17_82] : memref<98xf32, #tpu.memory_space<smem>>
    %c66 = arith.constant 66 : index
    %274 = memref.load %arg1[%c66] : memref<98xf32, #tpu.memory_space<smem>>
    %275 = vector.extract_strided_slice %88 {offsets = [2, 0], sizes = [16, 16], strides = [1, 1]} : vector<22x16xf32> to vector<16x16xf32>
    %276 = vector.broadcast %273 : f32 to vector<16x16xf32>
    %277 = arith.mulf %276, %275 : vector<16x16xf32>
    %278 = arith.addf %268, %277 : vector<16x16xf32>
    %279 = vector.extract_strided_slice %95 {offsets = [2, 0], sizes = [16, 16], strides = [1, 1]} : vector<22x16xf32> to vector<16x16xf32>
    %280 = vector.broadcast %274 : f32 to vector<16x16xf32>
    %281 = arith.mulf %280, %279 : vector<16x16xf32>
    %282 = arith.addf %272, %281 : vector<16x16xf32>
    %c18_83 = arith.constant 18 : index
    %283 = memref.load %arg1[%c18_83] : memref<98xf32, #tpu.memory_space<smem>>
    %c67 = arith.constant 67 : index
    %284 = memref.load %arg1[%c67] : memref<98xf32, #tpu.memory_space<smem>>
    %285 = vector.extract_strided_slice %89 {offsets = [2, 0], sizes = [16, 16], strides = [1, 1]} : vector<22x16xf32> to vector<16x16xf32>
    %286 = vector.broadcast %283 : f32 to vector<16x16xf32>
    %287 = arith.mulf %286, %285 : vector<16x16xf32>
    %288 = arith.addf %278, %287 : vector<16x16xf32>
    %289 = vector.extract_strided_slice %96 {offsets = [2, 0], sizes = [16, 16], strides = [1, 1]} : vector<22x16xf32> to vector<16x16xf32>
    %290 = vector.broadcast %284 : f32 to vector<16x16xf32>
    %291 = arith.mulf %290, %289 : vector<16x16xf32>
    %292 = arith.addf %282, %291 : vector<16x16xf32>
    %c19 = arith.constant 19 : index
    %293 = memref.load %arg1[%c19] : memref<98xf32, #tpu.memory_space<smem>>
    %c68 = arith.constant 68 : index
    %294 = memref.load %arg1[%c68] : memref<98xf32, #tpu.memory_space<smem>>
    %295 = vector.extract_strided_slice %90 {offsets = [2, 0], sizes = [16, 16], strides = [1, 1]} : vector<22x16xf32> to vector<16x16xf32>
    %296 = vector.broadcast %293 : f32 to vector<16x16xf32>
    %297 = arith.mulf %296, %295 : vector<16x16xf32>
    %298 = arith.addf %288, %297 : vector<16x16xf32>
    %299 = vector.extract_strided_slice %97 {offsets = [2, 0], sizes = [16, 16], strides = [1, 1]} : vector<22x16xf32> to vector<16x16xf32>
    %300 = vector.broadcast %294 : f32 to vector<16x16xf32>
    %301 = arith.mulf %300, %299 : vector<16x16xf32>
    %302 = arith.addf %292, %301 : vector<16x16xf32>
    %c20 = arith.constant 20 : index
    %303 = memref.load %arg1[%c20] : memref<98xf32, #tpu.memory_space<smem>>
    %c69 = arith.constant 69 : index
    %304 = memref.load %arg1[%c69] : memref<98xf32, #tpu.memory_space<smem>>
    %305 = vector.extract_strided_slice %91 {offsets = [2, 0], sizes = [16, 16], strides = [1, 1]} : vector<22x16xf32> to vector<16x16xf32>
    %306 = vector.broadcast %303 : f32 to vector<16x16xf32>
    %307 = arith.mulf %306, %305 : vector<16x16xf32>
    %308 = arith.addf %298, %307 : vector<16x16xf32>
    %309 = vector.extract_strided_slice %98 {offsets = [2, 0], sizes = [16, 16], strides = [1, 1]} : vector<22x16xf32> to vector<16x16xf32>
    %310 = vector.broadcast %304 : f32 to vector<16x16xf32>
    %311 = arith.mulf %310, %309 : vector<16x16xf32>
    %312 = arith.addf %302, %311 : vector<16x16xf32>
    %c21 = arith.constant 21 : index
    %313 = memref.load %arg1[%c21] : memref<98xf32, #tpu.memory_space<smem>>
    %c70 = arith.constant 70 : index
    %314 = memref.load %arg1[%c70] : memref<98xf32, #tpu.memory_space<smem>>
    %315 = vector.extract_strided_slice %85 {offsets = [3, 0], sizes = [16, 16], strides = [1, 1]} : vector<22x16xf32> to vector<16x16xf32>
    %316 = vector.broadcast %313 : f32 to vector<16x16xf32>
    %317 = arith.mulf %316, %315 : vector<16x16xf32>
    %318 = arith.addf %238, %317 : vector<16x16xf32>
    %319 = vector.extract_strided_slice %92 {offsets = [3, 0], sizes = [16, 16], strides = [1, 1]} : vector<22x16xf32> to vector<16x16xf32>
    %320 = vector.broadcast %314 : f32 to vector<16x16xf32>
    %321 = arith.mulf %320, %319 : vector<16x16xf32>
    %322 = arith.addf %242, %321 : vector<16x16xf32>
    %c22 = arith.constant 22 : index
    %323 = memref.load %arg1[%c22] : memref<98xf32, #tpu.memory_space<smem>>
    %c71 = arith.constant 71 : index
    %324 = memref.load %arg1[%c71] : memref<98xf32, #tpu.memory_space<smem>>
    %325 = vector.extract_strided_slice %86 {offsets = [3, 0], sizes = [16, 16], strides = [1, 1]} : vector<22x16xf32> to vector<16x16xf32>
    %326 = vector.broadcast %323 : f32 to vector<16x16xf32>
    %327 = arith.mulf %326, %325 : vector<16x16xf32>
    %328 = arith.addf %318, %327 : vector<16x16xf32>
    %329 = vector.extract_strided_slice %93 {offsets = [3, 0], sizes = [16, 16], strides = [1, 1]} : vector<22x16xf32> to vector<16x16xf32>
    %330 = vector.broadcast %324 : f32 to vector<16x16xf32>
    %331 = arith.mulf %330, %329 : vector<16x16xf32>
    %332 = arith.addf %322, %331 : vector<16x16xf32>
    %c23 = arith.constant 23 : index
    %333 = memref.load %arg1[%c23] : memref<98xf32, #tpu.memory_space<smem>>
    %c72 = arith.constant 72 : index
    %334 = memref.load %arg1[%c72] : memref<98xf32, #tpu.memory_space<smem>>
    %335 = vector.extract_strided_slice %87 {offsets = [3, 0], sizes = [16, 16], strides = [1, 1]} : vector<22x16xf32> to vector<16x16xf32>
    %336 = vector.broadcast %333 : f32 to vector<16x16xf32>
    %337 = arith.mulf %336, %335 : vector<16x16xf32>
    %338 = arith.addf %328, %337 : vector<16x16xf32>
    %339 = vector.extract_strided_slice %94 {offsets = [3, 0], sizes = [16, 16], strides = [1, 1]} : vector<22x16xf32> to vector<16x16xf32>
    %340 = vector.broadcast %334 : f32 to vector<16x16xf32>
    %341 = arith.mulf %340, %339 : vector<16x16xf32>
    %342 = arith.addf %332, %341 : vector<16x16xf32>
    %c24 = arith.constant 24 : index
    %343 = memref.load %arg1[%c24] : memref<98xf32, #tpu.memory_space<smem>>
    %c73 = arith.constant 73 : index
    %344 = memref.load %arg1[%c73] : memref<98xf32, #tpu.memory_space<smem>>
    %345 = vector.extract_strided_slice %88 {offsets = [3, 0], sizes = [16, 16], strides = [1, 1]} : vector<22x16xf32> to vector<16x16xf32>
    %346 = vector.broadcast %343 : f32 to vector<16x16xf32>
    %347 = arith.mulf %346, %345 : vector<16x16xf32>
    %348 = arith.addf %338, %347 : vector<16x16xf32>
    %349 = vector.extract_strided_slice %95 {offsets = [3, 0], sizes = [16, 16], strides = [1, 1]} : vector<22x16xf32> to vector<16x16xf32>
    %350 = vector.broadcast %344 : f32 to vector<16x16xf32>
    %351 = arith.mulf %350, %349 : vector<16x16xf32>
    %352 = arith.addf %342, %351 : vector<16x16xf32>
    %c25 = arith.constant 25 : index
    %353 = memref.load %arg1[%c25] : memref<98xf32, #tpu.memory_space<smem>>
    %c74 = arith.constant 74 : index
    %354 = memref.load %arg1[%c74] : memref<98xf32, #tpu.memory_space<smem>>
    %355 = vector.extract_strided_slice %89 {offsets = [3, 0], sizes = [16, 16], strides = [1, 1]} : vector<22x16xf32> to vector<16x16xf32>
    %356 = vector.broadcast %353 : f32 to vector<16x16xf32>
    %357 = arith.mulf %356, %355 : vector<16x16xf32>
    %358 = arith.addf %348, %357 : vector<16x16xf32>
    %359 = vector.extract_strided_slice %96 {offsets = [3, 0], sizes = [16, 16], strides = [1, 1]} : vector<22x16xf32> to vector<16x16xf32>
    %360 = vector.broadcast %354 : f32 to vector<16x16xf32>
    %361 = arith.mulf %360, %359 : vector<16x16xf32>
    %362 = arith.addf %352, %361 : vector<16x16xf32>
    %c26 = arith.constant 26 : index
    %363 = memref.load %arg1[%c26] : memref<98xf32, #tpu.memory_space<smem>>
    %c75 = arith.constant 75 : index
    %364 = memref.load %arg1[%c75] : memref<98xf32, #tpu.memory_space<smem>>
    %365 = vector.extract_strided_slice %90 {offsets = [3, 0], sizes = [16, 16], strides = [1, 1]} : vector<22x16xf32> to vector<16x16xf32>
    %366 = vector.broadcast %363 : f32 to vector<16x16xf32>
    %367 = arith.mulf %366, %365 : vector<16x16xf32>
    %368 = arith.addf %358, %367 : vector<16x16xf32>
    %369 = vector.extract_strided_slice %97 {offsets = [3, 0], sizes = [16, 16], strides = [1, 1]} : vector<22x16xf32> to vector<16x16xf32>
    %370 = vector.broadcast %364 : f32 to vector<16x16xf32>
    %371 = arith.mulf %370, %369 : vector<16x16xf32>
    %372 = arith.addf %362, %371 : vector<16x16xf32>
    %c27 = arith.constant 27 : index
    %373 = memref.load %arg1[%c27] : memref<98xf32, #tpu.memory_space<smem>>
    %c76 = arith.constant 76 : index
    %374 = memref.load %arg1[%c76] : memref<98xf32, #tpu.memory_space<smem>>
    %375 = vector.extract_strided_slice %91 {offsets = [3, 0], sizes = [16, 16], strides = [1, 1]} : vector<22x16xf32> to vector<16x16xf32>
    %376 = vector.broadcast %373 : f32 to vector<16x16xf32>
    %377 = arith.mulf %376, %375 : vector<16x16xf32>
    %378 = arith.addf %368, %377 : vector<16x16xf32>
    %379 = vector.extract_strided_slice %98 {offsets = [3, 0], sizes = [16, 16], strides = [1, 1]} : vector<22x16xf32> to vector<16x16xf32>
    %380 = vector.broadcast %374 : f32 to vector<16x16xf32>
    %381 = arith.mulf %380, %379 : vector<16x16xf32>
    %382 = arith.addf %372, %381 : vector<16x16xf32>
    %c28 = arith.constant 28 : index
    %383 = memref.load %arg1[%c28] : memref<98xf32, #tpu.memory_space<smem>>
    %c77 = arith.constant 77 : index
    %384 = memref.load %arg1[%c77] : memref<98xf32, #tpu.memory_space<smem>>
    %385 = vector.extract_strided_slice %85 {offsets = [4, 0], sizes = [16, 16], strides = [1, 1]} : vector<22x16xf32> to vector<16x16xf32>
    %386 = vector.broadcast %383 : f32 to vector<16x16xf32>
    %387 = arith.mulf %386, %385 : vector<16x16xf32>
    %388 = arith.addf %308, %387 : vector<16x16xf32>
    %389 = vector.extract_strided_slice %92 {offsets = [4, 0], sizes = [16, 16], strides = [1, 1]} : vector<22x16xf32> to vector<16x16xf32>
    %390 = vector.broadcast %384 : f32 to vector<16x16xf32>
    %391 = arith.mulf %390, %389 : vector<16x16xf32>
    %392 = arith.addf %312, %391 : vector<16x16xf32>
    %c29 = arith.constant 29 : index
    %393 = memref.load %arg1[%c29] : memref<98xf32, #tpu.memory_space<smem>>
    %c78 = arith.constant 78 : index
    %394 = memref.load %arg1[%c78] : memref<98xf32, #tpu.memory_space<smem>>
    %395 = vector.extract_strided_slice %86 {offsets = [4, 0], sizes = [16, 16], strides = [1, 1]} : vector<22x16xf32> to vector<16x16xf32>
    %396 = vector.broadcast %393 : f32 to vector<16x16xf32>
    %397 = arith.mulf %396, %395 : vector<16x16xf32>
    %398 = arith.addf %388, %397 : vector<16x16xf32>
    %399 = vector.extract_strided_slice %93 {offsets = [4, 0], sizes = [16, 16], strides = [1, 1]} : vector<22x16xf32> to vector<16x16xf32>
    %400 = vector.broadcast %394 : f32 to vector<16x16xf32>
    %401 = arith.mulf %400, %399 : vector<16x16xf32>
    %402 = arith.addf %392, %401 : vector<16x16xf32>
    %c30 = arith.constant 30 : index
    %403 = memref.load %arg1[%c30] : memref<98xf32, #tpu.memory_space<smem>>
    %c79 = arith.constant 79 : index
    %404 = memref.load %arg1[%c79] : memref<98xf32, #tpu.memory_space<smem>>
    %405 = vector.extract_strided_slice %87 {offsets = [4, 0], sizes = [16, 16], strides = [1, 1]} : vector<22x16xf32> to vector<16x16xf32>
    %406 = vector.broadcast %403 : f32 to vector<16x16xf32>
    %407 = arith.mulf %406, %405 : vector<16x16xf32>
    %408 = arith.addf %398, %407 : vector<16x16xf32>
    %409 = vector.extract_strided_slice %94 {offsets = [4, 0], sizes = [16, 16], strides = [1, 1]} : vector<22x16xf32> to vector<16x16xf32>
    %410 = vector.broadcast %404 : f32 to vector<16x16xf32>
    %411 = arith.mulf %410, %409 : vector<16x16xf32>
    %412 = arith.addf %402, %411 : vector<16x16xf32>
    %c31 = arith.constant 31 : index
    %413 = memref.load %arg1[%c31] : memref<98xf32, #tpu.memory_space<smem>>
    %c80 = arith.constant 80 : index
    %414 = memref.load %arg1[%c80] : memref<98xf32, #tpu.memory_space<smem>>
    %415 = vector.extract_strided_slice %88 {offsets = [4, 0], sizes = [16, 16], strides = [1, 1]} : vector<22x16xf32> to vector<16x16xf32>
    %416 = vector.broadcast %413 : f32 to vector<16x16xf32>
    %417 = arith.mulf %416, %415 : vector<16x16xf32>
    %418 = arith.addf %408, %417 : vector<16x16xf32>
    %419 = vector.extract_strided_slice %95 {offsets = [4, 0], sizes = [16, 16], strides = [1, 1]} : vector<22x16xf32> to vector<16x16xf32>
    %420 = vector.broadcast %414 : f32 to vector<16x16xf32>
    %421 = arith.mulf %420, %419 : vector<16x16xf32>
    %422 = arith.addf %412, %421 : vector<16x16xf32>
    %c32 = arith.constant 32 : index
    %423 = memref.load %arg1[%c32] : memref<98xf32, #tpu.memory_space<smem>>
    %c81 = arith.constant 81 : index
    %424 = memref.load %arg1[%c81] : memref<98xf32, #tpu.memory_space<smem>>
    %425 = vector.extract_strided_slice %89 {offsets = [4, 0], sizes = [16, 16], strides = [1, 1]} : vector<22x16xf32> to vector<16x16xf32>
    %426 = vector.broadcast %423 : f32 to vector<16x16xf32>
    %427 = arith.mulf %426, %425 : vector<16x16xf32>
    %428 = arith.addf %418, %427 : vector<16x16xf32>
    %429 = vector.extract_strided_slice %96 {offsets = [4, 0], sizes = [16, 16], strides = [1, 1]} : vector<22x16xf32> to vector<16x16xf32>
    %430 = vector.broadcast %424 : f32 to vector<16x16xf32>
    %431 = arith.mulf %430, %429 : vector<16x16xf32>
    %432 = arith.addf %422, %431 : vector<16x16xf32>
    %c33 = arith.constant 33 : index
    %433 = memref.load %arg1[%c33] : memref<98xf32, #tpu.memory_space<smem>>
    %c82 = arith.constant 82 : index
    %434 = memref.load %arg1[%c82] : memref<98xf32, #tpu.memory_space<smem>>
    %435 = vector.extract_strided_slice %90 {offsets = [4, 0], sizes = [16, 16], strides = [1, 1]} : vector<22x16xf32> to vector<16x16xf32>
    %436 = vector.broadcast %433 : f32 to vector<16x16xf32>
    %437 = arith.mulf %436, %435 : vector<16x16xf32>
    %438 = arith.addf %428, %437 : vector<16x16xf32>
    %439 = vector.extract_strided_slice %97 {offsets = [4, 0], sizes = [16, 16], strides = [1, 1]} : vector<22x16xf32> to vector<16x16xf32>
    %440 = vector.broadcast %434 : f32 to vector<16x16xf32>
    %441 = arith.mulf %440, %439 : vector<16x16xf32>
    %442 = arith.addf %432, %441 : vector<16x16xf32>
    %c34 = arith.constant 34 : index
    %443 = memref.load %arg1[%c34] : memref<98xf32, #tpu.memory_space<smem>>
    %c83 = arith.constant 83 : index
    %444 = memref.load %arg1[%c83] : memref<98xf32, #tpu.memory_space<smem>>
    %445 = vector.extract_strided_slice %91 {offsets = [4, 0], sizes = [16, 16], strides = [1, 1]} : vector<22x16xf32> to vector<16x16xf32>
    %446 = vector.broadcast %443 : f32 to vector<16x16xf32>
    %447 = arith.mulf %446, %445 : vector<16x16xf32>
    %448 = arith.addf %438, %447 : vector<16x16xf32>
    %449 = vector.extract_strided_slice %98 {offsets = [4, 0], sizes = [16, 16], strides = [1, 1]} : vector<22x16xf32> to vector<16x16xf32>
    %450 = vector.broadcast %444 : f32 to vector<16x16xf32>
    %451 = arith.mulf %450, %449 : vector<16x16xf32>
    %452 = arith.addf %442, %451 : vector<16x16xf32>
    %c35 = arith.constant 35 : index
    %453 = memref.load %arg1[%c35] : memref<98xf32, #tpu.memory_space<smem>>
    %c84 = arith.constant 84 : index
    %454 = memref.load %arg1[%c84] : memref<98xf32, #tpu.memory_space<smem>>
    %455 = vector.extract_strided_slice %85 {offsets = [5, 0], sizes = [16, 16], strides = [1, 1]} : vector<22x16xf32> to vector<16x16xf32>
    %456 = vector.broadcast %453 : f32 to vector<16x16xf32>
    %457 = arith.mulf %456, %455 : vector<16x16xf32>
    %458 = arith.addf %378, %457 : vector<16x16xf32>
    %459 = vector.extract_strided_slice %92 {offsets = [5, 0], sizes = [16, 16], strides = [1, 1]} : vector<22x16xf32> to vector<16x16xf32>
    %460 = vector.broadcast %454 : f32 to vector<16x16xf32>
    %461 = arith.mulf %460, %459 : vector<16x16xf32>
    %462 = arith.addf %382, %461 : vector<16x16xf32>
    %c36 = arith.constant 36 : index
    %463 = memref.load %arg1[%c36] : memref<98xf32, #tpu.memory_space<smem>>
    %c85 = arith.constant 85 : index
    %464 = memref.load %arg1[%c85] : memref<98xf32, #tpu.memory_space<smem>>
    %465 = vector.extract_strided_slice %86 {offsets = [5, 0], sizes = [16, 16], strides = [1, 1]} : vector<22x16xf32> to vector<16x16xf32>
    %466 = vector.broadcast %463 : f32 to vector<16x16xf32>
    %467 = arith.mulf %466, %465 : vector<16x16xf32>
    %468 = arith.addf %458, %467 : vector<16x16xf32>
    %469 = vector.extract_strided_slice %93 {offsets = [5, 0], sizes = [16, 16], strides = [1, 1]} : vector<22x16xf32> to vector<16x16xf32>
    %470 = vector.broadcast %464 : f32 to vector<16x16xf32>
    %471 = arith.mulf %470, %469 : vector<16x16xf32>
    %472 = arith.addf %462, %471 : vector<16x16xf32>
    %c37 = arith.constant 37 : index
    %473 = memref.load %arg1[%c37] : memref<98xf32, #tpu.memory_space<smem>>
    %c86 = arith.constant 86 : index
    %474 = memref.load %arg1[%c86] : memref<98xf32, #tpu.memory_space<smem>>
    %475 = vector.extract_strided_slice %87 {offsets = [5, 0], sizes = [16, 16], strides = [1, 1]} : vector<22x16xf32> to vector<16x16xf32>
    %476 = vector.broadcast %473 : f32 to vector<16x16xf32>
    %477 = arith.mulf %476, %475 : vector<16x16xf32>
    %478 = arith.addf %468, %477 : vector<16x16xf32>
    %479 = vector.extract_strided_slice %94 {offsets = [5, 0], sizes = [16, 16], strides = [1, 1]} : vector<22x16xf32> to vector<16x16xf32>
    %480 = vector.broadcast %474 : f32 to vector<16x16xf32>
    %481 = arith.mulf %480, %479 : vector<16x16xf32>
    %482 = arith.addf %472, %481 : vector<16x16xf32>
    %c38 = arith.constant 38 : index
    %483 = memref.load %arg1[%c38] : memref<98xf32, #tpu.memory_space<smem>>
    %c87 = arith.constant 87 : index
    %484 = memref.load %arg1[%c87] : memref<98xf32, #tpu.memory_space<smem>>
    %485 = vector.extract_strided_slice %88 {offsets = [5, 0], sizes = [16, 16], strides = [1, 1]} : vector<22x16xf32> to vector<16x16xf32>
    %486 = vector.broadcast %483 : f32 to vector<16x16xf32>
    %487 = arith.mulf %486, %485 : vector<16x16xf32>
    %488 = arith.addf %478, %487 : vector<16x16xf32>
    %489 = vector.extract_strided_slice %95 {offsets = [5, 0], sizes = [16, 16], strides = [1, 1]} : vector<22x16xf32> to vector<16x16xf32>
    %490 = vector.broadcast %484 : f32 to vector<16x16xf32>
    %491 = arith.mulf %490, %489 : vector<16x16xf32>
    %492 = arith.addf %482, %491 : vector<16x16xf32>
    %c39 = arith.constant 39 : index
    %493 = memref.load %arg1[%c39] : memref<98xf32, #tpu.memory_space<smem>>
    %c88 = arith.constant 88 : index
    %494 = memref.load %arg1[%c88] : memref<98xf32, #tpu.memory_space<smem>>
    %495 = vector.extract_strided_slice %89 {offsets = [5, 0], sizes = [16, 16], strides = [1, 1]} : vector<22x16xf32> to vector<16x16xf32>
    %496 = vector.broadcast %493 : f32 to vector<16x16xf32>
    %497 = arith.mulf %496, %495 : vector<16x16xf32>
    %498 = arith.addf %488, %497 : vector<16x16xf32>
    %499 = vector.extract_strided_slice %96 {offsets = [5, 0], sizes = [16, 16], strides = [1, 1]} : vector<22x16xf32> to vector<16x16xf32>
    %500 = vector.broadcast %494 : f32 to vector<16x16xf32>
    %501 = arith.mulf %500, %499 : vector<16x16xf32>
    %502 = arith.addf %492, %501 : vector<16x16xf32>
    %c40 = arith.constant 40 : index
    %503 = memref.load %arg1[%c40] : memref<98xf32, #tpu.memory_space<smem>>
    %c89 = arith.constant 89 : index
    %504 = memref.load %arg1[%c89] : memref<98xf32, #tpu.memory_space<smem>>
    %505 = vector.extract_strided_slice %90 {offsets = [5, 0], sizes = [16, 16], strides = [1, 1]} : vector<22x16xf32> to vector<16x16xf32>
    %506 = vector.broadcast %503 : f32 to vector<16x16xf32>
    %507 = arith.mulf %506, %505 : vector<16x16xf32>
    %508 = arith.addf %498, %507 : vector<16x16xf32>
    %509 = vector.extract_strided_slice %97 {offsets = [5, 0], sizes = [16, 16], strides = [1, 1]} : vector<22x16xf32> to vector<16x16xf32>
    %510 = vector.broadcast %504 : f32 to vector<16x16xf32>
    %511 = arith.mulf %510, %509 : vector<16x16xf32>
    %512 = arith.addf %502, %511 : vector<16x16xf32>
    %c41 = arith.constant 41 : index
    %513 = memref.load %arg1[%c41] : memref<98xf32, #tpu.memory_space<smem>>
    %c90 = arith.constant 90 : index
    %514 = memref.load %arg1[%c90] : memref<98xf32, #tpu.memory_space<smem>>
    %515 = vector.extract_strided_slice %91 {offsets = [5, 0], sizes = [16, 16], strides = [1, 1]} : vector<22x16xf32> to vector<16x16xf32>
    %516 = vector.broadcast %513 : f32 to vector<16x16xf32>
    %517 = arith.mulf %516, %515 : vector<16x16xf32>
    %518 = arith.addf %508, %517 : vector<16x16xf32>
    %519 = vector.extract_strided_slice %98 {offsets = [5, 0], sizes = [16, 16], strides = [1, 1]} : vector<22x16xf32> to vector<16x16xf32>
    %520 = vector.broadcast %514 : f32 to vector<16x16xf32>
    %521 = arith.mulf %520, %519 : vector<16x16xf32>
    %522 = arith.addf %512, %521 : vector<16x16xf32>
    %c42 = arith.constant 42 : index
    %523 = memref.load %arg1[%c42] : memref<98xf32, #tpu.memory_space<smem>>
    %c91 = arith.constant 91 : index
    %524 = memref.load %arg1[%c91] : memref<98xf32, #tpu.memory_space<smem>>
    %525 = vector.extract_strided_slice %85 {offsets = [6, 0], sizes = [16, 16], strides = [1, 1]} : vector<22x16xf32> to vector<16x16xf32>
    %526 = vector.broadcast %523 : f32 to vector<16x16xf32>
    %527 = arith.mulf %526, %525 : vector<16x16xf32>
    %528 = arith.addf %448, %527 : vector<16x16xf32>
    %529 = vector.extract_strided_slice %92 {offsets = [6, 0], sizes = [16, 16], strides = [1, 1]} : vector<22x16xf32> to vector<16x16xf32>
    %530 = vector.broadcast %524 : f32 to vector<16x16xf32>
    %531 = arith.mulf %530, %529 : vector<16x16xf32>
    %532 = arith.addf %452, %531 : vector<16x16xf32>
    %c43 = arith.constant 43 : index
    %533 = memref.load %arg1[%c43] : memref<98xf32, #tpu.memory_space<smem>>
    %c92 = arith.constant 92 : index
    %534 = memref.load %arg1[%c92] : memref<98xf32, #tpu.memory_space<smem>>
    %535 = vector.extract_strided_slice %86 {offsets = [6, 0], sizes = [16, 16], strides = [1, 1]} : vector<22x16xf32> to vector<16x16xf32>
    %536 = vector.broadcast %533 : f32 to vector<16x16xf32>
    %537 = arith.mulf %536, %535 : vector<16x16xf32>
    %538 = arith.addf %528, %537 : vector<16x16xf32>
    %539 = vector.extract_strided_slice %93 {offsets = [6, 0], sizes = [16, 16], strides = [1, 1]} : vector<22x16xf32> to vector<16x16xf32>
    %540 = vector.broadcast %534 : f32 to vector<16x16xf32>
    %541 = arith.mulf %540, %539 : vector<16x16xf32>
    %542 = arith.addf %532, %541 : vector<16x16xf32>
    %c44 = arith.constant 44 : index
    %543 = memref.load %arg1[%c44] : memref<98xf32, #tpu.memory_space<smem>>
    %c93 = arith.constant 93 : index
    %544 = memref.load %arg1[%c93] : memref<98xf32, #tpu.memory_space<smem>>
    %545 = vector.extract_strided_slice %87 {offsets = [6, 0], sizes = [16, 16], strides = [1, 1]} : vector<22x16xf32> to vector<16x16xf32>
    %546 = vector.broadcast %543 : f32 to vector<16x16xf32>
    %547 = arith.mulf %546, %545 : vector<16x16xf32>
    %548 = arith.addf %538, %547 : vector<16x16xf32>
    %549 = vector.extract_strided_slice %94 {offsets = [6, 0], sizes = [16, 16], strides = [1, 1]} : vector<22x16xf32> to vector<16x16xf32>
    %550 = vector.broadcast %544 : f32 to vector<16x16xf32>
    %551 = arith.mulf %550, %549 : vector<16x16xf32>
    %552 = arith.addf %542, %551 : vector<16x16xf32>
    %c45 = arith.constant 45 : index
    %553 = memref.load %arg1[%c45] : memref<98xf32, #tpu.memory_space<smem>>
    %c94 = arith.constant 94 : index
    %554 = memref.load %arg1[%c94] : memref<98xf32, #tpu.memory_space<smem>>
    %555 = vector.extract_strided_slice %88 {offsets = [6, 0], sizes = [16, 16], strides = [1, 1]} : vector<22x16xf32> to vector<16x16xf32>
    %556 = vector.broadcast %553 : f32 to vector<16x16xf32>
    %557 = arith.mulf %556, %555 : vector<16x16xf32>
    %558 = arith.addf %548, %557 : vector<16x16xf32>
    %559 = vector.extract_strided_slice %95 {offsets = [6, 0], sizes = [16, 16], strides = [1, 1]} : vector<22x16xf32> to vector<16x16xf32>
    %560 = vector.broadcast %554 : f32 to vector<16x16xf32>
    %561 = arith.mulf %560, %559 : vector<16x16xf32>
    %562 = arith.addf %552, %561 : vector<16x16xf32>
    %c46 = arith.constant 46 : index
    %563 = memref.load %arg1[%c46] : memref<98xf32, #tpu.memory_space<smem>>
    %c95 = arith.constant 95 : index
    %564 = memref.load %arg1[%c95] : memref<98xf32, #tpu.memory_space<smem>>
    %565 = vector.extract_strided_slice %89 {offsets = [6, 0], sizes = [16, 16], strides = [1, 1]} : vector<22x16xf32> to vector<16x16xf32>
    %566 = vector.broadcast %563 : f32 to vector<16x16xf32>
    %567 = arith.mulf %566, %565 : vector<16x16xf32>
    %568 = arith.addf %558, %567 : vector<16x16xf32>
    %569 = vector.extract_strided_slice %96 {offsets = [6, 0], sizes = [16, 16], strides = [1, 1]} : vector<22x16xf32> to vector<16x16xf32>
    %570 = vector.broadcast %564 : f32 to vector<16x16xf32>
    %571 = arith.mulf %570, %569 : vector<16x16xf32>
    %572 = arith.addf %562, %571 : vector<16x16xf32>
    %c47 = arith.constant 47 : index
    %573 = memref.load %arg1[%c47] : memref<98xf32, #tpu.memory_space<smem>>
    %c96 = arith.constant 96 : index
    %574 = memref.load %arg1[%c96] : memref<98xf32, #tpu.memory_space<smem>>
    %575 = vector.extract_strided_slice %90 {offsets = [6, 0], sizes = [16, 16], strides = [1, 1]} : vector<22x16xf32> to vector<16x16xf32>
    %576 = vector.broadcast %573 : f32 to vector<16x16xf32>
    %577 = arith.mulf %576, %575 : vector<16x16xf32>
    %578 = arith.addf %568, %577 : vector<16x16xf32>
    %579 = vector.extract_strided_slice %97 {offsets = [6, 0], sizes = [16, 16], strides = [1, 1]} : vector<22x16xf32> to vector<16x16xf32>
    %580 = vector.broadcast %574 : f32 to vector<16x16xf32>
    %581 = arith.mulf %580, %579 : vector<16x16xf32>
    %582 = arith.addf %572, %581 : vector<16x16xf32>
    %c48 = arith.constant 48 : index
    %583 = memref.load %arg1[%c48] : memref<98xf32, #tpu.memory_space<smem>>
    %c97 = arith.constant 97 : index
    %584 = memref.load %arg1[%c97] : memref<98xf32, #tpu.memory_space<smem>>
    %585 = vector.extract_strided_slice %91 {offsets = [6, 0], sizes = [16, 16], strides = [1, 1]} : vector<22x16xf32> to vector<16x16xf32>
    %586 = vector.broadcast %583 : f32 to vector<16x16xf32>
    %587 = arith.mulf %586, %585 : vector<16x16xf32>
    %588 = arith.addf %578, %587 : vector<16x16xf32>
    %589 = vector.extract_strided_slice %98 {offsets = [6, 0], sizes = [16, 16], strides = [1, 1]} : vector<22x16xf32> to vector<16x16xf32>
    %590 = vector.broadcast %584 : f32 to vector<16x16xf32>
    %591 = arith.mulf %590, %589 : vector<16x16xf32>
    %592 = arith.addf %582, %591 : vector<16x16xf32>
    %593 = arith.addf %588, %518 : vector<16x16xf32>
    %594 = arith.addf %592, %522 : vector<16x16xf32>
    %595 = arith.addf %593, %594 : vector<16x16xf32>
    %596 = arith.negf %595 : vector<16x16xf32>
    %597 = math.exp %596 : vector<16x16xf32>
    %cst_84 = arith.constant 1.000000e+00 : f32
    %598 = vector.broadcast %cst_84 : f32 to vector<16x16xf32>
    %599 = arith.addf %598, %597 : vector<16x16xf32>
    %600 = arith.divf %598, %599 : vector<16x16xf32>
    %601 = vector.extract_strided_slice %600 {offsets = [0, 0], sizes = [1, 16], strides = [1, 1]} : vector<16x16xf32> to vector<1x16xf32>
    %602 = vector.extract_strided_slice %600 {offsets = [1, 0], sizes = [1, 16], strides = [1, 1]} : vector<16x16xf32> to vector<1x16xf32>
    %603 = vector.extract_strided_slice %600 {offsets = [2, 0], sizes = [1, 16], strides = [1, 1]} : vector<16x16xf32> to vector<1x16xf32>
    %604 = vector.extract_strided_slice %600 {offsets = [3, 0], sizes = [1, 16], strides = [1, 1]} : vector<16x16xf32> to vector<1x16xf32>
    %605 = vector.extract_strided_slice %600 {offsets = [4, 0], sizes = [1, 16], strides = [1, 1]} : vector<16x16xf32> to vector<1x16xf32>
    %606 = vector.extract_strided_slice %600 {offsets = [5, 0], sizes = [1, 16], strides = [1, 1]} : vector<16x16xf32> to vector<1x16xf32>
    %607 = vector.extract_strided_slice %600 {offsets = [6, 0], sizes = [1, 16], strides = [1, 1]} : vector<16x16xf32> to vector<1x16xf32>
    %608 = vector.extract_strided_slice %600 {offsets = [7, 0], sizes = [1, 16], strides = [1, 1]} : vector<16x16xf32> to vector<1x16xf32>
    %609 = vector.extract_strided_slice %600 {offsets = [8, 0], sizes = [1, 16], strides = [1, 1]} : vector<16x16xf32> to vector<1x16xf32>
    %610 = vector.extract_strided_slice %600 {offsets = [9, 0], sizes = [1, 16], strides = [1, 1]} : vector<16x16xf32> to vector<1x16xf32>
    %611 = vector.extract_strided_slice %600 {offsets = [10, 0], sizes = [1, 16], strides = [1, 1]} : vector<16x16xf32> to vector<1x16xf32>
    %612 = vector.extract_strided_slice %600 {offsets = [11, 0], sizes = [1, 16], strides = [1, 1]} : vector<16x16xf32> to vector<1x16xf32>
    %613 = vector.extract_strided_slice %600 {offsets = [12, 0], sizes = [1, 16], strides = [1, 1]} : vector<16x16xf32> to vector<1x16xf32>
    %614 = vector.extract_strided_slice %600 {offsets = [13, 0], sizes = [1, 16], strides = [1, 1]} : vector<16x16xf32> to vector<1x16xf32>
    %615 = vector.extract_strided_slice %600 {offsets = [14, 0], sizes = [1, 16], strides = [1, 1]} : vector<16x16xf32> to vector<1x16xf32>
    %616 = vector.extract_strided_slice %600 {offsets = [15, 0], sizes = [1, 16], strides = [1, 1]} : vector<16x16xf32> to vector<1x16xf32>
    %617 = tpu.concatenate %601, %602, %603, %604, %605, %606, %607, %608, %609, %610, %611, %612, %613, %614, %615, %616 in 1 : vector<1x16xf32>, vector<1x16xf32>, vector<1x16xf32>, vector<1x16xf32>, vector<1x16xf32>, vector<1x16xf32>, vector<1x16xf32>, vector<1x16xf32>, vector<1x16xf32>, vector<1x16xf32>, vector<1x16xf32>, vector<1x16xf32>, vector<1x16xf32>, vector<1x16xf32>, vector<1x16xf32>, vector<1x16xf32> -> vector<1x256xf32>
    %c0_i32_85 = arith.constant 0 : i32
    %c1_i32_86 = arith.constant 1 : i32
    %618 = arith.muli %c0_i32_85, %c1_i32_86 : i32
    %c0_i32_87 = arith.constant 0 : i32
    %619 = arith.addi %c0_i32_87, %618 : i32
    %c4_i32_88 = arith.constant 4 : i32
    %620 = arith.muli %619, %c4_i32_88 : i32
    %621 = tpu.assume_multiple %620, 4 : i32
    %c0_89 = arith.constant 0 : index
    %622 = arith.index_cast %621 : i32 to index
    %c0_90 = arith.constant 0 : index
    %623 = vector.load %arg2[%c0_89, %622, %c0_90] : memref<1x4x256xf32, #tpu.memory_space<vmem>>, vector<1x4x256xf32>
    %624 = vector.shape_cast %623 : vector<1x4x256xf32> to vector<4x256xf32>
    %625 = vector.broadcast %617 : vector<1x256xf32> to vector<4x256xf32>
    %626 = arith.mulf %624, %625 : vector<4x256xf32>
    %c0_91 = arith.constant 0 : index
    %627 = arith.index_cast %621 : i32 to index
    %c0_92 = arith.constant 0 : index
    %628 = vector.load %arg3[%c0_91, %627, %c0_92] : memref<1x4x256xf32, #tpu.memory_space<vmem>>, vector<1x4x256xf32>
    %629 = vector.shape_cast %628 : vector<1x4x256xf32> to vector<4x256xf32>
    %630 = vector.shape_cast %626 : vector<4x256xf32> to vector<1x4x256xf32>
    tpu.vector_store %arg3[%c0_91, %627, %c0_92], %630 {strides = array<i32>} : memref<1x4x256xf32, #tpu.memory_space<vmem>>, vector<1x4x256xf32>,
    %c1_i32_93 = arith.constant 1 : i32
    return
  }
  func.func @transform_0(%arg0: i32) -> i32 {
    %c0_i32 = arith.constant 0 : i32
    %c0_i32_0 = arith.constant 0 : i32
    return %c0_i32 : i32
  }
  func.func @transform_1(%arg0: i32) -> (i32, i32, i32) {
    %c0_i32 = arith.constant 0 : i32
    %c0_i32_0 = arith.constant 0 : i32
    %c0_i32_1 = arith.constant 0 : i32
    return %arg0, %c0_i32, %c0_i32_0 : i32, i32, i32
  }
  func.func @transform_2(%arg0: i32) -> (i32, i32, i32) {
    %c0_i32 = arith.constant 0 : i32
    %c0_i32_0 = arith.constant 0 : i32
    %c0_i32_1 = arith.constant 0 : i32
    return %arg0, %c0_i32, %c0_i32_0 : i32, i32, i32
  }
}

</mosaic_0001>

<bundles_post_ra>
// kernel: tpu_custom_call.1
= control target key start
LH: loop header
LB: loop body
LE: loop exit
PB: predicated region body
PF: predicated region fallthrough
CT: control target
= control target key end

     0   :  { %7 = vsyncpa [#allocation7], 0  ;;  %s4409_s0 = inlined_call_operand.hbm [shape: f32[98], index: 0, kind: input, shape index: {}]   ;;  %s4410_s1 = inlined_call_operand.hbm [shape: f32[2,4,256], index: 1, kind: input, shape index: {}]   ;;  %s4411_s2 = inlined_call_operand.hbm [shape: f32[2,4,256], index: 2, kind: output, shape index: {}]  }
   0x1   :  { %8 = vsyncpa [#allocation5], 0 }
   0x2   :  { %10 = vsyncpa [#allocation5 + $0x1], 0 }
   0x3   :  { %11 = vsyncpa [#allocation6], 0 }
   0x4   :  { %13 = vsyncpa [#allocation6 + $0x1], 0  ;;  %s2969_s9 = smov 0   ;;  %s2971_s10 = smov 0  }
   0x5   :  { %s2973_s11 = smov 0   ;;  %s2975_s12 = smov 0  }
   0x6 LB: > { %s2990_s13 = sadd.s32 4294967295, %s2929_s12   ;;  %s2598_s14 = sadd.s32 4294967294, %s2929_s12   ;;  %s2929_s12 = sphi %s2975_s12, %s4471_s12   ;;  %s2925_s11 = sphi %s2973_s11, %s4470_s11   ;;  %s2921_s10 = sphi %s2971_s10, %s4469_s10   ;;  %s2917_s9 = sphi %s2969_s9, %s4468_s9  }
   0x7   : > { %p60_p0 = scmp.ne.s32.totalorder %s2921_s10, %s2917_s9  ;;  %p61_p1 = scmp.eq.s32.totalorder %s2990_s13, 0 }
   0x8   : > { %p84_p2 = scmp.eq.s32.totalorder %s2990_s13, 1  ;;  %p90_p3 = scmp.eq.s32.totalorder %s2598_s14, 1 }
   0x9   : > { %p2999_p4 = por %p61_p1, %p60_p0  ;;  %p2599_p5 = scmp.ge.s32.totalorder %s2929_s12, 1 }
   0xa   : > { %p3004_p6 = por %p90_p3, %p60_p0  ;;  %p97_p7 = scmp.lt.s32.totalorder %s2929_s12, 3 }
   0xb   : > { %s109_s19 = sshll.u32 %s4409_s0, 4  ;;  %s3020_s21 = sadd.s32 1, %s2929_s12   ;;  %s110_s19 = int_to_ptr.hbm [resolvable:$true] %s109_s19 }
   0xc   : > { %p3012_p8 = pnand %p2599_p5, %p97_p7  ;;  %s44_s22 = ssub.s32 %s2929_s12, %s3020_s21 }
   0xd   : > { %p45_p12 = scmp.eq.s32.totalorder %s44_s22, 0  ;;  %s47_s23 = sadd.s32 1, %s2925_s11 }
   0xe   : > { %p2723_p10 = pneg %p3012_p8  ;;  %p54_p13 = scmp.ne.s32.totalorder %s2925_s11, %s2921_s10 }
   0xf   : > { %s2931_s24 = smov [#allocation4]   ;;  %p55_p0 = scmp.eq.s32.totalorder %s2929_s12, 0 }
  0x10   : > { %p2724_p11 = pnand %p2723_p10, %p61_p1  ;;  %p3035_p3 = por %p84_p2, %p54_p13 }
  0x11   : > { %s3030_s25 = scalar_select %p45_p12, %s2925_s11, %s47_s23  }
  0x12   : > { %2726 = dma.hbm_to_smem (!%p2724_p11), %s110_s19, 16, %s2931_s24, [#allocation7]  }
  0x13   : > { %s120_s27 = sand.u32 1, %s2925_s11   ;;  %p56_p5 = por %p55_p0, %p54_p13 }
  0x14   : > { %p2736_p7 = scmp.lt.s32.totalorder %s2929_s12, 2  ;;  %s2602_s28 = sshll.u32 %s120_s27, 3 }
  0x15   : > { %s2713_s29 = sshll.u32 %s2929_s12, 3  ;;  %s124_s6 = scalar_lea.vmem [#allocation8], %s2602_s28 }
  0x16   : > { %s129_s4 = scalar_lea.hbm %s4410_s1, %s2713_s29  ;;  %s133_s7 = sshll.u32 %s124_s6, 4  ;;  %s134_s7 = int_to_ptr.vmem [resolvable:$true] %s133_s7 }
  0x17   : > { %s131_s5 = sshll.u32 %s129_s4, 4  ;;  %p3045_p10 = pnand %p2736_p7, %p56_p5  ;;  %s132_s5 = int_to_ptr.hbm [resolvable:$true] %s131_s5 }
  0x18   : > { %s121_s14 = scalar_lea.sflag [#allocation5], %s120_s27  ;;  %s2829_s17 = sshra.s32 %s132_s5, 4  ;;  %s2830_s17 = int_to_ptr.hbm [resolvable:$true] %s2829_s17 }
  0x19   : > { %s2831_s18 = scalar_lea.hbm %s2830_s17, 8  ;;  %p2833_p11 = pneg %p3045_p10 }
  0x1a   : > { %p2832_p2 = scmp.ne.s32.totalorder %s2830_s17, %s2831_s18  ;;  %s2836_s23 = scalar_lea.hbm %s4410_s1, 16 }
  0x1b   : > { %p2837_p0 = scmp.lt.s32.totalorder %s2830_s17, %s4410_s1  ;;  %p2838_p5 = scmp.lt.s32.totalorder %s2836_s23, %s2831_s18 }
  0x1c   : > { %p2834_p12 = pnand %p2833_p11, %p2832_p2 }
  0x1d   : > { %p2839_p7 = por %p2838_p5, %p2837_p0 }
  0x1e   : > { %p2835_p13 = pneg %p2834_p12 }
  0x20   : > { %p2840_p9 = pnand %p2839_p7, %p2835_p13 }
  0x22   : > { %2843 = shalt.err (!%p2840_p9)
}
  0x23   : > { %2730 = dma.hbm_to_vmem [thread:$0]  (!%p3045_p10), %s132_s5, 128, %s134_s7, %s121_s14  }
  0x24   : > { %142 = sbr.rel (%p3012_p8) target bundleno = 1101 (0x44d), region = 28 }
  0x29   : > { %2904 = dma.done.wait (%p61_p1), [#allocation7], 16  }
  0x2a   : > { %2906 = vsyncadd (%p61_p1), [#allocation7], 4294967280  ;;  %s3066_s27 = sand.u32 1, %s2921_s10  }
  0x2b   : > { %s2607_s29 = sshll.u32 %s3066_s27, 3  ;;  %s150_s30 = scalar_lea.sflag [#allocation5], %s3066_s27 }
  0x2c   : > { %s3072_s3 = scalar_lea.vmem [#allocation8], %s2607_s29 }
  0x2d   : > { %2908 = dma.done.wait (%p2999_p4), %s150_s30, 128  }
  0x2e   : > { %2910 = vsyncadd (%p2999_p4), %s150_s30, 4294967168 }
  0x2f   : > { %159 = sfence }
  0x30   : > { %v187_v0 = vld [vmem:[%s3072_s3] sm:$0xff]  ;;  %vm194_vm0 = vcmask 1043456   ;;  %s2932_s15 = smov 115   ;;  %s2933_s20 = smov 3   ;;  %vm176_vm1 = vcmask 179200   ;;  %v2940_v35 = vmov 0.0  }
  0x31   : > { %189 = vst [vmem:[#allocation1] ss:$2 sm:$0xff] %v187_v0  ;;  %s2934_s4 = smov 99   ;;  %s2935_s5 = smov 51   ;;  %vm236_vm2 = vcmask 147480   ;;  %vm179_vm3 = vcmask 177152  }
  0x32   : > { %s2936_s6 = smov 83   ;;  %s2937_s7 = smov 67   ;;  %177 = vst.msk [vmem:[#allocation2] sm:$0xff] %vm176_vm1, %v2940_v35  ;;  %vm816_vm4 = vcmask 1045504   ;;  %vm2065_vm5 = vcmask 1041408   ;;  %vm2346_vm6 = vcmask 1046528  }
  0x33   : > { %s2938_s8 = smov 35   ;;  %s2939_s14 = smov 19   ;;  %178 = vst.msk [vmem:[#allocation2 + $0x8] sm:$0xff] %vm176_vm1, %v2940_v35  ;;  %vm2466_vm15 = vcmask 130048  }
  0x34   : > { %181 = vst.msk [vmem:[#allocation3] sm:$0xff] %vm176_vm1, %v2940_v35  ;;  %s3117_s17 = sld [smem:[#allocation4 + $0x1]]  ;;  %s2941_s18 = smov 127  }
  0x35   : > { %182 = vst.msk [vmem:[#allocation3 + $0x8] sm:$0xff] %vm176_vm1, %v2940_v35  ;;  %s2612_s19 = sld [smem:[#allocation4 + $0x2]]  ;;  %s2942_s24 = smov 126   ;;  %vm2468_vm1 = vcmask 261120  }
  0x36   : > { %180 = vst.msk [vmem:[#allocation2 + $0x10] sm:$0x3f] %vm179_vm3, %v2940_v35  ;;  %s2614_s22 = sld [smem:[#allocation4 + $0x3]]  ;;  %s2943_s28 = smov 125  }
  0x37   : > { %183 = vst.msk [vmem:[#allocation3 + $0x10] sm:$0x3f] %vm179_vm3, %v2940_v35  ;;  %s3148_s23 = sld [smem:[#allocation4 + $0x4]]  ;;  %vm2472_vm3 = vcmask 523264  }
  0x38   : > { %v190_v1 = vld.sshfl [vmem:[#allocation1] sm:$0xff pattern:$0x75316420]  ;;  %v191_v2 = vld.sshfl [vmem:[#allocation1 + $0x8] sm:$0xff pattern:$0x75316420] }
  0x39   : > { %v195_v3 = vsel %vm194_vm0, %v190_v1, 0.0  ;;  %211 = vst [vmem:[#allocation1] ss:$2 sm:$0xff] %v187_v0  ;;  %v202_v18 = vsel %vm194_vm0, %v191_v2, 0.0  ;;  %s2618_s30 = sld [smem:[#allocation4 + $0x5]] }
  0x3a   : > { %v196_v4 = vrot.slane %v195_v3, 4  ;;  %v203_v20 = vrot.slane %v202_v18, 4  ;;  %v385_v45 = vstv %s3117_s17  ;;  %s2617_s17 = sld [smem:[#allocation4 + $0x35]] }
  0x3c   : > { %v197_v5 = vadd.f32 %v196_v4, %v195_v3  ;;  %v204_v22 = vadd.f32 %v203_v20, %v202_v18 }
  0x3e   : > { %v198_v6 = vrot.slane %v197_v5, 2  ;;  %v205_v25 = vrot.slane %v204_v22, 2 }
  0x40   : > { %v199_v7 = vadd.f32 %v198_v6, %v197_v5  ;;  %v212_v8 = vld.sshfl [vmem:[#allocation1] sm:$0xff pattern:$0x75316420]  ;;  %v213_v21 = vld.sshfl [vmem:[#allocation1 + $0x8] sm:$0xff pattern:$0x75316420]  ;;  %v206_v27 = vadd.f32 %v205_v25, %v204_v22  ;;  %v413_v6 = vstv %s2612_s19 }
  0x41   : > { %v216_v9 = vsel %vm194_vm0, %v212_v8, -inf  ;;  %v223_v23 = vsel %vm194_vm0, %v213_v21, -inf  ;;  %s2619_s19 = sld [smem:[#allocation4 + $0x36]] }
  0x42   : > { %v200_v10 = vrot.slane %v199_v7, 1  ;;  %v217_v11 = vrot.slane %v216_v9, 4  ;;  %v224_v24 = vrot.slane %v223_v23, 4  ;;  %v207_v29 = vrot.slane %v206_v27, 1 }
  0x44   : > { %v201_v12 = vadd.f32 %v200_v10, %v199_v7  ;;  %v218_v13 = vmax.f32 %v216_v9, %v217_v11  ;;  %v225_v26 = vmax.f32 %v223_v23, %v224_v24  ;;  %v208_v31 = vadd.f32 %v207_v29, %v206_v27 }
  0x45   : > { %v441_v7 = vstv %s2614_s22  ;;  %s2621_s22 = sld [smem:[#allocation4 + $0x37]] }
  0x46   : > { %v230_v14 = vmul.f32 0.25, %v201_v12  ;;  %v219_v15 = vrot.slane %v218_v13, 2  ;;  %v226_v28 = vrot.slane %v225_v26, 2  ;;  %v231_v33 = vmul.f32 0.25, %v208_v31 }
  0x48   : > { %243 = vrot.lane.b32.xlu1 %v230_v14, %s2932_s15  ;;  %233 = vrot.lane.b32.xlu0 %v230_v14, %s2933_s20  ;;  %v220_v16 = vmax.f32 %v218_v13, %v219_v15  ;;  %v227_v30 = vmax.f32 %v225_v26, %v226_v28  ;;  %v469_v13 = vstv %s3148_s23  ;;  %s2625_s23 = sld [smem:[#allocation4 + $0x39]] }
  0x49   : > { %251 = vrot.lane.b32.xlu2 %v230_v14, %s2934_s4 }
  0x4a   : > { %v221_v17 = vrot.slane %v220_v16, 1  ;;  %v228_v32 = vrot.slane %v227_v30, 1 }
  0x4c   : > { %v222_v19 = vmax.f32 %v220_v16, %v221_v17  ;;  %v229_v34 = vmax.f32 %v227_v30, %v228_v32  ;;  %v497_v17 = vstv %s2618_s30  ;;  %s2626_s30 = sld [smem:[#allocation4 + $0x9]] }
  0x50   : > { %275 = vrot.lane.b32.xlu1 %v230_v14, %s2935_s5  ;;  %259 = vrot.lane.b32.xlu0 %v230_v14, %s2936_s6 }
  0x51   : > { %267 = vrot.lane.b32.xlu2 %v230_v14, %s2937_s7 }
  0x58   : > { %247 = vrot.lane.b32.xlu1 %v222_v19, %s2932_s15  ;;  %239 = vrot.lane.b32.xlu0 %v222_v19, %s2933_s20 }
  0x59   : > { %255 = vrot.lane.b32.xlu2 %v222_v19, %s2934_s4 }
  0x60   : > { %263 = vrot.lane.b32.xlu1 %v222_v19, %s2936_s6  ;;  %271 = vrot.lane.b32.xlu0 %v222_v19, %s2937_s7 }
  0x61   : > { %279 = vrot.lane.b32.xlu2 %v222_v19, %s2935_s5 }
  0x68   : > { %287 = vrot.lane.b32.xlu1 %v222_v19, %s2938_s8  ;;  %283 = vrot.lane.b32.xlu0 %v230_v14, %s2938_s8 }
  0x69   : > { %291 = vrot.lane.b32.xlu2 %v230_v14, %s2939_s14 }
  0x70   : > { %300 = vrot.lane.b32.xlu1 %v231_v33, %s2933_s20  ;;  %295 = vrot.lane.b32.xlu0 %v222_v19, %s2939_s14 }
  0x71   : > { %305 = vrot.lane.b32.xlu2 %v229_v34, %s2933_s20  ;;  %s2944_s20 = smov 124  }
  0x78   : > { %313 = vrot.lane.b32.xlu1 %v229_v34, %s2932_s15  ;;  %309 = vrot.lane.b32.xlu0 %v231_v33, %s2932_s15  ;;  %s2620_s15 = sld [smem:[#allocation4 + $0x6]] }
  0x79   : > { %317 = vrot.lane.b32.xlu2 %v231_v33, %s2934_s4 }
  0x7e   : > { %v525_v20 = vstv %s2620_s15  ;;  %s2627_s15 = sld [smem:[#allocation4 + $0x3a]] }
  0x80   : > { %325 = vrot.lane.b32.xlu1 %v231_v33, %s2936_s6  ;;  %321 = vrot.lane.b32.xlu0 %v229_v34, %s2934_s4  ;;  %s2624_s4 = sld [smem:[#allocation4 + $0x8]] }
  0x81   : > { %329 = vrot.lane.b32.xlu2 %v229_v34, %s2936_s6  ;;  %s2946_s6 = smov 122  }
  0x86   : > { %v569_v22 = vstv %s2624_s4  ;;  %s2628_s4 = sld [smem:[#allocation4 + $0xa]] }
  0x88   : > { %337 = vrot.lane.b32.xlu1 %v229_v34, %s2937_s7  ;;  %333 = vrot.lane.b32.xlu0 %v231_v33, %s2937_s7  ;;  %s2611_s7 = sld [smem:[#allocation4 + $0x32]] }
  0x89   : > { %341 = vrot.lane.b32.xlu2 %v231_v33, %s2935_s5 }
  0x8e   : > { %v398_v30 = vstv %s2611_s7  ;;  %s2629_s7 = sld [smem:[#allocation4 + $0x3b]] }
  0x90   : > { %349 = vrot.lane.b32.xlu1 %v231_v33, %s2938_s8  ;;  %345 = vrot.lane.b32.xlu0 %v229_v34, %s2935_s5  ;;  %s2945_s5 = smov 123  }
  0x91   : > { %353 = vrot.lane.b32.xlu2 %v229_v34, %s2938_s8  ;;  %s2613_s8 = sld [smem:[#allocation4 + $0x33]] }
  0x98   : > { %361 = vrot.lane.b32.xlu1 %v229_v34, %s2939_s14  ;;  %357 = vrot.lane.b32.xlu0 %v231_v33, %s2939_s14  ;;  %s2615_s14 = sld [smem:[#allocation4 + $0x34]]  ;;  %v426_v33 = vstv %s2613_s8 }
  0x99   : > { %s2630_s8 = sld [smem:[#allocation4 + $0xb]] }
  0xa3   : > { %v252_v36 = vpop.permute.xlu2 %251 }
  0xa4   : > { %254 = vst.msk [vmem:[#allocation2 + $0x5] sm:$0x1] %vm236_vm2, %v252_v36 }
  0xab   : > { %v268_v37 = vpop.permute.xlu2 %267 }
  0xac   : > { %270 = vst.msk [vmem:[#allocation2 + $0x7] sm:$0x1] %vm236_vm2, %v268_v37  ;;  %v454_v37 = vstv %s2615_s14  ;;  %s2631_s14 = sld [smem:[#allocation4 + $0x3c]] }
  0xb3   : > { %v256_v38 = vpop.permute.xlu2 %255 }
  0xb4   : > { %258 = vst.msk [vmem:[#allocation3 + $0x5] sm:$0x1] %vm236_vm2, %v256_v38 }
  0xba   : > { %v244_v39 = vpop.permute.xlu1 %243  ;;  %v234_v40 = vpop.permute.xlu0 %233 }
  0xbb   : > { %246 = vst.msk [vmem:[#allocation2 + $0x4] sm:$0x1] %vm236_vm2, %v244_v39  ;;  %v280_v41 = vpop.permute.xlu2 %279 }
  0xbc   : > { %237 = vst.msk [vmem:[#allocation2 + $0x3] sm:$0x1] %vm236_vm2, %v234_v40  ;;  %v482_v40 = vstv %s2617_s17  ;;  %s2632_s17 = sld [smem:[#allocation4 + $0xc]] }
  0xbd   : > { %282 = vst.msk [vmem:[#allocation3 + $0x8] sm:$0x1] %vm236_vm2, %v280_v41 }
  0xc2   : > { %v276_v42 = vpop.permute.xlu1 %275  ;;  %v260_v43 = vpop.permute.xlu0 %259 }
  0xc3   : > { %278 = vst.msk [vmem:[#allocation2 + $0x8] sm:$0x1] %vm236_vm2, %v276_v42  ;;  %v292_v44 = vpop.permute.xlu2 %291  ;;  %v510_v42 = vstv %s2619_s19  ;;  %s2633_s19 = sld [smem:[#allocation4 + $0x3d]] }
  0xc4   : > { %262 = vst.msk [vmem:[#allocation2 + $0x6] sm:$0x1] %vm236_vm2, %v260_v43 }
  0xc5   : > { %294 = vst.msk [vmem:[#allocation2 + $0xa] sm:$0x1] %vm236_vm2, %v292_v44 }
  0xca   : > { %v248_v46 = vpop.permute.xlu1 %247  ;;  %v240_v47 = vpop.permute.xlu0 %239 }
  0xcb   : > { %v3123_v48 = vld [vmem:[#allocation2] sm:$0xff]  ;;  %250 = vst.msk [vmem:[#allocation3 + $0x4] sm:$0x1] %vm236_vm2, %v248_v46  ;;  %v306_v49 = vpop.permute.xlu2 %305  ;;  %v538_v46 = vstv %s2621_s22  ;;  %s2634_s22 = sld [smem:[#allocation4 + $0xd]] }
  0xcc   : > { %242 = vst.msk [vmem:[#allocation3 + $0x3] sm:$0x1] %vm236_vm2, %v240_v47  ;;  %v386_v50 = vmul.f32 %v385_v45, %v3123_v48  ;;  %v442_v14 = vmul.f32 %v441_v7, %v3123_v48  ;;  %v414_v15 = vmul.f32 %v413_v6, %v3123_v48  ;;  %v470_v16 = vmul.f32 %v469_v13, %v3123_v48 }
  0xcd   : > { %308 = vst.msk [vmem:[#allocation3 + $0xb] sm:$0x1] %vm236_vm2, %v306_v49  ;;  %v526_v23 = vmul.f32 %v525_v20, %v3123_v48  ;;  %v498_v24 = vmul.f32 %v497_v17, %v3123_v48  ;;  %v570_v25 = vmul.f32 %v569_v22, %v3123_v48  ;;  %v588_v47 = vstv %s2625_s23  ;;  %s2635_s23 = sld [smem:[#allocation4 + $0x3e]] }
  0xce   : > { %390 = vrot.lane.b32.xlu2 %v386_v50, %s2941_s18 }
  0xd2   : > { %v264_v51 = vpop.permute.xlu1 %263  ;;  %v272_v52 = vpop.permute.xlu0 %271 }
  0xd3   : > { %266 = vst.msk [vmem:[#allocation3 + $0x6] sm:$0x1] %vm236_vm2, %v264_v51  ;;  %v318_v53 = vpop.permute.xlu2 %317 }
  0xd4   : > { %274 = vst.msk [vmem:[#allocation3 + $0x7] sm:$0x1] %vm236_vm2, %v272_v52  ;;  %v609_v52 = vstv %s2626_s30  ;;  %s2638_s30 = sld [smem:[#allocation4 + $0xf]] }
  0xd5   : > { %320 = vst.msk [vmem:[#allocation2 + $0xd] sm:$0x1] %vm236_vm2, %v318_v53 }
  0xda   : > { %v288_v54 = vpop.permute.xlu1 %287  ;;  %v284_v55 = vpop.permute.xlu0 %283 }
  0xdb   : > { %290 = vst.msk [vmem:[#allocation3 + $0x9] sm:$0x1] %vm236_vm2, %v288_v54  ;;  %v330_v56 = vpop.permute.xlu2 %329  ;;  %v3191_v32 = vld [vmem:[#allocation3] sm:$0xff] }
  0xdc   : > { %286 = vst.msk [vmem:[#allocation2 + $0x9] sm:$0x1] %vm236_vm2, %v284_v55  ;;  %v399_v34 = vmul.f32 %v398_v30, %v3191_v32  ;;  %v427_v36 = vmul.f32 %v426_v33, %v3191_v32  ;;  %v455_v39 = vmul.f32 %v454_v37, %v3191_v32  ;;  %v483_v43 = vmul.f32 %v482_v40, %v3191_v32 }
  0xdd   : > { %332 = vst.msk [vmem:[#allocation3 + $0xe] sm:$0x1] %vm236_vm2, %v330_v56  ;;  %v539_v50 = vmul.f32 %v538_v46, %v3191_v32  ;;  %v589_v51 = vmul.f32 %v588_v47, %v3191_v32  ;;  %v610_v56 = vmul.f32 %v609_v52, %v3123_v48 }
  0xe2   : > { %v301_v57 = vpop.permute.xlu1 %300  ;;  %v296_v58 = vpop.permute.xlu0 %295 }
  0xe3   : > { %303 = vst.msk [vmem:[#allocation2 + $0xb] sm:$0x1] %vm236_vm2, %v301_v57  ;;  %v342_v59 = vpop.permute.xlu2 %341  ;;  %v628_v57 = vstv %s2627_s15  ;;  %s2639_s15 = sld [smem:[#allocation4 + $0x40]] }
  0xe4   : > { %298 = vst.msk [vmem:[#allocation3 + $0xa] sm:$0x1] %vm236_vm2, %v296_v58 }
  0xe5   : > { %344 = vst.msk [vmem:[#allocation2 + $0x10] sm:$0x1] %vm236_vm2, %v342_v59 }
  0xea   : > { %v314_v60 = vpop.permute.xlu1 %313  ;;  %v310_v61 = vpop.permute.xlu0 %309 }
  0xeb   : > { %316 = vst.msk [vmem:[#allocation3 + $0xc] sm:$0x1] %vm236_vm2, %v314_v60  ;;  %v354_v62 = vpop.permute.xlu2 %353  ;;  %v629_v60 = vmul.f32 %v628_v57, %v3191_v32 }
  0xec   : > { %312 = vst.msk [vmem:[#allocation2 + $0xc] sm:$0x1] %vm236_vm2, %v310_v61 }
  0xed   : > { %356 = vst.msk [vmem:[#allocation3 + $0x11] sm:$0x1] %vm236_vm2, %v354_v62  ;;  %v649_v62 = vstv %s2628_s4  ;;  %s2640_s4 = sld [smem:[#allocation4 + $0x10]] }
  0xf2   : > { %v326_v63 = vpop.permute.xlu1 %325  ;;  %v322_v0 = vpop.permute.xlu0 %321 }
  0xf3   : > { %328 = vst.msk [vmem:[#allocation2 + $0xe] sm:$0x1] %vm236_vm2, %v326_v63 }
  0xf4   : > { %324 = vst.msk [vmem:[#allocation3 + $0xd] sm:$0x1] %vm236_vm2, %v322_v0 }
  0xfa   : > { %v338_v1 = vpop.permute.xlu1 %337  ;;  %v334_v2 = vpop.permute.xlu0 %333 }
  0xfb   : > { %340 = vst.msk [vmem:[#allocation3 + $0xf] sm:$0x1] %vm236_vm2, %v338_v1  ;;  %v650_v1 = vmul.f32 %v649_v62, %v3123_v48 }
  0xfc   : > { %336 = vst.msk [vmem:[#allocation2 + $0xf] sm:$0x1] %vm236_vm2, %v334_v2 }
 0x102   : > { %v350_v3 = vpop.permute.xlu1 %349  ;;  %v346_v4 = vpop.permute.xlu0 %345  ;;  %v3183_v27 = vld [vmem:[#allocation3 + $0x8] sm:$0xff] }
 0x103   : > { %v3150_v5 = vld [vmem:[#allocation2 + $0x8] sm:$0xff]  ;;  %352 = vst.msk [vmem:[#allocation2 + $0x11] sm:$0x1] %vm236_vm2, %v350_v3  ;;  %v400_v31 = vmul.f32 %v398_v30, %v3183_v27  ;;  %v428_v35 = vmul.f32 %v426_v33, %v3183_v27  ;;  %v456_v38 = vmul.f32 %v454_v37, %v3183_v27  ;;  %v484_v41 = vmul.f32 %v482_v40, %v3183_v27 }
 0x104   : > { %348 = vst.msk [vmem:[#allocation3 + $0x10] sm:$0x1] %vm236_vm2, %v346_v4  ;;  %v415_v8 = vmul.f32 %v413_v6, %v3150_v5  ;;  %v387_v9 = vmul.f32 %v385_v45, %v3150_v5  ;;  %v443_v10 = vmul.f32 %v441_v7, %v3150_v5  ;;  %v499_v18 = vmul.f32 %v497_v17, %v3150_v5 }
 0x105   : > { %v471_v19 = vmul.f32 %v469_v13, %v3150_v5  ;;  %v527_v21 = vmul.f32 %v525_v20, %v3150_v5  ;;  %v571_v29 = vmul.f32 %v569_v22, %v3150_v5  ;;  %v512_v44 = vmul.f32 %v510_v42, %v3183_v27 }
 0x106   : > { %420 = vrot.lane.b32.xlu1 %v415_v8, %s2942_s24  ;;  %392 = vrot.lane.b32.xlu0 %v387_v9, %s2941_s18  ;;  %v511_v45 = vmul.f32 %v510_v42, %v3191_v32  ;;  %v540_v49 = vmul.f32 %v538_v46, %v3183_v27  ;;  %v590_v55 = vmul.f32 %v588_v47, %v3183_v27  ;;  %v668_v3 = vstv %s2629_s7  ;;  %s2641_s7 = sld [smem:[#allocation4 + $0x41]] }
 0x107   : > { %448 = vrot.lane.b32.xlu2 %v443_v10, %s2943_s28  ;;  %v611_v59 = vmul.f32 %v609_v52, %v3150_v5  ;;  %v630_v0 = vmul.f32 %v628_v57, %v3183_v27  ;;  %v651_v6 = vmul.f32 %v649_v62, %v3150_v5  ;;  %v669_v7 = vmul.f32 %v668_v3, %v3191_v32 }
 0x108   : > { %v689_v9 = vstv %s2630_s8  ;;  %v748_v30 = vstv %s2633_s19  ;;  %s2642_s8 = sld [smem:[#allocation4 + $0x11]] }
 0x109   : > { %v750_v40 = vmul.f32 %v748_v30, %v3183_v27  ;;  %s2645_s19 = sld [smem:[#allocation4 + $0x43]] }
 0x10a   : > { %v362_v11 = vpop.permute.xlu1 %361  ;;  %v358_v12 = vpop.permute.xlu0 %357 }
 0x10b   : > { %364 = vst.msk [vmem:[#allocation3 + $0x12] sm:$0x1] %vm236_vm2, %v362_v11  ;;  %v670_v11 = vmul.f32 %v668_v3, %v3183_v27 }
 0x10c   : > { %360 = vst.msk [vmem:[#allocation2 + $0x12] sm:$0x1] %vm236_vm2, %v358_v12  ;;  %v690_v12 = vmul.f32 %v689_v9, %v3123_v48  ;;  %vm2470_vm2 = vcmask 392192  }
 0x10e   : > { %446 = vrot.lane.b32.xlu1 %v442_v14, %s2943_s28  ;;  %418 = vrot.lane.b32.xlu0 %v414_v15, %s2942_s24  ;;  %v708_v14 = vstv %s2631_s14  ;;  %s2643_s14 = sld [smem:[#allocation4 + $0x42]] }
 0x10f   : > { %474 = vrot.lane.b32.xlu2 %v470_v16, %s2944_s20  ;;  %v691_v16 = vmul.f32 %v689_v9, %v3150_v5  ;;  %v709_v17 = vmul.f32 %v708_v14, %v3191_v32 }
 0x112   : > { %v3217_v53 = vld [vmem:[#allocation3 + $0x10] sm:$0x3f] }
 0x113   : > { %v3181_v26 = vld [vmem:[#allocation2 + $0x10] sm:$0x3f]  ;;  %v591_v54 = vmul.f32 %v588_v47, %v3217_v53  ;;  %v631_v63 = vmul.f32 %v628_v57, %v3217_v53  ;;  %v671_v10 = vmul.f32 %v668_v3, %v3217_v53 }
 0x114   : > { %v572_v28 = vmul.f32 %v569_v22, %v3181_v26  ;;  %v612_v58 = vmul.f32 %v609_v52, %v3181_v26  ;;  %v652_v4 = vmul.f32 %v649_v62, %v3181_v26  ;;  %v692_v15 = vmul.f32 %v689_v9, %v3181_v26 }
 0x115   : > { %v711_v22 = vmul.f32 %v708_v14, %v3217_v53  ;;  %v864_v62 = vstv %s2639_s15  ;;  %s2649_s15 = sld [smem:[#allocation4 + $0x45]] }
 0x116   : > { %504 = vrot.lane.b32.xlu1 %v499_v18, %s2945_s5  ;;  %476 = vrot.lane.b32.xlu0 %v471_v19, %s2944_s20  ;;  %v867_v3 = vmul.f32 %v864_v62, %v3217_v53 }
 0x117   : > { %532 = vrot.lane.b32.xlu2 %v527_v21, %s2946_s6  ;;  %v729_v21 = vstv %s2632_s17  ;;  %s2644_s17 = sld [smem:[#allocation4 + $0x12]] }
 0x118   : > { %v731_v33 = vmul.f32 %v729_v21, %v3150_v5 }
 0x11e   : > { %530 = vrot.lane.b32.xlu1 %v526_v23, %s2946_s6  ;;  %502 = vrot.lane.b32.xlu0 %v498_v24, %s2945_s5  ;;  %v710_v23 = vmul.f32 %v708_v14, %v3183_v27  ;;  %v730_v24 = vmul.f32 %v729_v21, %v3123_v48 }
 0x11f   : > { %576 = vrot.lane.b32.xlu2 %v570_v25, %s2941_s18 }
 0x126   : > { %580 = vrot.lane.b32.xlu1 %v572_v28, %s2941_s18  ;;  %578 = vrot.lane.b32.xlu0 %v571_v29, %s2941_s18 }
 0x127   : > { %405 = vrot.lane.b32.xlu2 %v400_v31, %s2941_s18  ;;  %v732_v31 = vmul.f32 %v729_v21, %v3181_v26 }
 0x128   : > { %v3231_v61 = vpop.permute.xlu2 %390 }
 0x12e   : > { %403 = vrot.lane.b32.xlu1 %v399_v34, %s2941_s18  ;;  %433 = vrot.lane.b32.xlu0 %v428_v35, %s2942_s24  ;;  %v749_v34 = vmul.f32 %v748_v30, %v3191_v32 }
 0x12f   : > { %431 = vrot.lane.b32.xlu2 %v427_v36, %s2942_s24 }
 0x136   : > { %461 = vrot.lane.b32.xlu1 %v456_v38, %s2943_s28  ;;  %459 = vrot.lane.b32.xlu0 %v455_v39, %s2943_s28  ;;  %v769_v38 = vstv %s2634_s22  ;;  %v751_v39 = vmul.f32 %v748_v30, %v3217_v53  ;;  %s2646_s22 = sld [smem:[#allocation4 + $0x13]] }
 0x137   : > { %489 = vrot.lane.b32.xlu2 %v484_v41, %s2944_s20  ;;  %v770_v41 = vmul.f32 %v769_v38, %v3123_v48  ;;  %v772_v46 = vmul.f32 %v769_v38, %v3181_v26  ;;  %v771_v47 = vmul.f32 %v769_v38, %v3150_v5 }
 0x13e   : > { %487 = vrot.lane.b32.xlu1 %v483_v43, %s2944_s20  ;;  %517 = vrot.lane.b32.xlu0 %v512_v44, %s2945_s5 }
 0x13f   : > { %515 = vrot.lane.b32.xlu2 %v511_v45, %s2945_s5  ;;  %v788_v45 = vstv %s2635_s23  ;;  %s2647_s23 = sld [smem:[#allocation4 + $0x44]] }
 0x146   : > { %545 = vrot.lane.b32.xlu1 %v540_v49, %s2946_s6  ;;  %543 = vrot.lane.b32.xlu0 %v539_v50, %s2946_s6  ;;  %v789_v49 = vmul.f32 %v788_v45, %v3191_v32  ;;  %v844_v50 = vstv %s2638_s30  ;;  %s2648_s30 = sld [smem:[#allocation4 + $0x14]] }
 0x147   : > { %595 = vrot.lane.b32.xlu2 %v589_v51, %s2941_s18  ;;  %v846_v51 = vmul.f32 %v844_v50, %v3150_v5 }
 0x149   : > { %v852_v57 = vrot.slane %v846_v51, 2 }
 0x14e   : > { %599 = vrot.lane.b32.xlu1 %v591_v54, %s2941_s18  ;;  %597 = vrot.lane.b32.xlu0 %v590_v55, %s2941_s18  ;;  %v845_v55 = vmul.f32 %v844_v50, %v3123_v48 }
 0x14f   : > { %616 = vrot.lane.b32.xlu2 %v610_v56, %s2942_s24 }
 0x156   : > { %620 = vrot.lane.b32.xlu1 %v612_v58, %s2942_s24  ;;  %618 = vrot.lane.b32.xlu0 %v611_v59, %s2942_s24  ;;  %v791_v58 = vmul.f32 %v788_v45, %v3217_v53  ;;  %v790_v59 = vmul.f32 %v788_v45, %v3183_v27 }
 0x157   : > { %635 = vrot.lane.b32.xlu2 %v629_v60, %s2942_s24  ;;  %v851_v60 = vrot.slane %v845_v55, 2 }
 0x15e   : > { %639 = vrot.lane.b32.xlu1 %v631_v63, %s2942_s24  ;;  %637 = vrot.lane.b32.xlu0 %v630_v0, %s2942_s24  ;;  %v866_v63 = vmul.f32 %v864_v62, %v3183_v27  ;;  %v847_v0 = vmul.f32 %v844_v50, %v3181_v26 }
 0x15f   : > { %656 = vrot.lane.b32.xlu2 %v650_v1, %s2943_s28  ;;  %v853_v1 = vsel %vm816_vm4, %v851_v60, %v852_v57 }
 0x161   : > { %v3239_v2 = vpop.permute.xlu2 %448 }
 0x166   : > { %660 = vrot.lane.b32.xlu1 %v652_v4, %s2943_s28  ;;  %658 = vrot.lane.b32.xlu0 %v651_v6, %s2943_s28  ;;  %v865_v4 = vmul.f32 %v864_v62, %v3191_v32 }
 0x167   : > { %675 = vrot.lane.b32.xlu2 %v669_v7, %s2943_s28 }
 0x168   : > { %v871_v14 = vrot.slane %v865_v4, 2 }
 0x169   : > { %v3247_v8 = vpop.permute.xlu2 %474 }
 0x16e   : > { %679 = vrot.lane.b32.xlu1 %v671_v10, %s2943_s28  ;;  %677 = vrot.lane.b32.xlu0 %v670_v11, %s2943_s28  ;;  %v872_v10 = vrot.slane %v866_v63, 2  ;;  %v854_v11 = vrot.slane %v847_v0, 2 }
 0x16f   : > { %696 = vrot.lane.b32.xlu2 %v690_v12, %s2944_s20  ;;  %v874_v12 = vrot.slane %v867_v3, 2 }
 0x170   : > { %v855_v21 = vsel %vm816_vm4, %v852_v57, %v854_v11  ;;  %v948_v11 = vstv %s2643_s14  ;;  %s2655_s14 = sld [smem:[#allocation4 + $0x48]] }
 0x171   : > { %v3255_v13 = vpop.permute.xlu2 %532 }
 0x176   : > { %700 = vrot.lane.b32.xlu1 %v692_v15, %s2944_s20  ;;  %698 = vrot.lane.b32.xlu0 %v691_v16, %s2944_s20  ;;  %v886_v15 = vstv %s2640_s4  ;;  %v906_v16 = vstv %s2641_s7  ;;  %s2652_s4 = sld [smem:[#allocation4 + $0x16]] }
 0x177   : > { %715 = vrot.lane.b32.xlu2 %v709_v17, %s2944_s20  ;;  %v873_v17 = vsel %vm816_vm4, %v871_v14, %v872_v10  ;;  %v908_v30 = vmul.f32 %v906_v16, %v3183_v27  ;;  %v907_v38 = vmul.f32 %v906_v16, %v3191_v32  ;;  %v909_v57 = vmul.f32 %v906_v16, %v3217_v53  ;;  %s2653_s7 = sld [smem:[#allocation4 + $0x47]] }
 0x178   : > { %v3263_v18 = vpop.permute.xlu1 %420  ;;  %v3265_v19 = vpop.permute.xlu0 %392  ;;  %v950_v16 = vmul.f32 %v948_v11, %v3183_v27 }
 0x179   : > { %v3267_v20 = vpop.permute.xlu2 %576  ;;  %v914_v45 = vrot.slane %v908_v30, 2  ;;  %v916_v3 = vrot.slane %v909_v57, 2 }
 0x17e   : > { %719 = vrot.lane.b32.xlu1 %v711_v22, %s2944_s20  ;;  %717 = vrot.lane.b32.xlu0 %v710_v23, %s2944_s20  ;;  %v888_v22 = vmul.f32 %v886_v15, %v3150_v5  ;;  %v889_v23 = vmul.f32 %v886_v15, %v3181_v26 }
 0x17f   : > { %736 = vrot.lane.b32.xlu2 %v730_v24, %s2945_s5  ;;  %v875_v24 = vsel %vm816_vm4, %v872_v10, %v874_v12  ;;  %v970_v12 = vstv %s2644_s17  ;;  %s2656_s17 = sld [smem:[#allocation4 + $0x18]] }
 0x180   : > { %v3275_v25 = vpop.permute.xlu1 %446  ;;  %v3277_v28 = vpop.permute.xlu0 %418  ;;  %v973_v57 = vmul.f32 %v970_v12, %v3181_v26 }
 0x181   : > { %v3279_v29 = vpop.permute.xlu2 %405 }
 0x186   : > { %740 = vrot.lane.b32.xlu1 %v732_v31, %s2945_s5  ;;  %738 = vrot.lane.b32.xlu0 %v731_v33, %s2945_s5  ;;  %v887_v31 = vmul.f32 %v886_v15, %v3123_v48  ;;  %v917_v15 = vsel %vm816_vm4, %v914_v45, %v916_v3 }
 0x187   : > { %755 = vrot.lane.b32.xlu2 %v749_v34, %s2945_s5 }
 0x188   : > { %v3287_v35 = vpop.permute.xlu1 %504  ;;  %v3289_v36 = vpop.permute.xlu0 %476 }
 0x189   : > { %v3291_v37 = vpop.permute.xlu2 %431 }
 0x18e   : > { %759 = vrot.lane.b32.xlu1 %v751_v39, %s2945_s5  ;;  %757 = vrot.lane.b32.xlu0 %v750_v40, %s2945_s5  ;;  %v894_v40 = vrot.slane %v888_v22, 2  ;;  %v972_v22 = vmul.f32 %v970_v12, %v3150_v5 }
 0x18f   : > { %776 = vrot.lane.b32.xlu2 %v770_v41, %s2946_s6  ;;  %v896_v41 = vrot.slane %v889_v23, 2  ;;  %v949_v23 = vmul.f32 %v948_v11, %v3191_v32 }
 0x190   : > { %v3299_v42 = vpop.permute.xlu1 %530  ;;  %v3301_v43 = vpop.permute.xlu0 %502 }
 0x191   : > { %v3303_v44 = vpop.permute.xlu2 %489  ;;  %v897_v50 = vsel %vm816_vm4, %v894_v40, %v896_v41 }
 0x196   : > { %780 = vrot.lane.b32.xlu1 %v772_v46, %s2946_s6  ;;  %778 = vrot.lane.b32.xlu0 %v771_v47, %s2946_s6  ;;  %v893_v46 = vrot.slane %v887_v31, 2  ;;  %v913_v47 = vrot.slane %v907_v38, 2  ;;  %v971_v31 = vmul.f32 %v970_v12, %v3123_v48 }
 0x197   : > { %795 = vrot.lane.b32.xlu2 %v789_v49, %s2946_s6  ;;  %v928_v49 = vstv %s2642_s8  ;;  %s2654_s8 = sld [smem:[#allocation4 + $0x17]] }
 0x198   : > { %v3312_v52 = vpop.permute.xlu1 %580  ;;  %v3314_v54 = vpop.permute.xlu0 %578  ;;  %v895_v51 = vsel %vm816_vm4, %v893_v46, %v894_v40  ;;  %v930_v55 = vmul.f32 %v928_v49, %v3150_v5  ;;  %v929_v60 = vmul.f32 %v928_v49, %v3123_v48  ;;  %v956_v40 = vrot.slane %v950_v16, 2 }
 0x199   : > { %4417 = vst [vmem:[#allocation13_spill] sm:$0xff] %v3312_v52  ;;  %v3317_v56 = vpop.permute.xlu2 %515  ;;  %v955_v46 = vrot.slane %v949_v23, 2  ;;  %v1032_v16 = vstv %s2647_s23  ;;  %s3522_s23 = sld [smem:[#allocation4]] }
 0x19a   : > { %4418 = vst [vmem:[#allocation14_spill] sm:$0xff] %v3314_v54  ;;  %v935_v10 = vrot.slane %v929_v60, 2 }
 0x19e   : > { %799 = vrot.lane.b32.xlu1 %v791_v58, %s2946_s6  ;;  %797 = vrot.lane.b32.xlu0 %v790_v59, %s2946_s6  ;;  %v915_v58 = vsel %vm816_vm4, %v913_v47, %v914_v45  ;;  %v931_v59 = vmul.f32 %v928_v49, %v3181_v26  ;;  %v978_v45 = vrot.slane %v972_v22, 2  ;;  %v977_v47 = vrot.slane %v971_v31, 2 }
 0x19f   : > { %856 = vrot.lane.b32.xlu2 %v853_v1, %s2941_s18  ;;  %v936_v1 = vrot.slane %v930_v55, 2  ;;  %v990_v49 = vstv %s2645_s19  ;;  %s2657_s19 = sld [smem:[#allocation4 + $0x49]] }
 0x1a0   : > { %v3329_v6 = vpop.permute.xlu1 %403  ;;  %v3331_v7 = vpop.permute.xlu0 %433  ;;  %v938_v4 = vrot.slane %v931_v59, 2  ;;  %v992_v55 = vmul.f32 %v990_v49, %v3183_v27  ;;  %v993_v59 = vmul.f32 %v990_v49, %v3217_v53  ;;  %v991_v60 = vmul.f32 %v990_v49, %v3191_v32 }
 0x1a1   : > { %v3333_v9 = vpop.permute.xlu2 %595  ;;  %v937_v14 = vsel %vm816_vm4, %v935_v10, %v936_v1 }
 0x1a2   : > { %v998_v10 = vrot.slane %v992_v55, 2  ;;  %v1000_v12 = vrot.slane %v993_v59, 2  ;;  %v1054_v59 = vstv %s2648_s30  ;;  %s2659_s30 = sld [smem:[#allocation4 + $0x4a]] }
 0x1a4   : > { %v1001_v31 = vsel %vm816_vm4, %v998_v10, %v1000_v12  ;;  %v1035_v12 = vmul.f32 %v1032_v16, %v3217_v53 }
 0x1a6   : > { %876 = vrot.lane.b32.xlu1 %v873_v17, %s2941_s18  ;;  %858 = vrot.lane.b32.xlu0 %v855_v21, %s2941_s18  ;;  %v951_v17 = vmul.f32 %v948_v11, %v3217_v53  ;;  %v939_v21 = vsel %vm816_vm4, %v936_v1, %v938_v4  ;;  %v980_v11 = vrot.slane %v973_v57, 2 }
 0x1a7   : > { %878 = vrot.lane.b32.xlu2 %v875_v24, %s2941_s18 }
 0x1a8   : > { %v3345_v33 = vpop.permute.xlu1 %461  ;;  %v3347_v34 = vpop.permute.xlu0 %459  ;;  %v958_v41 = vrot.slane %v951_v17, 2 }
 0x1a9   : > { %v3350_v39 = vpop.permute.xlu2 %616 }
 0x1ae   : > { %900 = vrot.lane.b32.xlu1 %v897_v50, %s2942_s24  ;;  %898 = vrot.lane.b32.xlu0 %v895_v51, %s2942_s24  ;;  %v959_v50 = vsel %vm816_vm4, %v956_v40, %v958_v41  ;;  %v957_v51 = vsel %vm816_vm4, %v955_v46, %v956_v40  ;;  %v1034_v40 = vmul.f32 %v1032_v16, %v3183_v27 }
 0x1af   : > { %918 = vrot.lane.b32.xlu2 %v915_v58, %s2942_s24  ;;  %v979_v58 = vsel %vm816_vm4, %v977_v47, %v978_v45 }
 0x1b0   : > { %v3362_v62 = vpop.permute.xlu1 %487  ;;  %v3364_v63 = vpop.permute.xlu0 %517  ;;  %v1040_v55 = vrot.slane %v1034_v40, 2 }
 0x1b1   : > { %v3366_v0 = vpop.permute.xlu2 %635 }
 0x1b6   : > { %940 = vrot.lane.b32.xlu1 %v937_v14, %s2943_s28  ;;  %920 = vrot.lane.b32.xlu0 %v917_v15, %s2942_s24  ;;  %v997_v14 = vrot.slane %v991_v60, 2  ;;  %v1012_v15 = vstv %s2646_s22  ;;  %s2658_s22 = sld [smem:[#allocation4 + $0x19]] }
 0x1b7   : > { %942 = vrot.lane.b32.xlu2 %v939_v21, %s2943_s28  ;;  %v981_v21 = vsel %vm816_vm4, %v978_v45, %v980_v11  ;;  %v1014_v22 = vmul.f32 %v1012_v15, %v3150_v5  ;;  %v1015_v23 = vmul.f32 %v1012_v15, %v3181_v26  ;;  %v1013_v41 = vmul.f32 %v1012_v15, %v3123_v48 }
 0x1b8   : > { %v3378_v24 = vpop.permute.xlu1 %545  ;;  %v3380_v30 = vpop.permute.xlu0 %543  ;;  %v999_v17 = vsel %vm816_vm4, %v997_v14, %v998_v10  ;;  %v1033_v45 = vmul.f32 %v1032_v16, %v3191_v32  ;;  %v1056_v11 = vmul.f32 %v1054_v59, %v3150_v5  ;;  %v1057_v15 = vmul.f32 %v1054_v59, %v3181_v26 }
 0x1b9   : > { %v3383_v38 = vpop.permute.xlu2 %656  ;;  %v1019_v57 = vrot.slane %v1013_v41, 2  ;;  %v1042_v16 = vrot.slane %v1035_v12, 2 }
 0x1ba   : > { %v1064_v40 = vrot.slane %v1057_v15, 2 }
 0x1be   : > { %962 = vrot.lane.b32.xlu1 %v959_v50, %s2943_s28  ;;  %960 = vrot.lane.b32.xlu0 %v957_v51, %s2943_s28  ;;  %v1020_v50 = vrot.slane %v1014_v22, 2  ;;  %v1022_v51 = vrot.slane %v1015_v23, 2 }
 0x1bf   : > { %982 = vrot.lane.b32.xlu2 %v979_v58, %s2944_s20  ;;  %v1039_v58 = vrot.slane %v1033_v45, 2  ;;  %v1074_v45 = vstv %s2649_s15  ;;  %s2660_s15 = sld [smem:[#allocation4 + $0x1a]] }
 0x1c0   : > { %v3395_v1 = vpop.permute.xlu1 %599  ;;  %v3397_v3 = vpop.permute.xlu0 %597  ;;  %v1023_v60 = vsel %vm816_vm4, %v1020_v50, %v1022_v51  ;;  %v1021_v10 = vsel %vm816_vm4, %v1019_v57, %v1020_v50  ;;  %v1134_v50 = vstv %s2652_s4  ;;  %v1043_v57 = vsel %vm816_vm4, %v1040_v55, %v1042_v16  ;;  %s3549_s4 = sld [smem:[#allocation4 + $0x31]] }
 0x1c1   : > { %4419 = vst [vmem:[#allocation15_spill] sm:$0xff] %v3395_v1  ;;  %v3399_v4 = vpop.permute.xlu2 %675  ;;  %v1041_v14 = vsel %vm816_vm4, %v1039_v58, %v1040_v55  ;;  %v1076_v58 = vmul.f32 %v1074_v45, %v3183_v27 }
 0x1c2   : > { %4420 = vst [vmem:[#allocation16_spill] sm:$0xff] %v3397_v3  ;;  %v3539_v3 = vld [vmem:[#allocation2] sm:$0xff] }
 0x1c6   : > { %1002 = vrot.lane.b32.xlu1 %v999_v17, %s2944_s20  ;;  %984 = vrot.lane.b32.xlu0 %v981_v21, %s2944_s20  ;;  %v1055_v17 = vmul.f32 %v1054_v59, %v3123_v48  ;;  %v1077_v59 = vmul.f32 %v1074_v45, %v3217_v53 }
 0x1c7   : > { %1004 = vrot.lane.b32.xlu2 %v1001_v31, %s2944_s20  ;;  %v1062_v31 = vrot.slane %v1056_v11, 2  ;;  %v1075_v11 = vmul.f32 %v1074_v45, %v3191_v32  ;;  %v1158_v45 = vstv %s2653_s7  ;;  %s2636_s7 = sld [smem:[#allocation4 + $0xe]] }
 0x1c8   : > { %v3411_v46 = vpop.permute.xlu1 %620  ;;  %v3413_v47 = vpop.permute.xlu0 %618  ;;  %v1061_v41 = vrot.slane %v1055_v17, 2  ;;  %v1082_v17 = vrot.slane %v1076_v58, 2  ;;  %v1084_v16 = vrot.slane %v1077_v59, 2  ;;  %v1160_v58 = vmul.f32 %v1158_v45, %v3183_v27 }
 0x1c9   : > { %4421 = vst [vmem:[#allocation17_spill] sm:$0xff] %v3411_v46  ;;  %v3416_v49 = vpop.permute.xlu2 %696 }
 0x1ca   : > { %4422 = vst [vmem:[#allocation18_spill] sm:$0xff] %v3413_v47  ;;  %v1063_v51 = vsel %vm816_vm4, %v1061_v41, %v1062_v31 }
 0x1ce   : > { %1026 = vrot.lane.b32.xlu1 %v1023_v60, %s2945_s5  ;;  %1024 = vrot.lane.b32.xlu0 %v1021_v10, %s2945_s5  ;;  %v1065_v60 = vsel %vm816_vm4, %v1062_v31, %v1064_v40  ;;  %v1136_v10 = vmul.f32 %v1134_v50, %v3150_v5  ;;  %v1085_v31 = vsel %vm816_vm4, %v1082_v17, %v1084_v16 }
 0x1cf   : > { %1044 = vrot.lane.b32.xlu2 %v1041_v14, %s2945_s5  ;;  %v1135_v14 = vmul.f32 %v1134_v50, %v3123_v48 }
 0x1d0   : > { %v3428_v21 = vpop.permute.xlu1 %639  ;;  %v3430_v22 = vpop.permute.xlu0 %637  ;;  %v1142_v41 = vrot.slane %v1136_v10, 2 }
 0x1d1   : > { %4423 = vst [vmem:[#allocation19_spill] sm:$0xff] %v3428_v21  ;;  %v3432_v23 = vpop.permute.xlu2 %715 }
 0x1d2   : > { %4424 = vst [vmem:[#allocation20_spill] sm:$0xff] %v3430_v22  ;;  %v1284_v22 = vstv %s2658_s22  ;;  %s3612_s22 = sld [smem:[#allocation4 + $0x38]] }
 0x1d6   : > { %1066 = vrot.lane.b32.xlu1 %v1063_v51, %s2946_s6  ;;  %1046 = vrot.lane.b32.xlu0 %v1043_v57, %s2945_s5  ;;  %v1081_v51 = vrot.slane %v1075_v11, 2  ;;  %v1141_v57 = vrot.slane %v1135_v14, 2  ;;  %v1159_v11 = vmul.f32 %v1158_v45, %v3191_v32 }
 0x1d7   : > { %1068 = vrot.lane.b32.xlu2 %v1065_v60, %s2946_s6  ;;  %v1137_v60 = vmul.f32 %v1134_v50, %v3181_v26 }
 0x1d8   : > { %v3444_v12 = vpop.permute.xlu1 %660  ;;  %v3446_v55 = vpop.permute.xlu0 %658  ;;  %v1083_v40 = vsel %vm816_vm4, %v1081_v51, %v1082_v17  ;;  %v1143_v21 = vsel %vm816_vm4, %v1141_v57, %v1142_v41  ;;  %v1166_v17 = vrot.slane %v1160_v58, 2  ;;  %v1165_v16 = vrot.slane %v1159_v11, 2 }
 0x1d9   : > { %4425 = vst [vmem:[#allocation21_spill] sm:$0xff] %v3444_v12  ;;  %v3449_v15 = vpop.permute.xlu2 %736  ;;  %v1144_v50 = vrot.slane %v1137_v60, 2  ;;  %v1184_v57 = vstv %s2654_s8  ;;  %s3560_s8 = sld [smem:[#allocation4 + $0x4b]] }
 0x1da   : > { %4426 = vst [vmem:[#allocation22_spill] sm:$0xff] %v3446_v55 }
 0x1db   : > { %v1145_v51 = vsel %vm816_vm4, %v1142_v41, %v1144_v50  ;;  %v1185_v41 = vmul.f32 %v1184_v57, %v3123_v48 }
 0x1dd   : > { %v1191_v1 = vrot.slane %v1185_v41, 2 }
 0x1de   : > { %1088 = vrot.lane.b32.xlu1 %v1085_v31, %s2946_s6  ;;  %1086 = vrot.lane.b32.xlu0 %v1083_v40, %s2946_s6  ;;  %v1161_v31 = vmul.f32 %v1158_v45, %v3217_v53  ;;  %v1186_v40 = vmul.f32 %v1184_v57, %v3150_v5 }
 0x1df   : > { %1146 = vrot.lane.b32.xlu2 %v1143_v21, %s2941_s18  ;;  %v1167_v21 = vsel %vm816_vm4, %v1165_v16, %v1166_v17  ;;  %v1208_v16 = vstv %s2655_s14  ;;  %s3573_s14 = sld [smem:[#allocation4 + $0x7]] }
 0x1e0   : > { %v3459_v59 = vpop.permute.xlu1 %679  ;;  %v3461_v10 = vpop.permute.xlu0 %677  ;;  %v1168_v45 = vrot.slane %v1161_v31, 2  ;;  %v1192_v11 = vrot.slane %v1186_v40, 2 }
 0x1e1   : > { %4427 = vst [vmem:[#allocation23_spill] sm:$0xff] %v3459_v59  ;;  %v3464_v14 = vpop.permute.xlu2 %755 }
 0x1e2   : > { %4428 = vst [vmem:[#allocation24_spill] sm:$0xff] %v3461_v10 }
 0x1e6   : > { %1150 = vrot.lane.b32.xlu1 %v1144_v50, %s2941_s18  ;;  %1148 = vrot.lane.b32.xlu0 %v1145_v51, %s2941_s18  ;;  %v1169_v50 = vsel %vm816_vm4, %v1166_v17, %v1168_v45  ;;  %v1187_v51 = vmul.f32 %v1184_v57, %v3181_v26  ;;  %v1209_v17 = vmul.f32 %v1208_v16, %v3191_v32 }
 0x1e7   : > { %1170 = vrot.lane.b32.xlu2 %v1167_v21, %s2941_s18  ;;  %v1193_v21 = vsel %vm816_vm4, %v1191_v1, %v1192_v11  ;;  %v1234_v1 = vstv %s2656_s17  ;;  %s3584_s17 = sld [smem:[#allocation4 + $0x3f]] }
 0x1e8   : > { %v3473_v59 = vpop.permute.xlu1 %700  ;;  %v3475_v60 = vpop.permute.xlu0 %698  ;;  %v1194_v57 = vrot.slane %v1187_v51, 2  ;;  %v1215_v46 = vrot.slane %v1209_v17, 2 }
 0x1e9   : > { %4429 = vst [vmem:[#allocation25_spill] sm:$0xff] %v3473_v59  ;;  %v3478_v58 = vpop.permute.xlu2 %776  ;;  %v1210_v59 = vmul.f32 %v1208_v16, %v3183_v27 }
 0x1ea   : > { %4430 = vst [vmem:[#allocation26_spill] sm:$0xff] %v3475_v60  ;;  %v1308_v60 = vstv %s2659_s30  ;;  %s3641_s30 = sld [smem:[#allocation4 + $0x4c]] }
 0x1eb   : > { %v1216_v41 = vrot.slane %v1210_v59, 2 }
 0x1ee   : > { %1174 = vrot.lane.b32.xlu1 %v1168_v45, %s2941_s18  ;;  %1172 = vrot.lane.b32.xlu0 %v1169_v50, %s2941_s18  ;;  %v1195_v45 = vsel %vm816_vm4, %v1192_v11, %v1194_v57  ;;  %v1211_v50 = vmul.f32 %v1208_v16, %v3217_v53  ;;  %v1235_v11 = vmul.f32 %v1234_v1, %v3123_v48 }
 0x1ef   : > { %1196 = vrot.lane.b32.xlu2 %v1193_v21, %s2942_s24  ;;  %v1217_v21 = vsel %vm816_vm4, %v1215_v46, %v1216_v41  ;;  %v1258_v46 = vstv %s2657_s19  ;;  %s3592_s19 = sld [smem:[#allocation4 + $0x1b]] }
 0x1f0   : > { %v3487_v12 = vpop.permute.xlu1 %719  ;;  %v3489_v31 = vpop.permute.xlu0 %717  ;;  %v1218_v16 = vrot.slane %v1211_v50, 2  ;;  %v1241_v52 = vrot.slane %v1235_v11, 2 }
 0x1f1   : > { %4431 = vst [vmem:[#allocation27_spill] sm:$0xff] %v3487_v12  ;;  %v3492_v40 = vpop.permute.xlu2 %795  ;;  %v1236_v12 = vmul.f32 %v1234_v1, %v3150_v5 }
 0x1f2   : > { %4432 = vst [vmem:[#allocation28_spill] sm:$0xff] %v3489_v31 }
 0x1f3   : > { %4433 = vst [vmem:[#allocation29_spill] sm:$0xff] %v3492_v40  ;;  %v1242_v17 = vrot.slane %v1236_v12, 2 }
 0x1f6   : > { %1200 = vrot.lane.b32.xlu1 %v1194_v57, %s2942_s24  ;;  %1198 = vrot.lane.b32.xlu0 %v1195_v45, %s2942_s24  ;;  %v1219_v57 = vsel %vm816_vm4, %v1216_v41, %v1218_v16  ;;  %v1237_v45 = vmul.f32 %v1234_v1, %v3181_v26  ;;  %v1259_v41 = vmul.f32 %v1258_v46, %v3191_v32 }
 0x1f7   : > { %1220 = vrot.lane.b32.xlu2 %v1217_v21, %s2942_s24  ;;  %v1243_v21 = vsel %vm816_vm4, %v1241_v52, %v1242_v17 }
 0x1f8   : > { %v3501_v31 = vpop.permute.xlu1 %740  ;;  %v3503_v59 = vpop.permute.xlu0 %738  ;;  %v1244_v1 = vrot.slane %v1237_v45, 2 }
 0x1f9   : > { %4434 = vst [vmem:[#allocation30_spill] sm:$0xff] %v3501_v31  ;;  %v3506_v51 = vpop.permute.xlu2 %856  ;;  %v1260_v31 = vmul.f32 %v1258_v46, %v3183_v27 }
 0x1fa   : > { %4435 = vst [vmem:[#allocation31_spill] sm:$0xff] %v3503_v59  ;;  %v1245_v52 = vsel %vm816_vm4, %v1242_v17, %v1244_v1  ;;  %v1285_v17 = vmul.f32 %v1284_v22, %v3123_v48 }
 0x1fb   : > { %v1266_v11 = vrot.slane %v1260_v31, 2 }
 0x1fe   : > { %1224 = vrot.lane.b32.xlu1 %v1218_v16, %s2942_s24  ;;  %1222 = vrot.lane.b32.xlu0 %v1219_v57, %s2942_s24  ;;  %v1265_v16 = vrot.slane %v1259_v41, 2  ;;  %v1261_v57 = vmul.f32 %v1258_v46, %v3217_v53 }
 0x1ff   : > { %1246 = vrot.lane.b32.xlu2 %v1243_v21, %s2943_s28 }
 0x200   : > { %v3515_v10 = vpop.permute.xlu1 %759  ;;  %v3517_v12 = vpop.permute.xlu0 %757  ;;  %v1267_v21 = vsel %vm816_vm4, %v1265_v16, %v1266_v11  ;;  %v1268_v46 = vrot.slane %v1261_v57, 2  ;;  %v1310_v57 = vmul.f32 %v1308_v60, %v3183_v27 }
 0x201   : > { %4436 = vst [vmem:[#allocation32_spill] sm:$0xff] %v3515_v10  ;;  %v3520_v50 = vpop.permute.xlu2 %878  ;;  %v1286_v10 = vmul.f32 %v1284_v22, %v3150_v5 }
 0x202   : > { %4437 = vst [vmem:[#allocation33_spill] sm:$0xff] %v3517_v12  ;;  %v373_v12 = vstv %s3522_s23  ;;  %s3622_s23 = sld [smem:[#allocation4 + $0x15]] }
 0x203   : > { %v1292_v59 = vrot.slane %v1286_v10, 2  ;;  %v374_v16 = vmul.f32 %v3539_v3, %v373_v12 }
 0x205   : > { %v396_v10 = vadd.f32 %v3231_v61, %v374_v16 }
 0x206   : > { %1250 = vrot.lane.b32.xlu1 %v1244_v1, %s2943_s28  ;;  %1248 = vrot.lane.b32.xlu0 %v1245_v52, %s2943_s28  ;;  %v1291_v1 = vrot.slane %v1285_v17, 2  ;;  %v1269_v52 = vsel %vm816_vm4, %v1266_v11, %v1268_v46  ;;  %v1309_v17 = vmul.f32 %v1308_v60, %v3191_v32 }
 0x207   : > { %1270 = vrot.lane.b32.xlu2 %v1267_v21, %s2943_s28  ;;  %v1287_v21 = vmul.f32 %v1284_v22, %v3181_v26 }
 0x208   : > { %v3531_v45 = vpop.permute.xlu1 %780  ;;  %v3533_v31 = vpop.permute.xlu0 %778  ;;  %v1293_v48 = vsel %vm816_vm4, %v1291_v1, %v1292_v59 }
 0x209   : > { %4438 = vst [vmem:[#allocation34_spill] sm:$0xff] %v3531_v45  ;;  %v3536_v41 = vpop.permute.xlu2 %918  ;;  %v1294_v1 = vrot.slane %v1287_v21, 2  ;;  %v1316_v45 = vrot.slane %v1310_v57, 2  ;;  %v375_v21 = vmul.f32 %v373_v12, %v3150_v5 }
 0x20a   : > { %4439 = vst [vmem:[#allocation35_spill] sm:$0xff] %v3533_v31  ;;  %v1315_v31 = vrot.slane %v1309_v17, 2 }
 0x20b   : > { %v1295_v16 = vsel %vm816_vm4, %v1292_v59, %v1294_v1  ;;  %v809_v59 = vstv %s2636_s7  ;;  %s3731_s7 = sld [smem:[#allocation4 + $0x4e]] }
 0x20e   : > { %1274 = vrot.lane.b32.xlu1 %v1268_v46, %s2943_s28  ;;  %1272 = vrot.lane.b32.xlu0 %v1269_v52, %s2943_s28  ;;  %v424_v46 = vadd.f32 %v3277_v28, %v396_v10  ;;  %v1317_v28 = vsel %vm816_vm4, %v1315_v31, %v1316_v45  ;;  %v397_v31 = vadd.f32 %v3265_v19, %v375_v21 }
 0x20f   : > { %1296 = vrot.lane.b32.xlu2 %v1293_v48, %s2944_s20  ;;  %v1311_v48 = vmul.f32 %v1308_v60, %v3217_v53 }
 0x210   : > { %v3552_v11 = vpop.permute.xlu1 %799  ;;  %v3554_v22 = vpop.permute.xlu0 %797  ;;  %v452_v61 = vadd.f32 %v3275_v25, %v424_v46  ;;  %v378_v25 = vstv %s3549_s4  ;;  %s3701_s4 = sld [smem:[#allocation4 + $0x46]] }
 0x211   : > { %4440 = vst [vmem:[#allocation36_spill] sm:$0xff] %v3552_v11  ;;  %v3558_v52 = vpop.permute.xlu2 %942  ;;  %v1334_v11 = vstv %s2660_s15  ;;  %v380_v46 = vmul.f32 %v378_v25, %v3183_v27  ;;  %v379_v21 = vmul.f32 %v378_v25, %v3191_v32  ;;  %s3682_s15 = sld [smem:[#allocation4 + $0x1d]] }
 0x212   : > { %4441 = vst [vmem:[#allocation37_spill] sm:$0xff] %v3554_v22  ;;  %v3569_v10 = vmul.f32 %v1334_v11, %v3150_v5  ;;  %v1335_v17 = vmul.f32 %v3539_v3, %v1334_v11  ;;  %v1337_v47 = vmul.f32 %v1334_v11, %v3181_v26 }
 0x213   : > { %v410_v55 = vadd.f32 %v3279_v29, %v380_v46  ;;  %v409_v54 = vadd.f32 %v3329_v6, %v379_v21  ;;  %v1384_v21 = vstv %s3592_s19  ;;  %s3802_s19 = sld [smem:[#allocation4 + $0x50]] }
 0x214   : > { %v1342_v22 = vrot.slane %v3569_v10, 2 }
 0x215   : > { %v438_v10 = vadd.f32 %v3331_v7, %v410_v55  ;;  %v3617_v7 = vstv %s3573_s14  ;;  %s2669_s14 = sld [smem:[#allocation4 + $0x4f]] }
 0x216   : > { %1300 = vrot.lane.b32.xlu1 %v1294_v1, %s2944_s20  ;;  %1298 = vrot.lane.b32.xlu0 %v1295_v16, %s2944_s20  ;;  %v480_v1 = vadd.f32 %v3247_v8, %v452_v61  ;;  %v1318_v16 = vrot.slane %v1311_v48, 2  ;;  %v810_v8 = vmul.f32 %v3539_v3, %v809_v59  ;;  %v1341_v61 = vrot.slane %v1335_v17, 2 }
 0x217   : > { %1320 = vrot.lane.b32.xlu2 %v1317_v28, %s2944_s20  ;;  %v3589_v28 = vmul.f32 %v809_v59, %v3150_v5  ;;  %v1358_v48 = vstv %s3560_s8  ;;  %v425_v5 = vadd.f32 %v3263_v18, %v397_v31  ;;  %v466_v6 = vadd.f32 %v3345_v33, %v438_v10  ;;  %s2668_s8 = sld [smem:[#allocation4 + $0x1e]] }
 0x218   : > { %v3576_v57 = vpop.permute.xlu1 %876  ;;  %v3578_v60 = vpop.permute.xlu0 %858  ;;  %v508_v19 = vadd.f32 %v3301_v43, %v480_v1  ;;  %v1319_v40 = vsel %vm816_vm4, %v1316_v45, %v1318_v16  ;;  %v1343_v43 = vsel %vm816_vm4, %v1341_v61, %v1342_v22  ;;  %v3609_v11 = vmul.f32 %v1358_v48, %v3183_v27 }
 0x219   : > { %v3586_v12 = vpop.permute.xlu2 %982  ;;  %v818_v29 = vrot.slane %v3589_v28, 2  ;;  %v817_v55 = vrot.slane %v810_v8, 2  ;;  %v1359_v25 = vmul.f32 %v1358_v48, %v3191_v32  ;;  %v453_v17 = vadd.f32 %v3239_v2, %v425_v5 }
 0x21a   : > { %v536_v18 = vadd.f32 %v3299_v42, %v508_v19  ;;  %v437_v42 = vadd.f32 %v3291_v37, %v409_v54  ;;  %v826_v31 = vstv %s3584_s17  ;;  %v1344_v33 = vrot.slane %v1337_v47, 2  ;;  %s2670_s17 = sld [smem:[#allocation4 + $0x1f]] }
 0x21b   : > { %v819_v1 = vsel %vm816_vm4, %v817_v55, %v818_v29  ;;  %v1366_v19 = vrot.slane %v3609_v11, 2  ;;  %v481_v8 = vadd.f32 %v3289_v36, %v453_v17  ;;  %v494_v2 = vadd.f32 %v3303_v44, %v466_v6 }
 0x21c   : > { %v465_v61 = vadd.f32 %v3347_v34, %v437_v42  ;;  %v824_v37 = vadd.f32 %v819_v1, %v536_v18  ;;  %v828_v54 = vmul.f32 %v826_v31, %v3183_v27  ;;  %v812_v47 = vmul.f32 %v809_v59, %v3181_v26  ;;  %v3651_v27 = vld [vmem:[#allocation2 + $0x8] sm:$0xff] }
 0x21d   : > { %v1365_v5 = vrot.slane %v1359_v25, 2  ;;  %v1361_v10 = vmul.f32 %v1358_v48, %v3217_v53  ;;  %v522_v11 = vadd.f32 %v3364_v63, %v494_v2  ;;  %v1345_v34 = vsel %vm816_vm4, %v1342_v22, %v1344_v33 }
 0x21e   : > { %1324 = vrot.lane.b32.xlu1 %v1318_v16, %s2944_s20  ;;  %1322 = vrot.lane.b32.xlu0 %v1319_v40, %s2944_s20  ;;  %v829_v16 = vmul.f32 %v826_v31, %v3217_v53  ;;  %v862_v36 = vadd.f32 %v3506_v51, %v824_v37  ;;  %v827_v18 = vmul.f32 %v826_v31, %v3191_v32  ;;  %v3658_v63 = vstv %s3612_s22  ;;  %s3806_s22 = sld [smem:[#allocation4 + $0x20]] }
 0x21f   : > { %1346 = vrot.lane.b32.xlu2 %v1343_v43, %s2945_s5  ;;  %v493_v43 = vadd.f32 %v3362_v62, %v465_v61  ;;  %v1367_v26 = vsel %vm816_vm4, %v1365_v5, %v1366_v19  ;;  %v3654_v53 = vmul.f32 %v3651_v27, %v1384_v21  ;;  %v509_v62 = vadd.f32 %v3287_v35, %v481_v8 }
 0x220   : > { %v3619_v45 = vpop.permute.xlu1 %900  ;;  %v899_v40 = vpop.permute.xlu0 %898  ;;  %v836_v44 = vrot.slane %v829_v16, 2  ;;  %v550_v51 = vadd.f32 %v3378_v24, %v522_v11  ;;  %v554_v32 = vmul.f32 %v3539_v3, %v3617_v7  ;;  %v834_v59 = vrot.slane %v828_v54, 2  ;;  %v3696_v11 = vld [vmem:[#allocation3 + $0x8] sm:$0xff] }
 0x221   : > { %v3627_v46 = vpop.permute.xlu2 %1004  ;;  %v904_v22 = vadd.f32 %v899_v40, %v862_v36  ;;  %v1385_v55 = vmul.f32 %v3539_v3, %v1384_v21  ;;  %v3666_v25 = vstv %s3622_s23  ;;  %v521_v17 = vadd.f32 %v3317_v56, %v493_v43  ;;  %s3837_s23 = sld [smem:[#allocation4 + $0x51]] }
 0x222   : > { %v820_v35 = vrot.slane %v812_v47, 2  ;;  %v1368_v24 = vrot.slane %v1361_v10, 2  ;;  %v585_v40 = vadd.f32 %v3267_v20, %v554_v32  ;;  %v833_v1 = vrot.slane %v827_v18, 2 }
 0x223   : > { %v1392_v16 = vrot.slane %v3654_v53, 2  ;;  %v549_v8 = vadd.f32 %v3380_v30, %v521_v17  ;;  %v537_v2 = vadd.f32 %v3255_v13, %v509_v62  ;;  %v1391_v47 = vrot.slane %v1385_v55, 2  ;;  %v3689_v13 = vld [vmem:[#allocation2 + $0x10] sm:$0x3f] }
 0x224   : > { %v625_v37 = vadd.f32 %v3350_v39, %v585_v40  ;;  %v835_v54 = vsel %vm816_vm4, %v833_v1, %v834_v59  ;;  %v1408_v5 = vstv %s3641_s30  ;;  %v821_v30 = vsel %vm816_vm4, %v818_v29, %v820_v35  ;;  %s3879_s30 = sld [smem:[#allocation4 + $0x21]] }
 0x225   : > { %v1369_v10 = vsel %vm816_vm4, %v1366_v19, %v1368_v24  ;;  %v1393_v43 = vsel %vm816_vm4, %v1391_v47, %v1392_v16  ;;  %v840_v28 = vadd.f32 %v835_v54, %v549_v8  ;;  %v825_v29 = vadd.f32 %v821_v30, %v537_v2 }
 0x226   : > { %1350 = vrot.lane.b32.xlu1 %v1344_v33, %s2945_s5  ;;  %1348 = vrot.lane.b32.xlu0 %v1345_v34, %s2945_s5  ;;  %v837_v33 = vsel %vm816_vm4, %v834_v59, %v836_v44  ;;  %v665_v39 = vadd.f32 %v3383_v38, %v625_v37  ;;  %v3706_v38 = vmul.f32 %v3651_v27, %v3666_v25  ;;  %v3744_v1 = vstv %s3701_s4  ;;  %s2676_s4 = sld [smem:[#allocation4 + $0x22]] }
 0x227   : > { %1370 = vrot.lane.b32.xlu2 %v1367_v26, %s2945_s5  ;;  %v841_v61 = vadd.f32 %v837_v33, %v550_v51  ;;  %v1097_v53 = vmul.f32 %v3539_v3, %v3666_v25  ;;  %v882_v62 = vadd.f32 %v3576_v57, %v840_v28  ;;  %v863_v51 = vadd.f32 %v3578_v60, %v825_v29  ;;  %v4442_v28 = vld [vmem:[#allocation29_spill] sm:$0xff] }
 0x228   : > { %v941_v48 = vpop.permute.xlu1 %940  ;;  %v921_v6 = vpop.permute.xlu0 %920  ;;  %v705_v34 = vadd.f32 %v3416_v49, %v665_v39  ;;  %v1104_v17 = vrot.slane %v3706_v38, 2 }
 0x229   : > { %v946_v42 = vadd.f32 %v941_v48, %v904_v22  ;;  %v3669_v31 = vpop.permute.xlu2 %1044  ;;  %v883_v20 = vadd.f32 %v3520_v50, %v841_v61  ;;  %v3699_v50 = vmul.f32 %v3696_v11, %v1408_v5  ;;  %v905_v55 = vadd.f32 %v3619_v45, %v863_v51  ;;  %v3735_v45 = vld [vmem:[#allocation3 + $0x10] sm:$0x3f] }
 0x22a   : > { %v745_v49 = vadd.f32 %v3449_v15, %v705_v34  ;;  %v1103_v40 = vrot.slane %v1097_v53, 2  ;;  %v1411_v33 = vmul.f32 %v3735_v45, %v1408_v5 }
 0x22b   : > { %v3677_v56 = vadd.f32 %v3586_v12, %v946_v42  ;;  %v1387_v12 = vmul.f32 %v3689_v13, %v1384_v21  ;;  %v925_v19 = vadd.f32 %v921_v6, %v883_v20  ;;  %v3708_v21 = vld [vmem:[#allocation3] sm:$0xff]  ;;  %v1416_v6 = vrot.slane %v3699_v50, 2 }
 0x22c   : > { %v561_v36 = vmul.f32 %v3708_v21, %v3658_v63  ;;  %v1409_v26 = vmul.f32 %v3708_v21, %v1408_v5  ;;  %v785_v60 = vadd.f32 %v3478_v58, %v745_v49  ;;  %v1105_v8 = vsel %vm816_vm4, %v1103_v40, %v1104_v17 }
 0x22d   : > { %v1394_v59 = vrot.slane %v1387_v12, 2 }
 0x22e   : > { %1374 = vrot.lane.b32.xlu1 %v1368_v24, %s2945_s5  ;;  %1372 = vrot.lane.b32.xlu0 %v1369_v10, %s2945_s5  ;;  %v604_v48 = vadd.f32 %v3333_v9, %v561_v36  ;;  %v1415_v42 = vrot.slane %v1409_v26, 2  ;;  %v1468_v24 = vstv %s3682_s15  ;;  %v924_v9 = vadd.f32 %v3536_v41, %v882_v62  ;;  %s3884_s15 = sld [smem:[#allocation4 + $0x52]] }
 0x22f   : > { %1396 = vrot.lane.b32.xlu2 %v1393_v43, %s2946_s6  ;;  %v1395_v15 = vsel %vm816_vm4, %v1392_v16, %v1394_v59  ;;  %v1470_v58 = vmul.f32 %v3651_v27, %v1468_v24  ;;  %v947_v16 = vadd.f32 %v3558_v52, %v905_v55  ;;  %v1111_v54 = vadd.f32 %v1105_v8, %v785_v60 }
 0x230   : > { %v963_v44 = vpop.permute.xlu1 %962  ;;  %v961_v18 = vpop.permute.xlu0 %960  ;;  %v644_v57 = vadd.f32 %v3366_v0, %v604_v48  ;;  %v1417_v0 = vsel %vm816_vm4, %v1415_v42, %v1416_v6  ;;  %v1469_v47 = vmul.f32 %v3539_v3, %v1468_v24  ;;  %v1418_v52 = vrot.slane %v1411_v33, 2 }
 0x231   : > { %v967_v22 = vadd.f32 %v963_v44, %v925_v19  ;;  %v3718_v32 = vpop.permute.xlu2 %1068  ;;  %v966_v41 = vadd.f32 %v961_v18, %v924_v9  ;;  %v1115_v10 = vmul.f32 %v3708_v21, %v3744_v1  ;;  %v1476_v43 = vrot.slane %v1470_v58, 4 }
 0x232   : > { %v1475_v19 = vrot.slane %v1469_v47, 4  ;;  %v1488_v36 = vstv %s3731_s7  ;;  %v1419_v34 = vsel %vm816_vm4, %v1416_v6, %v1418_v52  ;;  %v1471_v26 = vmul.f32 %v3689_v13, %v1468_v24  ;;  %s2680_s7 = sld [smem:[#allocation4 + $0x24]] }
 0x233   : > { %v3726_v35 = vadd.f32 %v3627_v46, %v967_v22  ;;  %v684_v46 = vadd.f32 %v3399_v4, %v644_v57  ;;  %v3753_v4 = vmul.f32 %v3696_v11, %v3744_v1  ;;  %v1121_v44 = vrot.slane %v1115_v10, 2 }
 0x234   : > { %v1490_v18 = vmul.f32 %v3696_v11, %v1488_v36  ;;  %v1489_v62 = vmul.f32 %v3708_v21, %v1488_v36  ;;  %v1478_v57 = vrot.slane %v1471_v26, 4 }
 0x235   : > { %v724_v61 = vadd.f32 %v3432_v23, %v684_v46  ;;  %v1122_v50 = vrot.slane %v3753_v4, 2 }
 0x236   : > { %1400 = vrot.lane.b32.xlu1 %v1394_v59, %s2946_s6  ;;  %1398 = vrot.lane.b32.xlu0 %v1395_v15, %s2946_s6  ;;  %v1496_v55 = vrot.slane %v1490_v18, 4  ;;  %v1495_v9 = vrot.slane %v1489_v62, 4  ;;  %v1510_v15 = vstv %s2668_s8  ;;  %v1479_v46 = vsel %vm194_vm0, %v1476_v43, %v1478_v57  ;;  %v4445_v18 = vld [vmem:[#allocation22_spill] sm:$0xff]  ;;  %v4447_v57 = vld [vmem:[#allocation16_spill] sm:$0xff]  ;;  %s2677_s8 = sld [smem:[#allocation4 + $0x53]] }
 0x237   : > { %1420 = vrot.lane.b32.xlu2 %v1417_v0, %s2946_s6  ;;  %v764_v12 = vadd.f32 %v3464_v14, %v724_v61  ;;  %v1477_v14 = vsel %vm194_vm0, %v1475_v19, %v1476_v43  ;;  %v1123_v53 = vsel %vm816_vm4, %v1121_v44, %v1122_v50  ;;  %v1512_v40 = vmul.f32 %v3651_v27, %v1510_v15  ;;  %v4444_v43 = vld [vmem:[#allocation18_spill] sm:$0xff] }
 0x238   : > { %v1003_v2 = vpop.permute.xlu1 %1002  ;;  %v985_v37 = vpop.permute.xlu0 %984  ;;  %v1497_v33 = vsel %vm194_vm0, %v1495_v9, %v1496_v55  ;;  %v1513_v0 = vmul.f32 %v3689_v13, %v1510_v15  ;;  %v1552_v19 = vstv %s2670_s17  ;;  %v562_v62 = vmul.f32 %v3696_v11, %v3658_v63  ;;  %v4448_v9 = vld [vmem:[#allocation31_spill] sm:$0xff]  ;;  %s2682_s17 = sld [smem:[#allocation4 + $0x25]] }
 0x239   : > { %v1008_v5 = vadd.f32 %v1003_v2, %v966_v41  ;;  %v989_v20 = vadd.f32 %v985_v37, %v947_v16  ;;  %v1147_v30 = vpop.permute.xlu2 %1146  ;;  %v804_v29 = vadd.f32 %v4442_v28, %v764_v12  ;;  %v555_v41 = vmul.f32 %v3651_v27, %v3617_v7 }
 0x23a   : > { %v1155_v39 = vadd.f32 %v1147_v30, %v1111_v54  ;;  %v1511_v16 = vmul.f32 %v3539_v3, %v1510_v15  ;;  %v1518_v2 = vrot.slane %v1512_v40, 4  ;;  %v4443_v54 = vld [vmem:[#allocation14_spill] sm:$0xff] }
 0x23b   : > { %v3762_v23 = vadd.f32 %v3669_v31, %v1008_v5  ;;  %v1491_v31 = vmul.f32 %v3735_v45, %v1488_v36  ;;  %v1129_v59 = vadd.f32 %v1123_v53, %v804_v29  ;;  %v586_v47 = vadd.f32 %v4443_v54, %v555_v41  ;;  %v4450_v41 = vld [vmem:[#allocation35_spill] sm:$0xff]  ;;  %v4451_v54 = vld [vmem:[#allocation24_spill] sm:$0xff] }
 0x23c   : > { %v1517_v29 = vrot.slane %v1511_v16, 4  ;;  %v3817_v53 = vmul.f32 %v3689_v13, %v3666_v25 }
 0x23d   : > { %v1498_v42 = vrot.slane %v1491_v31, 4  ;;  %v626_v28 = vadd.f32 %v4444_v43, %v586_v47  ;;  %v1555_v31 = vmul.f32 %v3689_v13, %v1552_v19 }
 0x23e   : > { %1424 = vrot.lane.b32.xlu1 %v1418_v52, %s2946_s6  ;;  %1422 = vrot.lane.b32.xlu0 %v1419_v34, %s2946_s6  ;;  %v1520_v52 = vrot.slane %v1513_v0, 4  ;;  %v1554_v34 = vmul.f32 %v3651_v27, %v1552_v19 }
 0x23f   : > { %1480 = vrot.lane.b32.xlu2 %v1477_v14, %s2941_s18  ;;  %v1499_v58 = vsel %vm194_vm0, %v1496_v55, %v1498_v42  ;;  %v605_v42 = vadd.f32 %v4447_v57, %v562_v62  ;;  %v1562_v0 = vrot.slane %v1555_v31, 4 }
 0x240   : > { %v1027_v51 = vpop.permute.xlu1 %1026  ;;  %v1025_v22 = vpop.permute.xlu0 %1024  ;;  %v1521_v26 = vsel %vm194_vm0, %v1518_v2, %v1520_v52 }
 0x241   : > { %v1031_v48 = vadd.f32 %v1027_v51, %v989_v20  ;;  %v1030_v49 = vadd.f32 %v1025_v22, %v3677_v56  ;;  %v1171_v6 = vpop.permute.xlu2 %1170  ;;  %v1530_v56 = vstv %s2669_s14  ;;  %v4446_v51 = vld [vmem:[#allocation26_spill] sm:$0xff]  ;;  %s2681_s14 = sld [smem:[#allocation4 + $0x55]] }
 0x242   : > { %v1179_v60 = vadd.f32 %v1171_v6, %v1129_v59  ;;  %v1531_v37 = vmul.f32 %v3708_v21, %v1530_v56  ;;  %v1533_v44 = vmul.f32 %v3735_v45, %v1530_v56  ;;  %v1553_v59 = vmul.f32 %v3539_v3, %v1552_v19  ;;  %v4453_v19 = vld [vmem:[#allocation28_spill] sm:$0xff] }
 0x243   : > { %v3780_v24 = vadd.f32 %v3718_v32, %v1031_v48  ;;  %v1532_v32 = vmul.f32 %v3696_v11, %v1530_v56  ;;  %v1560_v6 = vrot.slane %v1554_v34, 4  ;;  %v1106_v56 = vrot.slane %v3817_v53, 2 }
 0x244   : > { %v1537_v36 = vrot.slane %v1531_v37, 4  ;;  %v1540_v55 = vrot.slane %v1533_v44, 4 }
 0x245   : > { %v1538_v12 = vrot.slane %v1532_v32, 4  ;;  %v1107_v43 = vsel %vm816_vm4, %v1104_v17, %v1106_v56  ;;  %v4454_v17 = vld [vmem:[#allocation17_spill] sm:$0xff] }
 0x246   : > { %1500 = vrot.lane.b32.xlu1 %v1497_v33, %s2941_s18  ;;  %1482 = vrot.lane.b32.xlu0 %v1479_v46, %s2941_s18 }
 0x247   : > { %1502 = vrot.lane.b32.xlu2 %v1499_v58, %s2941_s18  ;;  %v1539_v14 = vsel %vm194_vm0, %v1537_v36, %v1538_v12  ;;  %v4449_v58 = vld [vmem:[#allocation20_spill] sm:$0xff] }
 0x248   : > { %v1067_v8 = vpop.permute.xlu1 %1066  ;;  %v1047_v61 = vpop.permute.xlu0 %1046  ;;  %v645_v32 = vadd.f32 %v4449_v58, %v605_v42 }
 0x249   : > { %v3796_v5 = vadd.f32 %v1067_v8, %v1030_v49  ;;  %v1051_v20 = vadd.f32 %v1047_v61, %v3726_v35  ;;  %v1197_v30 = vpop.permute.xlu2 %1196  ;;  %v666_v35 = vadd.f32 %v4445_v18, %v626_v28  ;;  %v1559_v8 = vrot.slane %v1553_v59, 4 }
 0x24a   : > { %v3799_v10 = vadd.f32 %v1197_v30, %v1155_v39  ;;  %v1519_v39 = vsel %vm194_vm0, %v1517_v29, %v1518_v2  ;;  %v1572_v61 = vstv %s3802_s19  ;;  %v556_v2 = vmul.f32 %v3689_v13, %v3617_v7  ;;  %s2683_s19 = sld [smem:[#allocation4 + $0x56]] }
 0x24b   : > { %v706_v22 = vadd.f32 %v4446_v51, %v666_v35  ;;  %v1575_v37 = vmul.f32 %v3735_v45, %v1572_v61  ;;  %v685_v47 = vadd.f32 %v4451_v54, %v645_v32  ;;  %v1541_v30 = vsel %vm194_vm0, %v1538_v12, %v1540_v55  ;;  %v4452_v12 = vld [vmem:[#allocation13_spill] sm:$0xff] }
 0x24c   : > { %v1563_v7 = vsel %vm194_vm0, %v1560_v6, %v1562_v0  ;;  %v3860_v28 = vmul.f32 %v3735_v45, %v3744_v1  ;;  %v587_v29 = vadd.f32 %v4452_v12, %v556_v2  ;;  %v1573_v44 = vmul.f32 %v3708_v21, %v1572_v61  ;;  %v4457_v55 = vld [vmem:[#allocation37_spill] sm:$0xff]  ;;  %v4459_v2 = vld [vmem:[#allocation15_spill] sm:$0xff] }
 0x24d   : > { %v746_v25 = vadd.f32 %v4448_v9, %v706_v22  ;;  %v725_v36 = vadd.f32 %v4453_v19, %v685_v47  ;;  %v1582_v51 = vrot.slane %v1575_v37, 4  ;;  %v1614_v9 = vstv %s3837_s23  ;;  %v4460_v37 = vld [vmem:[#allocation30_spill] sm:$0xff]  ;;  %s2684_s23 = sld [smem:[#allocation4 + $0x26]] }
 0x24e   : > { %1524 = vrot.lane.b32.xlu1 %v1521_v26, %s2942_s24  ;;  %1522 = vrot.lane.b32.xlu0 %v1519_v39, %s2942_s24  ;;  %v627_v39 = vadd.f32 %v4454_v17, %v587_v29  ;;  %v1579_v42 = vrot.slane %v1573_v44, 4  ;;  %v1616_v0 = vmul.f32 %v3696_v11, %v1614_v9  ;;  %v1615_v47 = vmul.f32 %v3708_v21, %v1614_v9  ;;  %v4463_v44 = vld [vmem:[#allocation23_spill] sm:$0xff] }
 0x24f   : > { %1542 = vrot.lane.b32.xlu2 %v1539_v14, %s2942_s24  ;;  %v786_v16 = vadd.f32 %v4450_v41, %v746_v25  ;;  %v4455_v14 = vld [vmem:[#allocation33_spill] sm:$0xff]  ;;  %v563_v25 = vmul.f32 %v3735_v45, %v3658_v63 }
 0x250   : > { %v1089_v48 = vpop.permute.xlu1 %1088  ;;  %v1087_v49 = vpop.permute.xlu0 %1086  ;;  %v765_v1 = vadd.f32 %v4455_v14, %v725_v36  ;;  %v1656_v14 = vstv %s3884_s15  ;;  %s2685_s15 = sld [smem:[#allocation4 + $0x57]] }
 0x251   : > { %v3826_v15 = vadd.f32 %v1089_v48, %v1051_v20  ;;  %v3829_v40 = vadd.f32 %v1087_v49, %v3762_v23  ;;  %v1221_v33 = vpop.permute.xlu2 %1220  ;;  %v1574_v23 = vmul.f32 %v3696_v11, %v1572_v61  ;;  %v1561_v20 = vsel %vm194_vm0, %v1559_v8, %v1560_v6  ;;  %v4456_v49 = vld [vmem:[#allocation21_spill] sm:$0xff] }
 0x252   : > { %v3831_v46 = vadd.f32 %v1221_v33, %v1179_v60  ;;  %v1594_v60 = vstv %s3806_s22  ;;  %v1112_v34 = vadd.f32 %v1107_v43, %v786_v16  ;;  %v1124_v48 = vrot.slane %v3860_v28, 2  ;;  %v4462_v43 = vld [vmem:[#allocation34_spill] sm:$0xff]  ;;  %s2664_s22 = sld [smem:[#allocation4 + $0x1c]] }
 0x253   : > { %v3848_v52 = vmul.f32 %v3651_v27, %v1594_v60  ;;  %v1580_v26 = vrot.slane %v1574_v23, 4  ;;  %v1595_v38 = vmul.f32 %v3539_v3, %v1594_v60  ;;  %v667_v6 = vadd.f32 %v4456_v49, %v627_v39 }
 0x254   : > { %v805_v57 = vadd.f32 %v4457_v55, %v765_v1  ;;  %v1597_v16 = vmul.f32 %v3689_v13, %v1594_v60  ;;  %v1125_v63 = vsel %vm816_vm4, %v1122_v50, %v1124_v48  ;;  %v1617_v61 = vmul.f32 %v3735_v45, %v1614_v9  ;;  %v4464_v1 = vld [vmem:[#allocation27_spill] sm:$0xff] }
 0x255   : > { %v1602_v59 = vrot.slane %v3848_v52, 4  ;;  %v1601_v33 = vrot.slane %v1595_v38, 4  ;;  %v1583_v32 = vsel %vm194_vm0, %v1580_v26, %v1582_v51  ;;  %v1581_v41 = vsel %vm194_vm0, %v1579_v42, %v1580_v26 }
 0x256   : > { %1564 = vrot.lane.b32.xlu1 %v1561_v20, %s2943_s28  ;;  %1544 = vrot.lane.b32.xlu0 %v1541_v30, %s2942_s24  ;;  %v606_v23 = vadd.f32 %v4459_v2, %v563_v25  ;;  %v1130_v60 = vadd.f32 %v1125_v63, %v805_v57  ;;  %v1622_v52 = vrot.slane %v1616_v0, 4  ;;  %v1604_v19 = vrot.slane %v1597_v16, 4  ;;  %v4465_v57 = vld [vmem:[#allocation32_spill] sm:$0xff] }
 0x257   : > { %1566 = vrot.lane.b32.xlu2 %v1563_v7, %s2943_s28  ;;  %v1603_v8 = vsel %vm194_vm0, %v1601_v33, %v1602_v59  ;;  %v4461_v7 = vld [vmem:[#allocation19_spill] sm:$0xff]  ;;  %v1621_v26 = vrot.slane %v1615_v47, 4  ;;  %v1636_v38 = vstv %s3879_s30  ;;  %v1658_v55 = vmul.f32 %v3696_v11, %v1656_v14  ;;  %v4466_v0 = vld [vmem:[#allocation36_spill] sm:$0xff]  ;;  %s2665_s30 = sld [smem:[#allocation4 + $0x4d]] }
 0x258   : > { %v1151_v18 = vpop.permute.xlu1 %1150  ;;  %v1149_v35 = vpop.permute.xlu0 %1148  ;;  %v646_v4 = vadd.f32 %v4461_v7, %v606_v23  ;;  %v1638_v17 = vmul.f32 %v3651_v27, %v1636_v38  ;;  %v1639_v39 = vmul.f32 %v3689_v13, %v1636_v38  ;;  %v1637_v53 = vmul.f32 %v3539_v3, %v1636_v38 }
 0x259   : > { %v3869_v31 = vadd.f32 %v1149_v35, %v1112_v34  ;;  %v1247_v62 = vpop.permute.xlu2 %1246  ;;  %v1624_v34 = vrot.slane %v1617_v61, 4  ;;  %v1623_v49 = vsel %vm194_vm0, %v1621_v26, %v1622_v52  ;;  %v1664_v63 = vrot.slane %v1658_v55, 4 }
 0x25a   : > { %v3872_v22 = vadd.f32 %v1247_v62, %v3799_v10  ;;  %v4458_v10 = vld [vmem:[#allocation25_spill] sm:$0xff]  ;;  %v686_v35 = vadd.f32 %v4463_v44, %v646_v4  ;;  %v1644_v33 = vrot.slane %v1638_v17, 4  ;;  %v1646_v16 = vrot.slane %v1639_v39, 4 }
 0x25b   : > { %v707_v58 = vadd.f32 %v4458_v10, %v667_v6  ;;  %v1625_v6 = vsel %vm194_vm0, %v1622_v52, %v1624_v34  ;;  %v1678_v61 = vstv %s2676_s4  ;;  %v1758_v26 = vstv %s2680_s7  ;;  %s2686_s4 = sld [smem:[#allocation4 + $0x27]] }
 0x25c   : > { %v726_v62 = vadd.f32 %v4464_v1, %v686_v35  ;;  %v1680_v23 = vmul.f32 %v3651_v27, %v1678_v61  ;;  %v1681_v47 = vmul.f32 %v3689_v13, %v1678_v61  ;;  %v1679_v28 = vmul.f32 %v3539_v3, %v1678_v61  ;;  %s2687_s7 = sld [smem:[#allocation4 + $0x58]] }
 0x25d   : > { %v747_v54 = vadd.f32 %v4460_v37, %v707_v58  ;;  %v1698_v35 = vstv %s2677_s8  ;;  %s2688_s8 = sld [smem:[#allocation4 + $0x28]]  ;;  %vm2474_vm4 = vcmask 654336  }
 0x25e   : > { %1586 = vrot.lane.b32.xlu1 %v1583_v32, %s2943_s28  ;;  %1584 = vrot.lane.b32.xlu0 %v1581_v41, %s2943_s28  ;;  %v766_v42 = vadd.f32 %v4465_v57, %v726_v62  ;;  %v1688_v34 = vrot.slane %v1681_v47, 4  ;;  %v1685_v44 = vrot.slane %v1679_v28, 4  ;;  %v1700_v17 = vmul.f32 %v3696_v11, %v1698_v35 }
 0x25f   : > { %1606 = vrot.lane.b32.xlu2 %v1603_v8, %s2944_s20  ;;  %v787_v50 = vadd.f32 %v4462_v43, %v747_v54  ;;  %v1647_v54 = vsel %vm194_vm0, %v1644_v33, %v1646_v16  ;;  %v1701_v39 = vmul.f32 %v3735_v45, %v1698_v35 }
 0x260   : > { %v1175_v20 = vpop.permute.xlu1 %1174  ;;  %v1173_v30 = vpop.permute.xlu0 %1172  ;;  %v806_v10 = vadd.f32 %v4466_v0, %v766_v42  ;;  %v1706_v55 = vrot.slane %v1700_v17, 4  ;;  %v1782_v0 = vstv %s2681_s14  ;;  %s2689_s14 = sld [smem:[#allocation4 + $0x59]] }
 0x261   : > { %v1180_v12 = vadd.f32 %v1173_v30, %v1130_v60  ;;  %v1271_v29 = vpop.permute.xlu2 %1270  ;;  %v1113_v51 = vadd.f32 %v1106_v56, %v787_v50  ;;  %v1686_v50 = vrot.slane %v1680_v23, 4  ;;  %v1708_v57 = vrot.slane %v1701_v39, 4 }
 0x262   : > { %v1279_v36 = vadd.f32 %v1271_v29, %v3831_v46  ;;  %v1605_v46 = vsel %vm194_vm0, %v1602_v59, %v1604_v19  ;;  %v1657_v59 = vmul.f32 %v3708_v21, %v1656_v14  ;;  %v1131_v37 = vadd.f32 %v1124_v48, %v806_v10 }
 0x263   : > { %v1157_v9 = vadd.f32 %v1151_v18, %v1113_v51  ;;  %v1643_v18 = vrot.slane %v1637_v53, 4  ;;  %v1687_v38 = vsel %vm194_vm0, %v1685_v44, %v1686_v50  ;;  %v1759_v51 = vmul.f32 %v3539_v3, %v1758_v26 }
 0x264   : > { %v1663_v2 = vrot.slane %v1657_v59, 4  ;;  %v1181_v30 = vadd.f32 %v1175_v20, %v1131_v37  ;;  %v1761_v59 = vmul.f32 %v3689_v13, %v1758_v26  ;;  %v1783_v16 = vmul.f32 %v3708_v21, %v1782_v0 }
 0x265   : > { %v1645_v60 = vsel %vm194_vm0, %v1643_v18, %v1644_v33 }
 0x266   : > { %1626 = vrot.lane.b32.xlu1 %v1623_v49, %s2944_s20  ;;  %1608 = vrot.lane.b32.xlu0 %v1605_v46, %s2944_s20  ;;  %v1768_v61 = vrot.slane %v1761_v59, 4  ;;  %v1789_v37 = vrot.slane %v1783_v16, 4 }
 0x267   : > { %1628 = vrot.lane.b32.xlu2 %v1625_v6, %s2944_s20 }
 0x268   : > { %v1201_v56 = vpop.permute.xlu1 %1200  ;;  %v1199_v25 = vpop.permute.xlu0 %1198 }
 0x269   : > { %v1207_v58 = vadd.f32 %v1201_v56, %v1157_v9  ;;  %v1206_v32 = vadd.f32 %v1199_v25, %v3869_v31  ;;  %v1297_v41 = vpop.permute.xlu2 %1296  ;;  %v1659_v31 = vmul.f32 %v3735_v45, %v1656_v14  ;;  %v1699_v14 = vmul.f32 %v3708_v21, %v1698_v35 }
 0x26a   : > { %v1305_v8 = vadd.f32 %v1297_v41, %v3872_v22  ;;  %v1665_v22 = vsel %vm194_vm0, %v1663_v2, %v1664_v63  ;;  %v1765_v56 = vrot.slane %v1759_v51, 4  ;;  %v1709_v25 = vsel %vm194_vm0, %v1706_v55, %v1708_v57 }
 0x26b   : > { %v1666_v29 = vrot.slane %v1659_v31, 4  ;;  %v1705_v53 = vrot.slane %v1699_v14, 4  ;;  %v1808_v31 = vstv %s2682_s17  ;;  %v1832_v35 = vstv %s2683_s19  ;;  %s2694_s17 = sld [smem:[#allocation4 + $0x2b]] }
 0x26c   : > { %v1810_v47 = vmul.f32 %v3651_v27, %v1808_v31  ;;  %v1811_v44 = vmul.f32 %v3689_v13, %v1808_v31  ;;  %s2695_s19 = sld [smem:[#allocation4 + $0x5c]] }
 0x26d   : > { %v1667_v20 = vsel %vm194_vm0, %v1664_v63, %v1666_v29  ;;  %v1707_v33 = vsel %vm194_vm0, %v1705_v53, %v1706_v55  ;;  %v1835_v53 = vmul.f32 %v3735_v45, %v1832_v35 }
 0x26e   : > { %1650 = vrot.lane.b32.xlu1 %v1647_v54, %s2945_s5  ;;  %1648 = vrot.lane.b32.xlu0 %v1645_v60, %s2945_s5  ;;  %v1785_v60 = vmul.f32 %v3735_v45, %v1782_v0  ;;  %v1816_v29 = vrot.slane %v1810_v47, 4  ;;  %v1818_v51 = vrot.slane %v1811_v44, 4  ;;  %v1882_v47 = vstv %s2685_s15  ;;  %s4112_s15 = sld [smem:[#allocation4 + $0x2d]] }
 0x26f   : > { %1668 = vrot.lane.b32.xlu2 %v1665_v22, %s2945_s5 }
 0x270   : > { %v1225_v48 = vpop.permute.xlu1 %1224  ;;  %v1223_v52 = vpop.permute.xlu0 %1222 }
 0x271   : > { %v1231_v7 = vadd.f32 %v1225_v48, %v1181_v30  ;;  %v1230_v4 = vadd.f32 %v1223_v52, %v1180_v12  ;;  %v1321_v43 = vpop.permute.xlu2 %1320  ;;  %v1689_v12 = vsel %vm194_vm0, %v1686_v50, %v1688_v34  ;;  %v1809_v48 = vmul.f32 %v3539_v3, %v1808_v31 }
 0x272   : > { %v1329_v19 = vadd.f32 %v1321_v43, %v1279_v36  ;;  %v1760_v36 = vmul.f32 %v3651_v27, %v1758_v26  ;;  %v1792_v43 = vrot.slane %v1785_v60, 4 }
 0x274   : > { %v1766_v9 = vrot.slane %v1760_v36, 4  ;;  %v1833_v36 = vmul.f32 %v3708_v21, %v1832_v35 }
 0x276   : > { %1690 = vrot.lane.b32.xlu1 %v1687_v38, %s2946_s6  ;;  %1670 = vrot.lane.b32.xlu0 %v1667_v20, %s2945_s5  ;;  %v1767_v10 = vsel %vm194_vm0, %v1765_v56, %v1766_v9  ;;  %v1769_v54 = vsel %vm194_vm0, %v1766_v9, %v1768_v61  ;;  %v1834_v38 = vmul.f32 %v3696_v11, %v1832_v35  ;;  %v3975_v20 = vstv %s2664_s22  ;;  %s2696_s22 = sld [smem:[#allocation4 + $0x2c]] }
 0x277   : > { %1692 = vrot.lane.b32.xlu2 %v1689_v12, %s2946_s6  ;;  %v3980_v17 = vmul.f32 %v3651_v27, %v3975_v20  ;;  %v1839_v57 = vrot.slane %v1833_v36, 4  ;;  %v1858_v56 = vstv %s2684_s23  ;;  %v1908_v36 = vstv %s2686_s4  ;;  %s2697_s23 = sld [smem:[#allocation4 + $0x5d]] }
 0x278   : > { %v1251_v1 = vpop.permute.xlu1 %1250  ;;  %v1249_v62 = vpop.permute.xlu0 %1248  ;;  %s4119_s4 = sld [smem:[#allocation4 + $0x54]] }
 0x279   : > { %v1257_v49 = vadd.f32 %v1251_v1, %v1207_v58  ;;  %v1256_v46 = vadd.f32 %v1249_v62, %v1206_v32  ;;  %v1347_v6 = vpop.permute.xlu2 %1346  ;;  %v1784_v58 = vmul.f32 %v3696_v11, %v1782_v0  ;;  %v1442_v55 = vrot.slane %v3980_v17, 4 }
 0x27a   : > { %v1355_v42 = vadd.f32 %v1347_v6, %v1305_v8  ;;  %v1840_v6 = vrot.slane %v1834_v38, 4 }
 0x27b   : > { %v1790_v23 = vrot.slane %v1784_v58, 4 }
 0x27d   : > { %v1791_v22 = vsel %vm194_vm0, %v1789_v37, %v1790_v23  ;;  %v1793_v34 = vsel %vm194_vm0, %v1790_v23, %v1792_v43 }
 0x27e   : > { %1712 = vrot.lane.b32.xlu1 %v1709_v25, %s2946_s6  ;;  %1710 = vrot.lane.b32.xlu0 %v1707_v33, %s2946_s6  ;;  %v1841_v25 = vsel %vm194_vm0, %v1839_v57, %v1840_v6  ;;  %v3994_v33 = vstv %s2665_s30  ;;  %s2678_s30 = sld [smem:[#allocation4 + $0x23]] }
 0x27f   : > { %1770 = vrot.lane.b32.xlu2 %v1767_v10, %s2941_s18  ;;  %v1453_v0 = vmul.f32 %v3735_v45, %v3994_v33 }
 0x280   : > { %v1275_v32 = vpop.permute.xlu1 %1274  ;;  %v1273_v41 = vpop.permute.xlu0 %1272 }
 0x281   : > { %v1281_v8 = vadd.f32 %v1275_v32, %v1231_v7  ;;  %v1280_v63 = vadd.f32 %v1273_v41, %v1230_v4  ;;  %v1371_v18 = vpop.permute.xlu2 %1370  ;;  %v4003_v41 = vld [vmem:[#allocation2] sm:$0xff] }
 0x282   : > { %v1379_v2 = vadd.f32 %v1371_v18, %v1329_v19  ;;  %v1815_v19 = vrot.slane %v1809_v48, 4  ;;  %v1859_v16 = vmul.f32 %v4003_v41, %v1858_v56 }
 0x284   : > { %v1817_v26 = vsel %vm194_vm0, %v1815_v19, %v1816_v29  ;;  %v1865_v60 = vrot.slane %v1859_v16, 4 }
 0x286   : > { %1774 = vrot.lane.b32.xlu1 %v1768_v61, %s2941_s18  ;;  %1772 = vrot.lane.b32.xlu0 %v1769_v54, %s2941_s18  ;;  %v1842_v61 = vrot.slane %v1835_v53, 4  ;;  %v1460_v54 = vrot.slane %v1453_v0, 4 }
 0x287   : > { %1794 = vrot.lane.b32.xlu2 %v1791_v22, %s2941_s18  ;;  %v1861_v22 = vmul.f32 %v3689_v13, %v1858_v56 }
 0x288   : > { %v1301_v30 = vpop.permute.xlu1 %1300  ;;  %v1299_v28 = vpop.permute.xlu0 %1298  ;;  %v1843_v31 = vsel %vm194_vm0, %v1840_v6, %v1842_v61 }
 0x289   : > { %v1307_v52 = vadd.f32 %v1301_v30, %v1257_v49  ;;  %v1306_v7 = vadd.f32 %v1299_v28, %v1256_v46  ;;  %v1397_v4 = vpop.permute.xlu2 %1396  ;;  %v1435_v49 = vmul.f32 %v3539_v3, %v3975_v20  ;;  %v1860_v3 = vmul.f32 %v3651_v27, %v1858_v56 }
 0x28a   : > { %v3967_v50 = vadd.f32 %v1397_v4, %v1355_v42  ;;  %v1819_v42 = vsel %vm194_vm0, %v1816_v29, %v1818_v51  ;;  %v1884_v28 = vmul.f32 %v3696_v11, %v1882_v47  ;;  %v1868_v44 = vrot.slane %v1861_v22, 4 }
 0x28b   : > { %v1441_v9 = vrot.slane %v1435_v49, 4  ;;  %v1866_v37 = vrot.slane %v1860_v3, 4  ;;  %v1932_v3 = vstv %s2687_s7  ;;  %s2699_s7 = sld [smem:[#allocation4 + $0x5e]] }
 0x28c   : > { %v1934_v0 = vmul.f32 %v3696_v11, %v1932_v3  ;;  %v1933_v16 = vmul.f32 %v3708_v21, %v1932_v3 }
 0x28d   : > { %v1443_v59 = vsel %vm194_vm0, %v1441_v9, %v1442_v55  ;;  %v1867_v30 = vsel %vm194_vm0, %v1865_v60, %v1866_v37 }
 0x28e   : > { %1798 = vrot.lane.b32.xlu1 %v1792_v43, %s2941_s18  ;;  %1796 = vrot.lane.b32.xlu0 %v1793_v34, %s2941_s18  ;;  %v1448_v32 = vadd.f32 %v1443_v59, %v3796_v5  ;;  %v1883_v43 = vmul.f32 %v3708_v21, %v1882_v47 }
 0x28f   : > { %1820 = vrot.lane.b32.xlu2 %v1817_v26, %s2942_s24  ;;  %v1890_v26 = vrot.slane %v1884_v28, 4 }
 0x290   : > { %v1325_v39 = vpop.permute.xlu1 %1324  ;;  %v1323_v12 = vpop.permute.xlu0 %1322  ;;  %v1889_v38 = vrot.slane %v1883_v43, 4 }
 0x291   : > { %v1331_v14 = vadd.f32 %v1325_v39, %v1281_v8  ;;  %v1330_v1 = vadd.f32 %v1323_v12, %v1280_v63  ;;  %v1421_v62 = vpop.permute.xlu2 %1420  ;;  %v1869_v39 = vsel %vm194_vm0, %v1866_v37, %v1868_v44  ;;  %v1885_v12 = vmul.f32 %v3735_v45, %v1882_v47 }
 0x292   : > { %v3985_v46 = vadd.f32 %v1421_v62, %v1379_v2  ;;  %v4008_v2 = vmul.f32 %v3696_v11, %v3994_v33 }
 0x294   : > { %v1458_v5 = vrot.slane %v4008_v2, 4 }
 0x296   : > { %1824 = vrot.lane.b32.xlu1 %v1818_v51, %s2942_s24  ;;  %1822 = vrot.lane.b32.xlu0 %v1819_v42, %s2942_s24  ;;  %v1461_v48 = vsel %vm194_vm0, %v1458_v5, %v1460_v54  ;;  %v1909_v51 = vmul.f32 %v4003_v41, %v1908_v36  ;;  %v1892_v42 = vrot.slane %v1885_v12, 4  ;;  %v1940_v54 = vrot.slane %v1934_v0, 4 }
 0x297   : > { %1844 = vrot.lane.b32.xlu2 %v1841_v25, %s2942_s24  ;;  %v1465_v4 = vadd.f32 %v1461_v48, %v3826_v15  ;;  %v1891_v15 = vsel %vm194_vm0, %v1889_v38, %v1890_v26  ;;  %v1911_v25 = vmul.f32 %v3689_v13, %v1908_v36  ;;  %v4075_v38 = vstv %s2689_s14  ;;  %s2691_s14 = sld [smem:[#allocation4 + $0x5a]] }
 0x298   : > { %v1351_v10 = vpop.permute.xlu1 %1350  ;;  %v1349_v58 = vpop.permute.xlu0 %1348  ;;  %v1915_v53 = vrot.slane %v1909_v51, 4  ;;  %v1893_v56 = vsel %vm194_vm0, %v1890_v26, %v1892_v42 }
 0x299   : > { %v1357_v8 = vadd.f32 %v1351_v10, %v1307_v52  ;;  %v1356_v63 = vadd.f32 %v1349_v58, %v1306_v7  ;;  %v1481_v18 = vpop.permute.xlu2 %1480  ;;  %v1437_v10 = vmul.f32 %v3689_v13, %v3975_v20  ;;  %v1918_v37 = vrot.slane %v1911_v25, 4 }
 0x29a   : > { %v4010_v23 = vadd.f32 %v1481_v18, %v1448_v32  ;;  %v1958_v20 = vstv %s2688_s8  ;;  %s2701_s8 = sld [smem:[#allocation4 + $0x5f]] }
 0x29b   : > { %v1444_v60 = vrot.slane %v1437_v10, 4  ;;  %v1960_v28 = vmul.f32 %v3651_v27, %v1958_v20 }
 0x29d   : > { %v1966_v26 = vrot.slane %v1960_v28, 4  ;;  %v4116_v28 = vld [vmem:[#allocation2 + $0x10] sm:$0x3f] }
 0x29e   : > { %1848 = vrot.lane.b32.xlu1 %v1842_v61, %s2942_s24  ;;  %1846 = vrot.lane.b32.xlu0 %v1843_v31, %s2942_s24  ;;  %v1939_v31 = vrot.slane %v1933_v16, 4 }
 0x29f   : > { %1870 = vrot.lane.b32.xlu2 %v1867_v30, %s2943_s28  ;;  %v1935_v30 = vmul.f32 %v3735_v45, %v1932_v3 }
 0x2a0   : > { %v1375_v52 = vpop.permute.xlu1 %1374  ;;  %v1373_v7 = vpop.permute.xlu0 %1372 }
 0x2a1   : > { %v1381_v29 = vadd.f32 %v1375_v52, %v1331_v14  ;;  %v1380_v19 = vadd.f32 %v1373_v7, %v1330_v1  ;;  %v1503_v34 = vpop.permute.xlu2 %1502  ;;  %v1910_v14 = vmul.f32 %v3651_v27, %v1908_v36  ;;  %v1445_v52 = vsel %vm194_vm0, %v1442_v55, %v1444_v60 }
 0x2a2   : > { %v4025_v35 = vadd.f32 %v1503_v34, %v1465_v4  ;;  %v1449_v27 = vadd.f32 %v1445_v52, %v3780_v24  ;;  %v1942_v2 = vrot.slane %v1935_v30, 4 }
 0x2a3   : > { %v1916_v9 = vrot.slane %v1910_v14, 4 }
 0x2a4   : > { %v1943_v55 = vsel %vm194_vm0, %v1940_v54, %v1942_v2 }
 0x2a5   : > { %v1917_v59 = vsel %vm194_vm0, %v1915_v53, %v1916_v9  ;;  %v1919_v47 = vsel %vm194_vm0, %v1916_v9, %v1918_v37  ;;  %v2113_v53 = vstv %s2695_s19  ;;  %s2692_s19 = sld [smem:[#allocation4 + $0x2a]] }
 0x2a6   : > { %1874 = vrot.lane.b32.xlu1 %v1868_v44, %s2943_s28  ;;  %1872 = vrot.lane.b32.xlu0 %v1869_v39, %s2943_s28  ;;  %v4082_v39 = vmul.f32 %v3696_v11, %v4075_v38  ;;  %v2116_v3 = vmul.f32 %v3735_v45, %v2113_v53  ;;  %v2115_v10 = vmul.f32 %v3696_v11, %v2113_v53 }
 0x2a7   : > { %1894 = vrot.lane.b32.xlu2 %v1891_v15, %s2943_s28  ;;  %v1983_v15 = vmul.f32 %v3708_v21, %v4075_v38 }
 0x2a8   : > { %v1401_v1 = vpop.permute.xlu1 %1400  ;;  %v1399_v62 = vpop.permute.xlu0 %1398 }
 0x2a9   : > { %v4035_v49 = vadd.f32 %v1401_v1, %v1357_v8  ;;  %v4037_v6 = vadd.f32 %v1399_v62, %v1356_v63  ;;  %v1543_v57 = vpop.permute.xlu2 %1542  ;;  %v1451_v8 = vmul.f32 %v3708_v21, %v3994_v33  ;;  %v1941_v33 = vsel %vm194_vm0, %v1939_v31, %v1940_v54 }
 0x2aa   : > { %v1989_v9 = vrot.slane %v1983_v15, 4  ;;  %v2121_v31 = vrot.slane %v2115_v10, 6 }
 0x2ab   : > { %v1457_v22 = vrot.slane %v1451_v8, 4 }
 0x2ad   : > { %v1459_v48 = vsel %vm194_vm0, %v1457_v22, %v1458_v5 }
 0x2ae   : > { %1898 = vrot.lane.b32.xlu1 %v1892_v42, %s2943_s28  ;;  %1896 = vrot.lane.b32.xlu0 %v1893_v56, %s2943_s28  ;;  %v1464_v7 = vadd.f32 %v1459_v48, %v3829_v40  ;;  %v1961_v40 = vmul.f32 %v3689_v13, %v1958_v20  ;;  %v2093_v56 = vstv %s2694_s17  ;;  %s2703_s17 = sld [smem:[#allocation4 + $0x60]] }
 0x2af   : > { %1920 = vrot.lane.b32.xlu2 %v1917_v59, %s2944_s20  ;;  %v2096_v21 = vmul.f32 %v3689_v13, %v2093_v56  ;;  %v4101_v59 = vld [vmem:[#allocation2 + $0x8] sm:$0xff] }
 0x2b0   : > { %v1425_v58 = vpop.permute.xlu1 %1424  ;;  %v1423_v32 = vpop.permute.xlu0 %1422  ;;  %v1968_v51 = vrot.slane %v1961_v40, 4  ;;  %v2095_v0 = vmul.f32 %v4101_v59, %v2093_v56 }
 0x2b1   : > { %v4051_v63 = vadd.f32 %v1425_v58, %v1381_v29  ;;  %v4053_v18 = vadd.f32 %v1423_v32, %v1380_v19  ;;  %v1567_v61 = vpop.permute.xlu2 %1566  ;;  %v1959_v29 = vmul.f32 %v4003_v41, %v1958_v20  ;;  %v2094_v32 = vmul.f32 %v4003_v41, %v2093_v56 }
 0x2b2   : > { %v1969_v25 = vsel %vm194_vm0, %v1966_v26, %v1968_v51  ;;  %v2103_v54 = vrot.slane %v2096_v21, 6  ;;  %v2101_v60 = vrot.slane %v2095_v0, 6  ;;  %v4152_v56 = vstv %s4119_s4  ;;  %s2951_s4 = smov 64  }
 0x2b3   : > { %v1965_v17 = vrot.slane %v1959_v29, 4  ;;  %v2100_v20 = vrot.slane %v2094_v32, 6 }
 0x2b4   : > { %v2104_v30 = vsel %vm2065_vm5, %v2101_v60, %v2103_v54 }
 0x2b5   : > { %v1967_v24 = vsel %vm194_vm0, %v1965_v17, %v1966_v26  ;;  %v2102_v48 = vsel %vm2065_vm5, %v2100_v20, %v2101_v60 }
 0x2b6   : > { %1924 = vrot.lane.b32.xlu1 %v1918_v37, %s2944_s20  ;;  %1922 = vrot.lane.b32.xlu0 %v1919_v47, %s2944_s20  ;;  %v2123_v37 = vrot.slane %v2116_v3, 6  ;;  %v2135_v47 = vstv %s2696_s22  ;;  %s2704_s22 = sld [smem:[#allocation4 + $0x30]] }
 0x2b7   : > { %1944 = vrot.lane.b32.xlu2 %v1941_v33, %s2944_s20  ;;  %v2155_v33 = vstv %s2697_s23  ;;  %s2705_s23 = sld [smem:[#allocation4 + $0x61]] }
 0x2b8   : > { %v1501_v4 = vpop.permute.xlu1 %1500  ;;  %v1483_v43 = vpop.permute.xlu0 %1482  ;;  %v2124_v11 = vsel %vm2065_vm5, %v2121_v31, %v2123_v37  ;;  %v2158_v52 = vmul.f32 %v3735_v45, %v2155_v33 }
 0x2b9   : > { %v1506_v19 = vadd.f32 %v1501_v4, %v1464_v7  ;;  %v1487_v34 = vadd.f32 %v1483_v43, %v1449_v27  ;;  %v1607_v44 = vpop.permute.xlu2 %1606  ;;  %v4125_v7 = vstv %s2678_s30  ;;  %v2137_v27 = vmul.f32 %v4101_v59, %v2135_v47  ;;  %v4129_v4 = vld [vmem:[#allocation3] sm:$0xff]  ;;  %s2949_s30 = smov 48  }
 0x2ba   : > { %v2114_v43 = vmul.f32 %v4129_v4, %v2113_v53  ;;  %v4134_v29 = vmul.f32 %v4101_v59, %v4125_v7  ;;  %v1721_v40 = vmul.f32 %v4003_v41, %v4125_v7  ;;  %v2156_v21 = vmul.f32 %v4129_v4, %v2155_v33 }
 0x2bb   : > { %v4071_v5 = vadd.f32 %v1543_v57, %v1506_v19  ;;  %v1990_v57 = vrot.slane %v4082_v39, 4 }
 0x2bc   : > { %v1728_v15 = vrot.slane %v4134_v29, 4  ;;  %v1727_v53 = vrot.slane %v1721_v40, 4  ;;  %v2162_v20 = vrot.slane %v2156_v21, 6 }
 0x2be   : > { %1948 = vrot.lane.b32.xlu1 %v1942_v2, %s2944_s20  ;;  %1946 = vrot.lane.b32.xlu0 %v1943_v55, %s2944_s20  ;;  %v1729_v3 = vsel %vm194_vm0, %v1727_v53, %v1728_v15 }
 0x2bf   : > { %1970 = vrot.lane.b32.xlu2 %v1967_v24, %s2945_s5  ;;  %v2165_v24 = vrot.slane %v2158_v52, 6 }
 0x2c0   : > { %v1525_v12 = vpop.permute.xlu1 %1524  ;;  %v1523_v36 = vpop.permute.xlu0 %1522 }
 0x2c1   : > { %v1529_v14 = vadd.f32 %v1525_v12, %v1487_v34  ;;  %v1528_v1 = vadd.f32 %v1523_v36, %v4010_v23  ;;  %v4088_v62 = vpop.permute.xlu2 %1628  ;;  %v1991_v23 = vsel %vm194_vm0, %v1989_v9, %v1990_v57  ;;  %v2143_v12 = vrot.slane %v2137_v27, 6  ;;  %v4184_v27 = vld [vmem:[#allocation3 + $0x10] sm:$0x3f] }
 0x2c2   : > { %v2120_v36 = vrot.slane %v2114_v43, 6 }
 0x2c3   : > { %v4091_v42 = vadd.f32 %v1567_v61, %v1529_v14 }
 0x2c6   : > { %1974 = vrot.lane.b32.xlu1 %v1968_v51, %s2945_s5  ;;  %1972 = vrot.lane.b32.xlu0 %v1969_v25, %s2945_s5  ;;  %v4147_v51 = vstv %s4112_s15  ;;  %s2950_s15 = smov 80  }
 0x2c7   : > { %1994 = vrot.lane.b32.xlu2 %v1991_v23, %s2945_s5  ;;  %v2136_v23 = vmul.f32 %v4003_v41, %v2135_v47  ;;  %v4172_v32 = vmul.f32 %v4101_v59, %v4147_v51 }
 0x2c8   : > { %v1565_v58 = vpop.permute.xlu1 %1564  ;;  %v1545_v13 = vpop.permute.xlu0 %1544 }
 0x2c9   : > { %v1570_v16 = vadd.f32 %v1565_v58, %v1528_v1  ;;  %v1549_v8 = vadd.f32 %v1545_v13, %v4025_v35  ;;  %v4108_v61 = vpop.permute.xlu2 %1668  ;;  %v2138_v35 = vmul.f32 %v4116_v28, %v2135_v47  ;;  %v1735_v13 = vadd.f32 %v1729_v3, %v3967_v50 }
 0x2ca   : > { %v2142_v47 = vrot.slane %v2136_v23, 6  ;;  %v2185_v50 = vrot.slane %v4172_v32, 6 }
 0x2cb   : > { %v4110_v22 = vadd.f32 %v1607_v44, %v1570_v16  ;;  %v4136_v44 = vld [vmem:[#allocation3 + $0x8] sm:$0xff]  ;;  %v2145_v55 = vrot.slane %v2138_v35, 6  ;;  %v1739_v16 = vmul.f32 %v4129_v4, %v4152_v56 }
 0x2cc   : > { %v2157_v45 = vmul.f32 %v4136_v44, %v2155_v33  ;;  %v4167_v0 = vmul.f32 %v4136_v44, %v4152_v56  ;;  %v2197_v33 = vstv %s2699_s7  ;;  %v2144_v52 = vsel %vm2065_vm5, %v2142_v47, %v2143_v12  ;;  %s2952_s7 = smov 96  }
 0x2cd   : > { %v2146_v9 = vsel %vm2065_vm5, %v2143_v12, %v2145_v55  ;;  %v1745_v35 = vrot.slane %v1739_v16, 4  ;;  %v2200_v43 = vmul.f32 %v4184_v27, %v2197_v33 }
 0x2ce   : > { %2127 = vrot.lane.b32.xlu1 %v2124_v11, %s2941_s18  ;;  %2107 = vrot.lane.b32.xlu0 %v2104_v30, %s2941_s18  ;;  %v2163_v1 = vrot.slane %v2157_v45, 6  ;;  %v1746_v11 = vrot.slane %v4167_v0, 4 }
 0x2cf   : > { %2105 = vrot.lane.b32.xlu2 %v2102_v48, %s2941_s18  ;;  %v2207_v12 = vrot.slane %v2200_v43, 6 }
 0x2d0   : > { %v1587_v19 = vpop.permute.xlu1 %1586  ;;  %v1585_v34 = vpop.permute.xlu0 %1584  ;;  %v2166_v25 = vsel %vm2065_vm5, %v2163_v1, %v2165_v24  ;;  %v2164_v48 = vsel %vm2065_vm5, %v2162_v20, %v2163_v1  ;;  %v1723_v20 = vmul.f32 %v4116_v28, %v4125_v7 }
 0x2d1   : > { %v1591_v2 = vadd.f32 %v1587_v19, %v1549_v8  ;;  %v1590_v26 = vadd.f32 %v1585_v34, %v4071_v5  ;;  %v1693_v17 = vpop.permute.xlu2 %1692  ;;  %v2122_v5 = vsel %vm2065_vm5, %v2120_v36, %v2121_v31  ;;  %v1747_v19 = vsel %vm194_vm0, %v1745_v35, %v1746_v11 }
 0x2d2   : > { %v2199_v34 = vmul.f32 %v4136_v44, %v2197_v33 }
 0x2d3   : > { %v4144_v14 = vadd.f32 %v4088_v62, %v1591_v2  ;;  %v2180_v62 = vmul.f32 %v4116_v28, %v4147_v51 }
 0x2d5   : > { %v2187_v31 = vrot.slane %v2180_v62, 6 }
 0x2d6   : > { %2149 = vrot.lane.b32.xlu1 %v2146_v9, %s2942_s24  ;;  %2125 = vrot.lane.b32.xlu0 %v2122_v5, %s2941_s18  ;;  %s2700_s18 = sld [smem:[#allocation4 + $0x2e]]  ;;  %v2205_v9 = vrot.slane %v2199_v34, 6 }
 0x2d7   : > { %2169 = vrot.lane.b32.xlu2 %v2166_v25, %s2942_s24 }
 0x2d8   : > { %v1627_v10 = vpop.permute.xlu1 %1626  ;;  %v1609_v58 = vpop.permute.xlu0 %1608  ;;  %v2208_v53 = vsel %vm2065_vm5, %v2205_v9, %v2207_v12 }
 0x2d9   : > { %v1632_v8 = vadd.f32 %v1627_v10, %v1590_v26  ;;  %v1613_v37 = vadd.f32 %v1609_v58, %v4091_v42  ;;  %v1771_v54 = vpop.permute.xlu2 %1770  ;;  %v1985_v42 = vmul.f32 %v4184_v27, %v4075_v38  ;;  %v1753_v38 = vadd.f32 %v1747_v19, %v3985_v46 }
 0x2da   : > { %v1779_v60 = vadd.f32 %v1771_v54, %v1735_v13  ;;  %v1730_v19 = vrot.slane %v1723_v20, 4 }
 0x2db   : > { %v4179_v30 = vadd.f32 %v4108_v61, %v1632_v8  ;;  %v2188_v61 = vsel %vm2065_vm5, %v2185_v50, %v2187_v31  ;;  %v1992_v24 = vrot.slane %v1985_v42, 4 }
 0x2dc   : > { %v2219_v25 = vstv %s2700_s18  ;;  %s2953_s18 = smov 112  }
 0x2dd   : > { %v1993_v5 = vsel %vm194_vm0, %v1990_v57, %v1992_v24  ;;  %v2222_v46 = vmul.f32 %v4116_v28, %v2219_v25  ;;  %v4213_v57 = vmul.f32 %v4101_v59, %v2219_v25  ;;  %v2220_v29 = vmul.f32 %v4003_v41, %v2219_v25 }
 0x2de   : > { %2167 = vrot.lane.b32.xlu1 %v2164_v48, %s2942_s24  ;;  %2147 = vrot.lane.b32.xlu0 %v2144_v52, %s2942_s24  ;;  %s2690_s24 = sld [smem:[#allocation4 + $0x29]] }
 0x2df   : > { %2191 = vrot.lane.b32.xlu2 %v2188_v61, %s2943_s28  ;;  %v2229_v58 = vrot.slane %v2222_v46, 6  ;;  %v2227_v16 = vrot.slane %v4213_v57, 6 }
 0x2e0   : > { %v1651_v45 = vpop.permute.xlu1 %1650  ;;  %v1649_v2 = vpop.permute.xlu0 %1648 }
 0x2e1   : > { %v1655_v26 = vadd.f32 %v1651_v45, %v1613_v37  ;;  %v1654_v55 = vadd.f32 %v1649_v2, %v4110_v22  ;;  %v1795_v40 = vpop.permute.xlu2 %1794  ;;  %v2198_v22 = vmul.f32 %v4129_v4, %v2197_v33  ;;  %v2239_v37 = vstv %s2701_s8 }
 0x2e2   : > { %v1803_v36 = vadd.f32 %v1795_v40, %v1753_v38  ;;  %v4246_v2 = vstv %s2691_s14  ;;  %v1741_v40 = vmul.f32 %v4184_v27, %v4152_v56 }
 0x2e3   : > { %v4199_v1 = vadd.f32 %v1693_v17, %v1655_v26  ;;  %v2178_v17 = vmul.f32 %v4003_v41, %v4147_v51  ;;  %v2204_v13 = vrot.slane %v2198_v22, 6 }
 0x2e4   : > { %v4219_v8 = vstv %s2690_s24  ;;  %s2714_s24 = sshll.u32 %s2990_s13, 3 }
 0x2e5   : > { %v2184_v32 = vrot.slane %v2178_v17, 6  ;;  %v2206_v51 = vsel %vm2065_vm5, %v2204_v13, %v2205_v9  ;;  %v2011_v31 = vmul.f32 %v4116_v28, %v4219_v8  ;;  %v4234_v47 = vmul.f32 %v4101_v59, %v4219_v8 }
 0x2e6   : > { %1996 = vrot.lane.b32.xlu1 %v1993_v5, %s2945_s5  ;;  %2211 = vrot.lane.b32.xlu0 %v2208_v53, %s2943_s28  ;;  %v1748_v17 = vrot.slane %v1741_v40, 4 }
 0x2e7   : > { %1998 = vrot.lane.b32.xlu2 %v1992_v24, %s2945_s5  ;;  %v2186_v54 = vsel %vm2065_vm5, %v2184_v32, %v2185_v50  ;;  %v4237_v50 = vmul.f32 %v4136_v44, %v2239_v37  ;;  %v2018_v43 = vrot.slane %v2011_v31, 4  ;;  %v2016_v34 = vrot.slane %v4234_v47, 4 }
 0x2e8   : > { %v1691_v62 = vpop.permute.xlu1 %1690  ;;  %v1671_v39 = vpop.permute.xlu0 %1670  ;;  %v1737_v24 = vadd.f32 %v1730_v19, %v4035_v49  ;;  %v2226_v49 = vrot.slane %v2220_v29, 6  ;;  %v1755_v13 = vadd.f32 %v1748_v17, %v4051_v63 }
 0x2e9   : > { %v4215_v3 = vadd.f32 %v1691_v62, %v1654_v55  ;;  %v1675_v21 = vadd.f32 %v1671_v39, %v4144_v14  ;;  %v1821_v23 = vpop.permute.xlu2 %1820  ;;  %v2242_v14 = vmul.f32 %v4184_v27, %v2239_v37  ;;  %v2247_v45 = vrot.slane %v4237_v50, 6 }
 0x2ea   : > { %v1829_v10 = vadd.f32 %v1821_v23, %v1779_v60  ;;  %v2230_v60 = vsel %vm2065_vm5, %v2227_v16, %v2229_v58  ;;  %v2019_v38 = vsel %vm194_vm0, %v2016_v34, %v2018_v43  ;;  %v1731_v55 = vsel %vm194_vm0, %v1728_v15, %v1730_v19 }
 0x2eb   : > { %v2249_v61 = vrot.slane %v2242_v14, 6  ;;  %v1736_v12 = vadd.f32 %v1731_v55, %v4037_v6  ;;  %v2281_v23 = vstv %s2703_s17  ;;  %v2228_v25 = vsel %vm2065_vm5, %v2226_v49, %v2227_v16  ;;  %s175_s17 = scalar_lea.vmem [#allocation9], %s2607_s29  ;;  %s2879_s29 = scalar_lea.hbm %s4411_s2, 16 }
 0x2ec   : > { %v2284_v58 = vmul.f32 %v4184_v27, %v2281_v23  ;;  %v4287_v16 = vmul.f32 %v4136_v44, %v2281_v23  ;;  %v2282_v47 = vmul.f32 %v4129_v4, %v2281_v23  ;;  %s2513_s13 = sshll.u32 %s175_s17, 4  ;;  %s2514_s13 = int_to_ptr.vmem [resolvable:$true] %s2513_s13 }
 0x2ed   : > { %v2250_v26 = vsel %vm2065_vm5, %v2247_v45, %v2249_v61 }
 0x2ee   : > { %2209 = vrot.lane.b32.xlu1 %v2206_v51, %s2943_s28  ;;  %2189 = vrot.lane.b32.xlu0 %v2186_v54, %s2943_s28  ;;  %s2702_s28 = sld [smem:[#allocation4 + $0x2f]]  ;;  %v4284_v51 = vstv %s2692_s19  ;;  %v2291_v50 = vrot.slane %v2284_v58, 6 }
 0x2ef   : > { %2233 = vrot.lane.b32.xlu2 %v2230_v60, %s2944_s20  ;;  %v4291_v0 = vmul.f32 %v4101_v59, %v4284_v51 }
 0x2f0   : > { %v1713_v35 = vpop.permute.xlu1 %1712  ;;  %v1711_v33 = vpop.permute.xlu0 %1710 }
 0x2f1   : > { %v4239_v48 = vadd.f32 %v1713_v35, %v1675_v21  ;;  %v4242_v52 = vadd.f32 %v1711_v33, %v4179_v30  ;;  %v1845_v42 = vpop.permute.xlu2 %1844  ;;  %v2035_v30 = vmul.f32 %v4184_v27, %v4246_v2  ;;  %v2240_v21 = vmul.f32 %v4129_v4, %v2239_v37 }
 0x2f2   : > { %v1853_v7 = vadd.f32 %v1845_v42, %v1803_v36  ;;  %v4266_v36 = vmul.f32 %v4136_v44, %v4246_v2  ;;  %v2289_v42 = vrot.slane %v4287_v16, 6 }
 0x2f3   : > { %v2042_v22 = vrot.slane %v2035_v30, 4  ;;  %v2246_v33 = vrot.slane %v2240_v21, 6  ;;  %v2009_v30 = vmul.f32 %v4003_v41, %v4219_v8 }
 0x2f4   : > { %v2040_v62 = vrot.slane %v4266_v36, 4  ;;  %v2261_v39 = vstv %s2702_s28  ;;  %s2511_s28 = scalar_lea.hbm %s4411_s2, %s2714_s24 }
 0x2f5   : > { %v2264_v57 = vmul.f32 %v4116_v28, %v2261_v39  ;;  %v2263_v37 = vmul.f32 %v4101_v59, %v2261_v39  ;;  %v2248_v19 = vsel %vm2065_vm5, %v2246_v33, %v2247_v45  ;;  %v2262_v45 = vmul.f32 %v4003_v41, %v2261_v39  ;;  %s2515_s19 = sshll.u32 %s2511_s28, 4  ;;  %s2516_s19 = int_to_ptr.hbm [resolvable:$true] %s2515_s19 }
 0x2f6   : > { %2022 = vrot.lane.b32.xlu1 %v2019_v38, %s2946_s6  ;;  %2253 = vrot.lane.b32.xlu0 %v2250_v26, %s2944_s20  ;;  %v2043_v6 = vsel %vm194_vm0, %v2040_v62, %v2042_v22  ;;  %v2033_v26 = vmul.f32 %v4129_v4, %v4246_v2  ;;  %v2015_v2 = vrot.slane %v2009_v30, 4 }
 0x2f7   : > { %2024 = vrot.lane.b32.xlu2 %v2018_v43, %s2946_s6  ;;  %v2271_v20 = vrot.slane %v2264_v57, 6  ;;  %v2269_v35 = vrot.slane %v2263_v37, 6  ;;  %v2067_v43 = vrot.slane %v4291_v0, 6  ;;  %v2288_v37 = vrot.slane %v2282_v47, 6 }
 0x2f8   : > { %v1775_v9 = vpop.permute.xlu1 %1774  ;;  %v1773_v5 = vpop.permute.xlu0 %1772  ;;  %v2017_v49 = vsel %vm194_vm0, %v2015_v2, %v2016_v34 }
 0x2f9   : > { %v1781_v53 = vadd.f32 %v1775_v9, %v1737_v24  ;;  %v1780_v15 = vadd.f32 %v1773_v5, %v1736_v12  ;;  %v1871_v46 = vpop.permute.xlu2 %1870  ;;  %v2272_v61 = vsel %vm2065_vm5, %v2269_v35, %v2271_v20  ;;  %v2290_v16 = vsel %vm2065_vm5, %v2288_v37, %v2289_v42 }
 0x2fa   : > { %v1879_v56 = vadd.f32 %v1871_v46, %v1829_v10  ;;  %v1749_v10 = vsel %vm194_vm0, %v1746_v11, %v1748_v17  ;;  %v2039_v46 = vrot.slane %v2033_v26, 4  ;;  %v2303_v17 = vstv %s2704_s22  ;;  %s2500_s22 = scalar_lea.sflag [#allocation6], %s3066_s27 }
 0x2fb   : > { %v1754_v32 = vadd.f32 %v1749_v10, %v4053_v18  ;;  %v2059_v18 = vmul.f32 %v4003_v41, %v4284_v51  ;;  %v2306_v39 = vmul.f32 %v4116_v28, %v2303_v17 }
 0x2fc   : > { %v2041_v8 = vsel %vm194_vm0, %v2039_v46, %v2040_v62 }
 0x2fd   : > { %v2066_v38 = vrot.slane %v2059_v18, 6  ;;  %v2313_v10 = vrot.slane %v2306_v39, 6 }
 0x2fe   : > { %2048 = vrot.lane.b32.xlu1 %v2042_v22, %s2946_s6  ;;  %2046 = vrot.lane.b32.xlu0 %v2043_v6, %s2946_s6  ;;  %v2268_v22 = vrot.slane %v2262_v45, 6  ;;  %v2323_v6 = vstv %s2705_s23  ;;  %s2873_s23 = sshra.s32 %s2516_s19, 4  ;;  %s2874_s23 = int_to_ptr.hbm [resolvable:$true] %s2873_s23 }
 0x2ff   : > { %2231 = vrot.lane.b32.xlu2 %v2228_v25, %s2944_s20  ;;  %v2068_v24 = vsel %vm2065_vm5, %v2066_v38, %v2067_v43  ;;  %v2325_v62 = vmul.f32 %v4136_v44, %v2323_v6  ;;  %p2880_p9 = scmp.lt.s32.totalorder %s2874_s23, %s4411_s2 }
 0x300   : > { %v1799_v54 = vpop.permute.xlu1 %1798  ;;  %v1797_v31 = vpop.permute.xlu0 %1796  ;;  %v4312_v5 = vadd.f32 %v2068_v24, %v4215_v3  ;;  %v2270_v3 = vsel %vm2065_vm5, %v2268_v22, %v2269_v35 }
 0x301   : > { %v1805_v11 = vadd.f32 %v1799_v54, %v1755_v13  ;;  %v1804_v14 = vadd.f32 %v1797_v31, %v1754_v32  ;;  %v1895_v60 = vpop.permute.xlu2 %1894  ;;  %v2331_v54 = vrot.slane %v2325_v62, 6 }
 0x302   : > { %v1903_v63 = vadd.f32 %v1895_v60, %v1853_v7  ;;  %v2292_v7 = vsel %vm2065_vm5, %v2289_v42, %v2291_v50  ;;  %v2061_v50 = vmul.f32 %v4116_v28, %v4284_v51 }
 0x304   : > { %v2069_v26 = vrot.slane %v2061_v50, 6 }
 0x306   : > { %2275 = vrot.lane.b32.xlu1 %v2272_v61, %s2945_s5  ;;  %2251 = vrot.lane.b32.xlu0 %v2248_v19, %s2944_s20  ;;  %s2693_s20 = sld [smem:[#allocation4 + $0x5b]] }
 0x307   : > { %2295 = vrot.lane.b32.xlu2 %v2292_v7, %s2945_s5 }
 0x308   : > { %v1825_v55 = vpop.permute.xlu1 %1824  ;;  %v1823_v40 = vpop.permute.xlu0 %1822 }
 0x309   : > { %v1831_v12 = vadd.f32 %v1825_v55, %v1781_v53  ;;  %v1830_v36 = vadd.f32 %v1823_v40, %v1780_v15  ;;  %v1921_v9 = vpop.permute.xlu2 %1920  ;;  %v2326_v53 = vmul.f32 %v4184_v27, %v2323_v6  ;;  %v2305_v15 = vmul.f32 %v4101_v59, %v2303_v17 }
 0x30a   : > { %v1929_v29 = vadd.f32 %v1921_v9, %v1879_v56  ;;  %v2070_v40 = vsel %vm2065_vm5, %v2067_v43, %v2069_v26 }
 0x30b   : > { %v2333_v13 = vrot.slane %v2326_v53, 6  ;;  %v2311_v32 = vrot.slane %v2305_v15, 6 }
 0x30c   : > { %v2075_v23 = vstv %s2693_s20  ;;  %s2875_s20 = scalar_lea.hbm %s2874_s23, 8 }
 0x30d   : > { %v2314_v31 = vsel %vm2065_vm5, %v2311_v32, %v2313_v10  ;;  %v2334_v59 = vsel %vm2065_vm5, %v2331_v54, %v2333_v13  ;;  %v2078_v60 = vmul.f32 %v4184_v27, %v2075_v23  ;;  %v2077_v42 = vmul.f32 %v4136_v44, %v2075_v23  ;;  %p2876_p1 = scmp.ne.s32.totalorder %s2874_s23, %s2875_s20  ;;  %p2881_p10 = scmp.lt.s32.totalorder %s2879_s29, %s2875_s20 }
 0x30e   : > { %2044 = vrot.lane.b32.xlu1 %v2041_v8, %s2946_s6  ;;  %2020 = vrot.lane.b32.xlu0 %v2017_v49, %s2946_s6 }
 0x30f   : > { %2273 = vrot.lane.b32.xlu2 %v2270_v3, %s2945_s5  ;;  %v2085_v38 = vrot.slane %v2078_v60, 6  ;;  %v2083_v30 = vrot.slane %v2077_v42, 6  ;;  %p2877_p4 = pnand %p2876_p1, %p3035_p3  ;;  %p2882_p2 = por %p2881_p10, %p2880_p9 }
 0x310   : > { %v1849_v56 = vpop.permute.xlu1 %1848  ;;  %v1847_v34 = vpop.permute.xlu0 %1846 }
 0x311   : > { %v1855_v57 = vadd.f32 %v1849_v56, %v1805_v11  ;;  %v1854_v21 = vadd.f32 %v1847_v34, %v1804_v14  ;;  %v1945_v25 = vpop.permute.xlu2 %1944  ;;  %v2324_v11 = vmul.f32 %v4129_v4, %v2323_v6  ;;  %v2304_v14 = vmul.f32 %v4003_v41, %v2303_v17  ;;  %p2878_p8 = pneg %p2877_p4 }
 0x312   : > { %v1953_v58 = vadd.f32 %v1945_v25, %v1903_v63  ;;  %v2086_v28 = vsel %vm2065_vm5, %v2083_v30, %v2085_v38 }
 0x313   : > { %v2330_v19 = vrot.slane %v2324_v11, 6  ;;  %v2310_v7 = vrot.slane %v2304_v14, 6  ;;  %v2090_v44 = vadd.f32 %v2086_v28, %v4239_v48  ;;  %p2883_p11 = pnand %p2882_p2, %p2878_p8 }
 0x315   : > { %v2332_v41 = vsel %vm2065_vm5, %v2330_v19, %v2331_v54  ;;  %v2312_v27 = vsel %vm2065_vm5, %v2310_v7, %v2311_v32 }
 0x316   : > { %2317 = vrot.lane.b32.xlu1 %v2314_v31, %s2946_s6  ;;  %2293 = vrot.lane.b32.xlu0 %v2290_v16, %s2945_s5  ;;  %s2947_s5 = smov 32  }
 0x317   : > { %2337 = vrot.lane.b32.xlu2 %v2334_v59, %s2946_s6 }
 0x318   : > { %v1875_v20 = vpop.permute.xlu1 %1874  ;;  %v1873_v63 = vpop.permute.xlu0 %1872 }
 0x319   : > { %v1881_v18 = vadd.f32 %v1875_v20, %v1831_v12  ;;  %v1880_v35 = vadd.f32 %v1873_v63, %v1830_v36  ;;  %v1971_v33 = vpop.permute.xlu2 %1970  ;;  %v4351_v36 = vadd.f32 %v2070_v40, %v4199_v1 }
 0x31a   : > { %v4339_v61 = vadd.f32 %v1971_v33, %v1929_v29  ;;  %v2076_v29 = vmul.f32 %v4129_v4, %v2075_v23 }
 0x31c   : > { %v2082_v46 = vrot.slane %v2076_v29, 6 }
 0x31e   : > { %2335 = vrot.lane.b32.xlu1 %v2332_v41, %s2946_s6  ;;  %2315 = vrot.lane.b32.xlu0 %v2312_v27, %s2946_s6  ;;  %v2084_v17 = vsel %vm2065_vm5, %v2082_v46, %v2083_v30  ;;  %s2948_s6 = smov 16   ;;  %vm2476_vm5 = vcmask 785408  }
 0x31f   : > { %v4358_v43 = vadd.f32 %v2084_v17, %v4242_v52 }
 0x320   : > { %v1899_v51 = vpop.permute.xlu1 %1898  ;;  %v1897_v55 = vpop.permute.xlu0 %1896 }
 0x321   : > { %v1905_v45 = vadd.f32 %v1899_v51, %v1855_v57  ;;  %v1904_v24 = vadd.f32 %v1897_v55, %v1854_v21  ;;  %v1995_v12 = vpop.permute.xlu2 %1994 }
 0x322   : > { %v4353_v9 = vadd.f32 %v1995_v12, %v1953_v58 }
 0x328   : > { %v1925_v2 = vpop.permute.xlu1 %1924  ;;  %v1923_v22 = vpop.permute.xlu0 %1922 }
 0x329   : > { %v1931_v48 = vadd.f32 %v1925_v2, %v1881_v18  ;;  %v1930_v8 = vadd.f32 %v1923_v22, %v1880_v35  ;;  %v2106_v0 = vpop.permute.xlu2 %2105 }
 0x32a   : > { %v4361_v49 = vadd.f32 %v2106_v0, %v4312_v5 }
 0x330   : > { %v1949_v1 = vpop.permute.xlu1 %1948  ;;  %v1947_v39 = vpop.permute.xlu0 %1946 }
 0x331   : > { %v1955_v6 = vadd.f32 %v1949_v1, %v1905_v45  ;;  %v1954_v3 = vadd.f32 %v1947_v39, %v1904_v24  ;;  %v2170_v53 = vpop.permute.xlu2 %2169 }
 0x338   : > { %v1975_v4 = vpop.permute.xlu1 %1974  ;;  %v1973_v15 = vpop.permute.xlu0 %1972 }
 0x339   : > { %v1981_v47 = vadd.f32 %v1975_v4, %v1931_v48  ;;  %v1980_v56 = vadd.f32 %v1973_v15, %v1930_v8  ;;  %v2192_v34 = vpop.permute.xlu2 %2191 }
 0x340   : > { %v2128_v62 = vpop.permute.xlu1 %2127  ;;  %v2108_v57 = vpop.permute.xlu0 %2107 }
 0x341   : > { %v1999_v21 = vpop.permute.xlu2 %1998  ;;  %v2132_v23 = vadd.f32 %v2128_v62, %v2090_v44  ;;  %v2112_v46 = vadd.f32 %v2108_v57, %v4351_v36 }
 0x342   : > { %v2005_v7 = vadd.f32 %v1999_v21, %v1955_v6 }
 0x343   : > { %v2174_v50 = vadd.f32 %v2170_v53, %v2132_v23 }
 0x348   : > { %v2150_v25 = vpop.permute.xlu1 %2149  ;;  %v2126_v10 = vpop.permute.xlu0 %2125 }
 0x349   : > { %v2234_v52 = vpop.permute.xlu2 %2233  ;;  %v2154_v2 = vadd.f32 %v2150_v25, %v2112_v46 }
 0x34b   : > { %v2196_v48 = vadd.f32 %v2192_v34, %v2154_v2 }
 0x34d   : > { %v2238_v1 = vadd.f32 %v2234_v52, %v2196_v48 }
 0x350   : > { %v2168_v58 = vpop.permute.xlu1 %2167  ;;  %v2148_v13 = vpop.permute.xlu0 %2147 }
 0x351   : > { %v2025_v5 = vpop.permute.xlu2 %2024 }
 0x352   : > { %v2031_v11 = vadd.f32 %v2025_v5, %v1981_v47  ;;  %v2153_v47 = vadd.f32 %v2148_v13, %v4361_v49 }
 0x354   : > { %v2350_v18 = vrot.slane %v2031_v11, 1 }
 0x358   : > { %v1997_v32 = vpop.permute.xlu1 %1996  ;;  %v2212_v37 = vpop.permute.xlu0 %2211 }
 0x359   : > { %v2232_v54 = vpop.permute.xlu2 %2231  ;;  %v2216_v33 = vadd.f32 %v2212_v37, %v2174_v50  ;;  %v2004_v38 = vadd.f32 %v1997_v32, %v1954_v3  ;;  %v2131_v3 = vadd.f32 %v2126_v10, %v4358_v43 }
 0x35b   : > { %v2173_v15 = vadd.f32 %v2168_v58, %v2131_v3 }
 0x360   : > { %v2210_v31 = vpop.permute.xlu1 %2209  ;;  %v2190_v16 = vpop.permute.xlu0 %2189 }
 0x361   : > { %v2296_v59 = vpop.permute.xlu2 %2295  ;;  %v2215_v57 = vadd.f32 %v2210_v31, %v2173_v15 }
 0x368   : > { %v2023_v14 = vpop.permute.xlu1 %2022  ;;  %v2254_v60 = vpop.permute.xlu0 %2253 }
 0x369   : > { %v2030_v20 = vadd.f32 %v2023_v14, %v1980_v56  ;;  %v2274_v63 = vpop.permute.xlu2 %2273  ;;  %v2258_v19 = vadd.f32 %v2254_v60, %v2216_v33 }
 0x36b   : > { %v2348_v35 = vrot.slane %v2030_v20, 1  ;;  %v2300_v51 = vadd.f32 %v2296_v59, %v2258_v19 }
 0x36d   : > { %v2351_v42 = vsel %vm2346_vm6, %v2348_v35, %v2350_v18 }
 0x370   : > { %v2049_v26 = vpop.permute.xlu1 %2048  ;;  %v2047_v41 = vpop.permute.xlu0 %2046 }
 0x371   : > { %v2055_v27 = vadd.f32 %v2049_v26, %v2005_v7  ;;  %v2054_v30 = vadd.f32 %v2047_v41, %v2004_v38  ;;  %v2338_v28 = vpop.permute.xlu2 %2337 }
 0x372   : > { %v2342_v40 = vadd.f32 %v2338_v28, %v2300_v51 }
 0x373   : > { %v2362_v55 = vrot.slane %v2055_v27, 1  ;;  %v2360_v44 = vrot.slane %v2054_v30, 1 }
 0x375   : > { %v2363_v45 = vsel %vm2346_vm6, %v2360_v44, %v2362_v55 }
 0x376   : > { %v2367_v24 = vadd.f32 %v2363_v45, %v2342_v40 }
 0x378   : > { %v2276_v12 = vpop.permute.xlu1 %2275  ;;  %v2252_v29 = vpop.permute.xlu0 %2251 }
 0x379   : > { %v2280_v53 = vadd.f32 %v2276_v12, %v2238_v1 }
 0x380   : > { %v2045_v22 = vpop.permute.xlu1 %2044  ;;  %v2021_v17 = vpop.permute.xlu0 %2020 }
 0x381   : > { %v2053_v8 = vadd.f32 %v2045_v22, %v4353_v9  ;;  %v2029_v0 = vadd.f32 %v2021_v17, %v4339_v61  ;;  %v2195_v9 = vadd.f32 %v2190_v16, %v2153_v47  ;;  %v2257_v61 = vadd.f32 %v2252_v29, %v2215_v57 }
 0x383   : > { %v2359_v39 = vrot.slane %v2053_v8, 1  ;;  %v2347_v6 = vrot.slane %v2029_v0, 1  ;;  %v2237_v52 = vadd.f32 %v2232_v54, %v2195_v9 }
 0x385   : > { %v2361_v62 = vsel %vm2346_vm6, %v2359_v39, %v2360_v44  ;;  %v2349_v34 = vsel %vm2346_vm6, %v2347_v6, %v2348_v35  ;;  %v2279_v10 = vadd.f32 %v2274_v63, %v2237_v52  ;;  %vm2478_vm6 = vcmask 916480  }
 0x388   : > { %v2318_v4 = vpop.permute.xlu1 %2317  ;;  %v2294_v36 = vpop.permute.xlu0 %2293 }
 0x389   : > { %v2322_v56 = vadd.f32 %v2318_v4, %v2280_v53  ;;  %v2299_v32 = vadd.f32 %v2294_v36, %v2257_v61 }
 0x38b   : > { %v2355_v21 = vadd.f32 %v2351_v42, %v2322_v56 }
 0x38d   : > { %v2369_v25 = vadd.f32 %v2367_v24, %v2355_v21 }
 0x38f   : > { %v2707_v5 = vmul.f32 -1.442695, %v2369_v25 }
 0x390   : > { %v2336_v43 = vpop.permute.xlu1 %2335  ;;  %v2316_v37 = vpop.permute.xlu0 %2315 }
 0x391   : > { %2794 = vpow2.f32 %v2707_v5  ;;  %v2341_v58 = vadd.f32 %v2336_v43, %v2299_v32  ;;  %v2321_v13 = vadd.f32 %v2316_v37, %v2279_v10 }
 0x393   : > { %v2366_v49 = vadd.f32 %v2361_v62, %v2341_v58  ;;  %v2354_v59 = vadd.f32 %v2349_v34, %v2321_v13 }
 0x395   : > { %v2368_v11 = vadd.f32 %v2366_v49, %v2354_v59 }
 0x397   : > { %v2795_v23 = vpop.eup %2794  ;;  %v2706_v60 = vmul.f32 -1.442695, %v2368_v11 }
 0x398   : > { %v2377_v14 = vadd.f32 1.0, %v2795_v23 }
 0x39a   : > { %2796 = vrcp.f32 %v2377_v14  ;;  %v2404_v18 = vand.u32 2147483648, %v2377_v14  ;;  %v2402_v35 = vand.u32 2147483647, %v2377_v14  ;;  %vm2398_vm8 = vweird.f32 %v2377_v14 }
 0x39b   : > { %2798 = vpow2.f32 %v2706_v60 }
 0x39c   : > { %v2405_v42 = vor.u32 1.1754944e-38, %v2404_v18  ;;  %vm2403_vm10 = vcmp.eq.f32.partialorder %v2402_v35, 8.507059e+37 }
 0x3a0   : > { %v2797_v31 = vpop.eup %2796 }
 0x3a1   : > { %v2799_v16 = vpop.eup %2798  ;;  %v2394_v20 = vmul.f32 %v2797_v31, %v2377_v14  ;;  %vm2399_vm7 = vweird.f32 %v2797_v31 }
 0x3a2   : > { %v2376_v54 = vadd.f32 1.0, %v2799_v16  ;;  %vm2400_vm9 = vmor %vm2398_vm8, %vm2399_vm7 }
 0x3a3   : > { %v2395_v50 = vsub.f32 1.0, %v2394_v20 }
 0x3a4   : > { %2800 = vrcp.f32 %v2376_v54  ;;  %v2389_v28 = vand.u32 2147483648, %v2376_v54  ;;  %v2387_v55 = vand.u32 2147483647, %v2376_v54  ;;  %vm2383_vm12 = vweird.f32 %v2376_v54 }
 0x3a5   : > { %v2396_v63 = vmul.f32 %v2797_v31, %v2395_v50 }
 0x3a6   : > { %v2390_v40 = vor.u32 1.1754944e-38, %v2389_v28  ;;  %vm2388_vm14 = vcmp.eq.f32.partialorder %v2387_v55, 8.507059e+37 }
 0x3a7   : > { %v2397_v33 = vadd.f32 %v2797_v31, %v2396_v63 }
 0x3a9   : > { %v2401_v19 = vsel %vm2400_vm9, %v2797_v31, %v2397_v33 }
 0x3aa   : > { %v2801_v7 = vpop.eup %2800  ;;  %v2406_v38 = vsel %vm2403_vm10, %v2405_v42, %v2401_v19 }
 0x3ab   : > { %v2379_v26 = vmul.f32 %v2801_v7, %v2376_v54  ;;  %v2442_v41 = vrot.slane %v2406_v38, 2  ;;  %v2438_v27 = vrot.slane %v2406_v38, 1  ;;  %vm2384_vm11 = vweird.f32 %v2801_v7  ;;  %v2487_v54 = vld [vmem:[%s3072_s3] sm:$0xff] }
 0x3ac   : > { %vm2385_vm13 = vmor %vm2383_vm12, %vm2384_vm11  ;;  %v2446_v24 = vrot.slane %v2406_v38, 3  ;;  %v2454_v22 = vrot.slane %v2406_v38, 5  ;;  %v2450_v17 = vrot.slane %v2406_v38, 4  ;;  %v2458_v48 = vrot.slane %v2406_v38, 6 }
 0x3ad   : > { %v2380_v30 = vsub.f32 1.0, %v2379_v26  ;;  %2443 = vrot.lane.b32.xlu0 %v2442_v41, %s2947_s5  ;;  %2439 = vrot.lane.b32.xlu2 %v2438_v27, %s2948_s6  ;;  %v2462_v6 = vrot.slane %v2406_v38, 7 }
 0x3af   : > { %v2381_v51 = vmul.f32 %v2801_v7, %v2380_v30 }
 0x3b1   : > { %v2382_v44 = vadd.f32 %v2801_v7, %v2381_v51 }
 0x3b3   : > { %v2386_v45 = vsel %vm2385_vm13, %v2801_v7, %v2382_v44 }
 0x3b4   : > { %v2391_v12 = vsel %vm2388_vm14, %v2390_v40, %v2386_v45 }
 0x3b5   : > { %2447 = vrot.lane.b32.xlu2 %v2446_v24, %s2949_s30  ;;  %v2413_v29 = vrot.slane %v2391_v12, 2  ;;  %v2409_v46 = vrot.slane %v2391_v12, 1  ;;  %v2417_v2 = vrot.slane %v2391_v12, 3  ;;  %v2425_v8 = vrot.slane %v2391_v12, 5 }
 0x3b6   : > { %v2421_v0 = vrot.slane %v2391_v12, 4  ;;  %v2429_v1 = vrot.slane %v2391_v12, 6  ;;  %v2433_v39 = vrot.slane %v2391_v12, 7 }
 0x3b7   : > { %2414 = vrot.lane.b32.xlu0 %v2413_v29, %s2947_s5  ;;  %2410 = vrot.lane.b32.xlu1 %v2409_v46, %s2948_s6 }
 0x3bd   : > { %2418 = vrot.lane.b32.xlu2 %v2417_v2, %s2949_s30 }
 0x3bf   : > { %2455 = vrot.lane.b32.xlu0 %v2454_v22, %s2950_s15  ;;  %2451 = vrot.lane.b32.xlu1 %v2450_v17, %s2951_s4 }
 0x3c5   : > { %2459 = vrot.lane.b32.xlu2 %v2458_v48, %s2952_s7 }
 0x3c7   : > { %2426 = vrot.lane.b32.xlu0 %v2425_v8, %s2950_s15  ;;  %2422 = vrot.lane.b32.xlu1 %v2421_v0, %s2951_s4 }
 0x3cd   : > { %2430 = vrot.lane.b32.xlu2 %v2429_v1, %s2952_s7 }
 0x3cf   : > { %2434 = vrot.lane.b32.xlu0 %v2433_v39, %s2953_s18  ;;  %2463 = vrot.lane.b32.xlu1 %v2462_v6, %s2953_s18 }
 0x407   : > { %v2440_v3 = vpop.permute.xlu2 %2439 }
 0x408   : > { %v2480_v57 = vsel %vm2466_vm15, %v2406_v38, %v2440_v3 }
 0x40f   : > { %v2448_v4 = vpop.permute.xlu2 %2447 }
 0x417   : > { %v2419_v56 = vpop.permute.xlu2 %2418 }
 0x41f   : > { %v2444_v53 = vpop.permute.xlu0 %2443  ;;  %v2460_v9 = vpop.permute.xlu2 %2459 }
 0x420   : > { %v2481_v21 = vsel %vm2468_vm1, %v2480_v57, %v2444_v53 }
 0x421   : > { %v2482_v5 = vsel %vm2470_vm2, %v2481_v21, %v2448_v4 }
 0x427   : > { %v2431_v49 = vpop.permute.xlu2 %2430 }
 0x429   : > { %v2415_v15 = vpop.permute.xlu0 %2414  ;;  %v2411_v47 = vpop.permute.xlu1 %2410 }
 0x42a   : > { %v2467_v34 = vsel %vm2466_vm15, %v2391_v12, %v2411_v47 }
 0x42b   : > { %v2469_v61 = vsel %vm2468_vm1, %v2467_v34, %v2415_v15 }
 0x42c   : > { %v2471_v32 = vsel %vm2470_vm2, %v2469_v61, %v2419_v56 }
 0x431   : > { %v2456_v36 = vpop.permute.xlu0 %2455  ;;  %v2452_v62 = vpop.permute.xlu1 %2451 }
 0x432   : > { %v2483_v43 = vsel %vm2472_vm3, %v2482_v5, %v2452_v62 }
 0x433   : > { %v2484_v58 = vsel %vm2474_vm4, %v2483_v43, %v2456_v36 }
 0x434   : > { %v2485_v23 = vsel %vm2476_vm5, %v2484_v58, %v2460_v9 }
 0x439   : > { %v2427_v25 = vpop.permute.xlu0 %2426  ;;  %v2423_v52 = vpop.permute.xlu1 %2422 }
 0x43a   : > { %v2473_v10 = vsel %vm2472_vm3, %v2471_v32, %v2423_v52 }
 0x43b   : > { %v2475_v37 = vsel %vm2474_vm4, %v2473_v10, %v2427_v25 }
 0x43c   : > { %v2477_v59 = vsel %vm2476_vm5, %v2475_v37, %v2431_v49 }
 0x441   : > { %v2435_v13 = vpop.permute.xlu0 %2434  ;;  %v2464_v11 = vpop.permute.xlu1 %2463 }
 0x442   : > { %v2479_v14 = vsel %vm2478_vm6, %v2477_v59, %v2435_v13  ;;  %v2486_v60 = vsel %vm2478_vm6, %v2485_v23, %v2464_v11 }
 0x443   : > { %v2489_v31 = vperm.slane %v2486_v60, 0  ;;  %v2488_v16 = vperm.slane %v2479_v14, 0 }
 0x445   : > { %v2492_v20 = vrot.slane %v2489_v31, 4 }
 0x447   : > { %v2493_v50 = vsel %vm194_vm0, %v2488_v16, %v2492_v20 }
 0x448   : > { %v2495_v18 = vmul.f32 %v2493_v50, %v2487_v54 }
 0x44a   : > { %2498 = vst [vmem:[%s175_s17] sm:$0xff] %v2495_v18 }
 0x44b   : > { %2886 = shalt.err (!%p2883_p11)
}
 0x44c   : > { %2721 = dma.vmem_to_hbm [thread:$0]  (%p3035_p3), %s2514_s13, 128, %s2516_s19, %s2500_s22  }
 0x44d PF: > { %s2527_s27 = sand.u32 1, %s2917_s9   ;;  %p4467_p12 = scmp.ge.s32.totalorder %s2929_s12, 2 }
 0x44e   : > { %s2528_s15 = scalar_lea.sflag [#allocation6], %s2527_s27 }
 0x44f   : > { %p2732_p13 = pnand %p4467_p12, %p3004_p6 }
 0x451   : > { %p2733_p0 = pneg %p2732_p13 }
 0x453   : > { %2912 = dma.done.wait (%p2733_p0), %s2528_s15, 128  }
 0x454   : > { %2914 = vsyncadd (%p2733_p0), %s2528_s15, 4294967168  ;;  %p16_p5 = scmp.ge.s32.totalorder %s3020_s21, 4   ;;  %s4468_s9 = smov %s2921_s10 }
 0x455   : > { %s4469_s10 = smov %s2925_s11  ;;  %s4470_s11 = smov %s3030_s25 }
 0x456   : > { %s4471_s12 = smov %s3020_s21  ;;  %18 = sbr.rel (!%p16_p5) target bundleno = 6 (0x6), region = 80 }
 0x45b   :  { %2534 = vsyncpa [#allocation5], 1 }
 0x45c   :  { %2536 = vsyncpa [#allocation5 + $0x1], 1 }
 0x45d   :  { %2537 = vsyncpa [#allocation6], 1 }
 0x45e   :  { %2539 = vsyncpa [#allocation6 + $0x1], 1 }
 0x45f   :  { %2540 = vsyncpa [#allocation7], 1 }
 0x460   :  { %2542 = vsyncpa [#allocation7 + $0x1], 1 }

</bundles_post_ra>
